<compile_context>
chip_gen: v6e
topology: v6e:2x2x1
jax: 0.10.0
libtpu: 0.0.40
codegen_flags: <defaults>
</compile_context>

<pallas_src>
import functools

import jax
import jax.numpy as jnp
from jax import lax
from jax.experimental import pallas as pl
from jax.experimental.pallas import tpu as pltpu


# ---------------------------------------------------------------------------
# helpers
# ---------------------------------------------------------------------------
def _pick_batch_tile(batch, rows_per_image, target_rows, align=8,
                     want_two_blocks=True):
    """Largest divisor t of `batch` with t*rows_per_image <= ~target_rows and an
    `align`-aligned block row count (or the block covering the full array).
    If want_two_blocks, keep at least 2 grid blocks (v7x has 2 TensorCores)."""
    cap = max(1, target_rows // max(1, rows_per_image))
    if want_two_blocks and batch >= 2:
        cap = min(cap, batch // 2)
    cap = max(1, min(batch, cap))
    for t in range(cap, 0, -1):
        if batch % t == 0 and ((t * rows_per_image) % align == 0 or t == batch):
            return t
    return batch  # full array in one block (always a legal block shape)


# ---------------------------------------------------------------------------
# Fused 4x4/stride-2/pad-1 conv + BatchNorm-statistics Pallas kernel
# ---------------------------------------------------------------------------
def _conv_bn_stats_kernel(g_ref, w_ref, z_ref, sum_ref, ssq_ref, *, wh, ow):
    """g_ref : (mblk, 8*Cin)   bf16 row-unfolded input; rows = (b, oh, u), u in [0, ow]
    w_ref : (8*Cin, 2*Cout) bf16 fused weights: cols [0:Cout]=j in {0,1}, [Cout:]=j in {2,3}
    z_ref : (mblk, Cout)    bf16 conv output (padded row layout, pre-BN)
    sum_ref/ssq_ref : (1,1,Cout) f32 masked partial per-channel sum / sum-of-squares."""
    cout = z_ref.shape[-1]
    g = g_ref[...]
    # single wide matmul (N = 2*Cout) fills the 256-wide MXU on v6e/v7x
    acc = jnp.dot(g, w_ref[...], preferred_element_type=jnp.float32)
    p0 = acc[:, :cout]          # kernel columns j in {0, 1}
    p1 = acc[:, cout:]          # kernel columns j in {2, 3}
    # j in {2,3} contribute to output column u-1 -> shift rows up by 1 (XLU roll).
    # The circular wrap only ever lands on a padding row because mblk % wh == 0
    # (blocks start/end on image boundaries) -- see assert in the wrapper.
    p1_up = pltpu.roll(p1, shift=p1.shape[0] - 1, axis=0)   # == roll by -1
    z = p0 + p1_up
    z_ref[...] = z.astype(z_ref.dtype)
    # validity mask built in-kernel: u = flat_row % wh, valid iff u < ow
    u = lax.broadcasted_iota(jnp.int32, (z.shape[0], 1), 0) % wh
    zv = jnp.where(u < ow, z, 0.0)          # where (not *mask): inf-safe stats
    sum_ref[...] = jnp.sum(zv, axis=0).reshape(1, 1, cout)
    ssq_ref[...] = jnp.sum(zv * zv, axis=0).reshape(1, 1, cout)


def conv4x4s2_bn_stats(x, wcat, *, target_rows=4096):
    """x: (B, H, W, Cin) ; wcat: (8*Cin, 2*Cout) bf16 (see _prep_conv_weight).

    Returns z (B*OH*(OW+1), Cout) bf16 with rows (b, oh, u) where u == OW is a
    padding row, plus masked partial BN statistics of shape (nb, 1, Cout)."""
    B, H, W, Cin = x.shape
    K8, C2 = wcat.shape
    Cout = C2 // 2
    assert K8 == 8 * Cin and K8 % 128 == 0 and Cout % 128 == 0
    OH, OW = H // 2, W // 2
    Wh = OW + 1
    rows = OH * Wh

    # row-unfold + column-parity split (glue; XLA fuses pad/slice/cast/concat).
    xp = jnp.pad(x.astype(jnp.bfloat16), ((0, 0), (1, 1), (1, 1), (0, 0)))
    cols = [xp[:, i:i + 2 * OH:2, pj::2, :] for i in range(4) for pj in range(2)]
    g = jnp.concatenate(cols, axis=-1).reshape(B * rows, K8)

    tb = _pick_batch_tile(B, rows, target_rows=target_rows, align=8,
                          want_two_blocks=True)
    nb = B // tb
    mblk = tb * rows
    # roll-wrap / mask invariant: every block covers whole images and therefore
    # ends on a padding row (u == OW); the wrapped row lands only there.
    assert mblk % Wh == 0 and mblk % rows == 0

    flops = 2 * (B * rows) * K8 * C2
    bytes_accessed = (B * rows * K8 * 2           # g read once
                      + K8 * C2 * 2 * nb          # fused weight per block
                      + B * rows * Cout * 2       # bf16 z writeback
                      + 2 * nb * Cout * 4)        # partial stats

    z, s, q = pl.pallas_call(
        functools.partial(_conv_bn_stats_kernel, wh=Wh, ow=OW),
        out_shape=(jax.ShapeDtypeStruct((B * rows, Cout), jnp.bfloat16),
                   jax.ShapeDtypeStruct((nb, 1, Cout), jnp.float32),
                   jax.ShapeDtypeStruct((nb, 1, Cout), jnp.float32)),
        grid_spec=pltpu.PrefetchScalarGridSpec(
            num_scalar_prefetch=0,
            grid=(nb,),
            in_specs=[
                pl.BlockSpec((mblk, K8), lambda b: (b, 0)),
                pl.BlockSpec((K8, C2), lambda b: (0, 0)),
            ],
            out_specs=(
                pl.BlockSpec((mblk, Cout), lambda b: (b, 0)),
                pl.BlockSpec((1, 1, Cout), lambda b: (b, 0, 0)),
                pl.BlockSpec((1, 1, Cout), lambda b: (b, 0, 0)),
            ),
        ),
        compiler_params=pltpu.CompilerParams(
            dimension_semantics=("parallel",),
            vmem_limit_bytes=48 * 1024 * 1024),
        cost_estimate=pl.CostEstimate(flops=flops, transcendentals=0,
                                      bytes_accessed=bytes_accessed),
    )(g, wcat)
    return z, s, q


# ---------------------------------------------------------------------------
# BatchNorm apply (training-mode stats) + LeakyReLU(0.2) + pad-column drop
# ---------------------------------------------------------------------------
def _bn_lrelu_kernel(z_ref, scale_ref, shift_ref, o_ref):
    """z_ref: (gb, Wh, C) bf16; o_ref: (gb, OW, C); scale/shift: (1, 1, C) f32.
    The u == OW padding row of each group is dropped by the :OW slice."""
    ow = o_ref.shape[1]
    z = z_ref[:, :ow, :].astype(jnp.float32)
    y = z * scale_ref[...] + shift_ref[...]
    o_ref[...] = jnp.where(y > 0.0, y, 0.2 * y).astype(o_ref.dtype)


def bn_lrelu_apply(z, part_sum, part_ssq, gamma, beta, *, B, OH, OW,
                   out_dtype=jnp.float32, eps=1e-5, target_rows=8192):
    Wh = OW + 1
    C = z.shape[-1]
    n_valid = B * OH * OW
    mean = jnp.sum(part_sum, axis=0).reshape(1, C) / n_valid
    var = jnp.maximum(jnp.sum(part_ssq, axis=0).reshape(1, C) / n_valid
                      - mean * mean, 0.0)
    scale = gamma * lax.rsqrt(var + eps)      # biased var, like torch BN (train)
    shift = beta - mean * scale
    scale3 = scale.reshape(1, 1, C)
    shift3 = shift.reshape(1, 1, C)

    z3 = z.reshape(B * OH, Wh, C)             # free row-major reshape
    tb = _pick_batch_tile(B, OH * Wh, target_rows=target_rows, align=1,
                          want_two_blocks=True)
    gb = tb * OH
    out = pl.pallas_call(
        _bn_lrelu_kernel,
        out_shape=jax.ShapeDtypeStruct((B * OH, OW, C), out_dtype),
        grid_spec=pltpu.PrefetchScalarGridSpec(
            num_scalar_prefetch=0,
            grid=(B // tb,),
            in_specs=[pl.BlockSpec((gb, Wh, C), lambda i: (i, 0, 0)),
                      pl.BlockSpec((1, 1, C), lambda i: (0, 0, 0)),
                      pl.BlockSpec((1, 1, C), lambda i: (0, 0, 0))],
            out_specs=pl.BlockSpec((gb, OW, C), lambda i: (i, 0, 0)),
        ),
        compiler_params=pltpu.CompilerParams(dimension_semantics=("parallel",)),
    )(z3, scale3, shift3)
    return out.reshape(B, OH, OW, C)


# ---------------------------------------------------------------------------
# Head: sigmoid( h @ wl + bl + sum(emb[y] * h) ) as a VPU reduce (no N=1 matmul)
# ---------------------------------------------------------------------------
def _head_kernel(h_ref, w_ref, emb_ref, b_ref, o_ref):
    w_eff = w_ref[...] + emb_ref[...]                                # (1,D)+(B,D)
    logit = jnp.sum(h_ref[...] * w_eff, axis=1, keepdims=True) + b_ref[...]
    o_ref[...] = 1.0 / (1.0 + jnp.exp(-logit))                       # sigmoid


def head_sigmoid(h, wl_row, emb_y, bias):
    # TODO(synk): tile over the batch axis for very large B; one block is fine here.
    B, D = h.shape
    return pl.pallas_call(
        _head_kernel,
        out_shape=jax.ShapeDtypeStruct((B, 1), jnp.float32),
        grid_spec=pltpu.PrefetchScalarGridSpec(
            num_scalar_prefetch=0,
            grid=(1,),
            in_specs=[pl.BlockSpec((B, D), lambda i: (0, 0)),
                      pl.BlockSpec((1, D), lambda i: (0, 0)),
                      pl.BlockSpec((B, D), lambda i: (0, 0)),
                      pl.BlockSpec((1, 1), lambda i: (0, 0))],
            out_specs=pl.BlockSpec((B, 1), lambda i: (0, 0)),
        ),
    )(h, wl_row, emb_y, bias)


# ---------------------------------------------------------------------------
# Parameters (torch layout) and one-time kernel-layout preparation
# ---------------------------------------------------------------------------
def init_params(key, model_dim=64, num_classes=10):
    ks = jax.random.split(key, 6)
    d = model_dim
    feat = 4 * 4 * 4 * d
    return {
        "w1": 0.05 * jax.random.normal(ks[0], (d, 1, 4, 4), jnp.float32),
        "w2": 0.05 * jax.random.normal(ks[1], (2 * d, d, 4, 4), jnp.float32),
        "w3": 0.05 * jax.random.normal(ks[2], (4 * d, 2 * d, 4, 4), jnp.float32),
        "gamma1": jnp.ones((1, 2 * d), jnp.float32),
        "beta1": jnp.zeros((1, 2 * d), jnp.float32),
        "gamma2": jnp.ones((1, 4 * d), jnp.float32),
        "beta2": jnp.zeros((1, 4 * d), jnp.float32),
        "wl": 0.02 * jax.random.normal(ks[3], (1, feat), jnp.float32),
        "bl": 0.01 * jax.random.normal(ks[4], (1,), jnp.float32),
        "emb": 0.01 * jax.random.normal(ks[5], (num_classes, feat), jnp.float32),
    }


def _prep_conv_weight(w_t):
    """torch conv weight (Cout, Cin, 4, 4) -> fused (8*Cin, 2*Cout) bf16:
    cols [0:Cout] for kernel columns j in {0,1}, cols [Cout:] for j in {2,3};
    rows ordered (kernel_row i, column parity, cin) to match the unfolded input."""
    cout, cin, _, _ = w_t.shape
    w = jnp.transpose(w_t, (2, 3, 1, 0))                             # (4,4,Cin,Cout)
    w0 = w[:, 0:2].reshape(8 * cin, cout)                            # j in {0,1}
    w1 = w[:, 2:4].reshape(8 * cin, cout)                            # j in {2,3}
    return jnp.concatenate([w0, w1], axis=1).astype(jnp.bfloat16)    # (8*Cin, 2*Cout)


def prepare_params(p, model_dim=64):
    d = model_dim
    c3 = 4 * d
    # head weights: permute once from torch NCHW flatten order to NHWC order
    wl = jnp.transpose(p["wl"].reshape(c3, 4, 4), (1, 2, 0)).reshape(1, 16 * c3)
    emb = jnp.transpose(p["emb"].reshape(-1, c3, 4, 4), (0, 2, 3, 1))
    emb = emb.reshape(p["emb"].shape[0], 16 * c3)
    return {
        "w1_hwio": jnp.transpose(p["w1"], (2, 3, 1, 0)),             # (4,4,1,d) f32
        "w2": _prep_conv_weight(p["w2"]),                            # (512, 256) bf16
        "w3": _prep_conv_weight(p["w3"]),                            # (1024, 512) bf16
        "gamma1": p["gamma1"], "beta1": p["beta1"],
        "gamma2": p["gamma2"], "beta2": p["beta2"],
        "wl_nhwc": wl, "emb_nhwc": emb, "bl": p["bl"].reshape(1, 1),
    }


# ---------------------------------------------------------------------------
# Forward pass
# ---------------------------------------------------------------------------
def discriminator_forward(x, y, prep, model_dim=64):
    d = model_dim
    x = x.reshape(-1, 1, 32, 32).astype(jnp.float32)
    B = x.shape[0]
    x_nhwc = jnp.transpose(x, (0, 2, 3, 1))                          # (B,32,32,1)

    # conv1 + LeakyReLU: Cin=1 / K=16 is MXU-hostile -> XLA conv, DEFAULT precision
    # (no multi-pass f32 emulation; downstream is bf16 anyway).
    h1 = lax.conv_general_dilated(
        x_nhwc, prep["w1_hwio"], window_strides=(2, 2), padding=((1, 1), (1, 1)),
        dimension_numbers=("NHWC", "HWIO", "NHWC"),
        precision=lax.Precision.DEFAULT)
    h1 = jnp.where(h1 > 0, h1, 0.2 * h1)                             # (B,16,16,d)

    # conv2 (fused im2col-in-VMEM matmul + BN stats) -> BN apply + LeakyReLU + pad drop
    z2, s2, q2 = conv4x4s2_bn_stats(h1, prep["w2"])
    h2 = bn_lrelu_apply(z2, s2, q2, prep["gamma1"], prep["beta1"],
                        B=B, OH=8, OW=8, out_dtype=jnp.bfloat16)     # (B,8,8,2d) bf16

    # conv3 -> BN apply + LeakyReLU + pad drop
    z3, s3, q3 = conv4x4s2_bn_stats(h2, prep["w3"])
    h3 = bn_lrelu_apply(z3, s3, q3, prep["gamma2"], prep["beta2"],
                        B=B, OH=4, OW=4, out_dtype=jnp.float32)      # (B,4,4,4d) f32

    # NHWC flatten (head weights were pre-permuted -> no NCHW transpose needed)
    h_flat = h3.reshape(B, 4 * 4 * 4 * d)
    emb_y = jnp.take(prep["emb_nhwc"], y, axis=0)                    # embedding gather
    return head_sigmoid(h_flat, prep["wl_nhwc"], emb_y, prep["bl"])


# ---------------------------------------------------------------------------
# Pure-JAX reference (torch-equivalent semantics) for a sanity check
# ---------------------------------------------------------------------------
def reference_forward(x, y, params, model_dim=64):
    d = model_dim
    x = x.reshape(-1, 1, 32, 32).astype(jnp.float32)
    B = x.shape[0]
    lrelu = lambda v: jnp.where(v > 0, v, 0.2 * v)

    def conv(inp, w):
        return lax.conv_general_dilated(
            inp, w, window_strides=(2, 2), padding=((1, 1), (1, 1)),
            dimension_numbers=("NCHW", "OIHW", "NCHW"),
            precision=lax.Precision.HIGHEST)

    def bn(z, gamma, beta):
        mean = jnp.mean(z, axis=(0, 2, 3), keepdims=True)
        var = jnp.var(z, axis=(0, 2, 3), keepdims=True)
        return (z - mean) * lax.rsqrt(var + 1e-5) * gamma.reshape(1, -1, 1, 1) \
            + beta.reshape(1, -1, 1, 1)

    h = lrelu(conv(x, params["w1"]))
    h = lrelu(bn(conv(h, params["w2"]), params["gamma1"], params["beta1"]))
    h = lrelu(bn(conv(h, params["w3"]), params["gamma2"], params["beta2"]))
    h = h.reshape(B, 4 * 4 * 4 * d)
    out = h @ params["wl"].T + params["bl"]
    out = out + jnp.sum(params["emb"][y] * h, axis=1, keepdims=True)
    return jax.nn.sigmoid(out)


if __name__ == "__main__":
    key = jax.random.PRNGKey(0)
    k_param, k_x, k_y = jax.random.split(key, 3)

    model_dim, num_classes, batch = 64, 10, 2
    params = init_params(k_param, model_dim=model_dim, num_classes=num_classes)
    prep = prepare_params(params, model_dim=model_dim)

    x = jax.random.normal(k_x, (batch, 1, 32, 32), jnp.float32)
    y = jax.random.randint(k_y, (batch,), 0, num_classes)

    fwd = jax.jit(functools.partial(discriminator_forward, model_dim=model_dim))
    out = jax.block_until_ready(fwd(x, y, prep))

    ref = jax.block_until_ready(reference_forward(x, y, params, model_dim=model_dim))
    max_diff = float(jnp.max(jnp.abs(out - ref)))
    assert out.shape == (batch, 1), out.shape
    # bf16 conv operands, bf16 z writeback and DEFAULT-precision conv1 vs a pure
    # f32 HIGHEST reference: sigmoid-output tolerance stays loose but meaningful.
    assert max_diff < 5e-2, f"mismatch vs reference: {max_diff}"

    print("KERNEL_OK")
</pallas_src>

<mosaic_0001>
module attributes {stable_mosaic.version = 11 : i64} {
  func.func @_conv_bn_stats_kernel(%arg0: i32, %arg1: memref<72x512xbf16, #tpu.memory_space<vmem>>, %arg2: memref<512x256xbf16, #tpu.memory_space<vmem>>, %arg3: memref<72x128xbf16, #tpu.memory_space<vmem>>, %arg4: memref<1x1x128xf32, #tpu.memory_space<vmem>>, %arg5: memref<1x1x128xf32, #tpu.memory_space<vmem>>) attributes {dimension_semantics = [#tpu.dimension_semantics<parallel>], iteration_bounds = array<i64: 2>, scalar_prefetch = 0 : i64, scratch_operands = 0 : i64, tpu.core_type = #tpu.core_type<tc>, window_params = [{transform_indices = @transform_0, window_bounds = array<i64: 72, 512>}, {pipeline_mode = #tpu.pipeline_mode<synchronous>, transform_indices = @transform_1, window_bounds = array<i64: 512, 256>}, {transform_indices = @transform_2, window_bounds = array<i64: 72, 128>}, {transform_indices = @transform_3, window_bounds = array<i64: 1, 1, 128>}, {transform_indices = @transform_4, window_bounds = array<i64: 1, 1, 128>}]} {
    %c0 = arith.constant 0 : index
    %c0_0 = arith.constant 0 : index
    %0 = vector.load %arg1[%c0, %c0_0] : memref<72x512xbf16, #tpu.memory_space<vmem>>, vector<72x512xbf16>
    %c0_1 = arith.constant 0 : index
    %c0_2 = arith.constant 0 : index
    %1 = vector.load %arg2[%c0_1, %c0_2] : memref<512x256xbf16, #tpu.memory_space<vmem>>, vector<512x256xbf16>
    %cst = arith.constant dense<0.000000e+00> : vector<72x256xf32>
    %2 = tpu.matmul %0, %1, %cst {dimension_numbers = #tpu.dot_dimension_numbers<[1], [0], [0], [1], [0, 0, 1, 1], [], []>} : vector<72x512xbf16>, vector<512x256xbf16>, vector<72x256xf32> -> vector<72x256xf32>
    %3 = vector.extract_strided_slice %2 {offsets = [0, 0], sizes = [72, 128], strides = [1, 1]} : vector<72x256xf32> to vector<72x128xf32>
    %4 = vector.extract_strided_slice %2 {offsets = [0, 128], sizes = [72, 128], strides = [1, 1]} : vector<72x256xf32> to vector<72x128xf32>
    %c71_i32 = arith.constant 71 : i32
    %5 = tpu.dynamic_rotate %4 by %c71_i32 dim 0 : vector<72x128xf32>, i32 -> vector<72x128xf32>
    %6 = arith.addf %3, %5 : vector<72x128xf32>
    %7 = arith.truncf %6 : vector<72x128xf32> to vector<72x128xbf16>
    %c0_3 = arith.constant 0 : index
    %c0_4 = arith.constant 0 : index
    %8 = vector.load %arg3[%c0_3, %c0_4] : memref<72x128xbf16, #tpu.memory_space<vmem>>, vector<72x128xbf16>
    tpu.vector_store %arg3[%c0_3, %c0_4], %7 {strides = array<i32>} : memref<72x128xbf16, #tpu.memory_space<vmem>>, vector<72x128xbf16>,
    %9 = tpu.iota {dimensions = array<i32: 0>} : vector<72x1xi32>
    %c9_i32 = arith.constant 9 : i32
    %c0_i32 = arith.constant 0 : i32
    %10 = arith.cmpi eq, %c9_i32, %c0_i32 : i32
    %c1_i32 = arith.constant 1 : i32
    %11 = arith.select %10, %c1_i32, %c9_i32 : i32
    %12 = vector.broadcast %11 : i32 to vector<72x1xi32>
    %13 = arith.remsi %9, %12 : vector<72x1xi32>
    %c0_i32_5 = arith.constant 0 : i32
    %14 = vector.broadcast %c0_i32_5 : i32 to vector<72x1xi32>
    %15 = arith.cmpi ne, %13, %14 : vector<72x1xi32>
    %c0_i32_6 = arith.constant 0 : i32
    %16 = vector.broadcast %c0_i32_6 : i32 to vector<72x1xi32>
    %17 = arith.cmpi slt, %13, %16 : vector<72x1xi32>
    %c0_i32_7 = arith.constant 0 : i32
    %18 = arith.cmpi slt, %11, %c0_i32_7 : i32
    %19 = vector.broadcast %18 : i1 to vector<72x1xi1>
    %20 = vector.broadcast %19 : vector<72x1xi1> to vector<72x1xi1>
    %21 = arith.xori %17, %20 : vector<72x1xi1>
    %22 = arith.andi %21, %15 : vector<72x1xi1>
    %23 = vector.broadcast %11 : i32 to vector<72x1xi32>
    %24 = arith.addi %13, %23 : vector<72x1xi32>
    %25 = arith.select %22, %24, %13 : vector<72x1xi1>, vector<72x1xi32>
    %c8_i32 = arith.constant 8 : i32
    %26 = vector.broadcast %c8_i32 : i32 to vector<72x1xi32>
    %27 = arith.cmpi slt, %25, %26 : vector<72x1xi32>
    %cst_8 = arith.constant 0.000000e+00 : f32
    %28 = vector.shape_cast %27 : vector<72x1xi1> to vector<72x1xi1>
    %29 = vector.broadcast %28 : vector<72x1xi1> to vector<72x128xi1>
    %30 = vector.broadcast %cst_8 : f32 to vector<72x128xf32>
    %31 = arith.select %29, %6, %30 : vector<72x128xi1>, vector<72x128xf32>
    %cst_9 = arith.constant dense<0.000000e+00> : vector<128xf32>
    %32 = vector.multi_reduction <add>, %31, %cst_9 [0] : vector<72x128xf32> to vector<128xf32>
    %33 = vector.shape_cast %32 : vector<128xf32> to vector<1x1x128xf32>
    %c0_10 = arith.constant 0 : index
    %c0_11 = arith.constant 0 : index
    %c0_12 = arith.constant 0 : index
    %34 = vector.load %arg4[%c0_10, %c0_11, %c0_12] : memref<1x1x128xf32, #tpu.memory_space<vmem>>, vector<1x1x128xf32>
    tpu.vector_store %arg4[%c0_10, %c0_11, %c0_12], %33 {strides = array<i32>} : memref<1x1x128xf32, #tpu.memory_space<vmem>>, vector<1x1x128xf32>,
    %35 = arith.mulf %31, %31 : vector<72x128xf32>
    %cst_13 = arith.constant dense<0.000000e+00> : vector<128xf32>
    %36 = vector.multi_reduction <add>, %35, %cst_13 [0] : vector<72x128xf32> to vector<128xf32>
    %37 = vector.shape_cast %36 : vector<128xf32> to vector<1x1x128xf32>
    %c0_14 = arith.constant 0 : index
    %c0_15 = arith.constant 0 : index
    %c0_16 = arith.constant 0 : index
    %38 = vector.load %arg5[%c0_14, %c0_15, %c0_16] : memref<1x1x128xf32, #tpu.memory_space<vmem>>, vector<1x1x128xf32>
    tpu.vector_store %arg5[%c0_14, %c0_15, %c0_16], %37 {strides = array<i32>} : memref<1x1x128xf32, #tpu.memory_space<vmem>>, vector<1x1x128xf32>,
    return
  }
  func.func @transform_0(%arg0: i32) -> (i32, i32) {
    %c0_i32 = arith.constant 0 : i32
    %c0_i32_0 = arith.constant 0 : i32
    return %arg0, %c0_i32 : i32, i32
  }
  func.func @transform_1(%arg0: i32) -> (i32, i32) {
    %c0_i32 = arith.constant 0 : i32
    %c0_i32_0 = arith.constant 0 : i32
    %c0_i32_1 = arith.constant 0 : i32
    return %c0_i32, %c0_i32_0 : i32, i32
  }
  func.func @transform_2(%arg0: i32) -> (i32, i32) {
    %c0_i32 = arith.constant 0 : i32
    %c0_i32_0 = arith.constant 0 : i32
    return %arg0, %c0_i32 : i32, i32
  }
  func.func @transform_3(%arg0: i32) -> (i32, i32, i32) {
    %c0_i32 = arith.constant 0 : i32
    %c0_i32_0 = arith.constant 0 : i32
    %c0_i32_1 = arith.constant 0 : i32
    return %arg0, %c0_i32, %c0_i32_0 : i32, i32, i32
  }
  func.func @transform_4(%arg0: i32) -> (i32, i32, i32) {
    %c0_i32 = arith.constant 0 : i32
    %c0_i32_0 = arith.constant 0 : i32
    %c0_i32_1 = arith.constant 0 : i32
    return %arg0, %c0_i32, %c0_i32_0 : i32, i32, i32
  }
}

module attributes {stable_mosaic.version = 11 : i64} {
  func.func @_bn_lrelu_kernel(%arg0: i32, %arg1: memref<8x9x128xbf16, #tpu.memory_space<vmem>>, %arg2: memref<1x1x128xf32, #tpu.memory_space<vmem>>, %arg3: memref<1x1x128xf32, #tpu.memory_space<vmem>>, %arg4: memref<8x8x128xbf16, #tpu.memory_space<vmem>>) attributes {dimension_semantics = [#tpu.dimension_semantics<parallel>], iteration_bounds = array<i64: 2>, scalar_prefetch = 0 : i64, scratch_operands = 0 : i64, tpu.core_type = #tpu.core_type<tc>, window_params = [{transform_indices = @transform_0, window_bounds = array<i64: 8, 9, 128>}, {pipeline_mode = #tpu.pipeline_mode<synchronous>, transform_indices = @transform_1, window_bounds = array<i64: 1, 1, 128>}, {pipeline_mode = #tpu.pipeline_mode<synchronous>, transform_indices = @transform_2, window_bounds = array<i64: 1, 1, 128>}, {transform_indices = @transform_3, window_bounds = array<i64: 8, 8, 128>}]} {
    %c0 = arith.constant 0 : index
    %c0_0 = arith.constant 0 : index
    %c0_1 = arith.constant 0 : index
    %0 = vector.load %arg1[%c0, %c0_0, %c0_1] : memref<8x9x128xbf16, #tpu.memory_space<vmem>>, vector<8x8x128xbf16>
    %1 = arith.extf %0 : vector<8x8x128xbf16> to vector<8x8x128xf32>
    %c0_2 = arith.constant 0 : index
    %c0_3 = arith.constant 0 : index
    %c0_4 = arith.constant 0 : index
    %2 = vector.load %arg2[%c0_2, %c0_3, %c0_4] : memref<1x1x128xf32, #tpu.memory_space<vmem>>, vector<1x1x128xf32>
    %3 = vector.broadcast %2 : vector<1x1x128xf32> to vector<8x8x128xf32>
    %4 = arith.mulf %1, %3 : vector<8x8x128xf32>
    %c0_5 = arith.constant 0 : index
    %c0_6 = arith.constant 0 : index
    %c0_7 = arith.constant 0 : index
    %5 = vector.load %arg3[%c0_5, %c0_6, %c0_7] : memref<1x1x128xf32, #tpu.memory_space<vmem>>, vector<1x1x128xf32>
    %6 = vector.broadcast %5 : vector<1x1x128xf32> to vector<8x8x128xf32>
    %7 = arith.addf %4, %6 : vector<8x8x128xf32>
    %cst = arith.constant 0.000000e+00 : f32
    %8 = vector.broadcast %cst : f32 to vector<8x8x128xf32>
    %9 = arith.cmpf ogt, %7, %8 : vector<8x8x128xf32>
    %cst_8 = arith.constant 2.000000e-01 : f32
    %10 = vector.broadcast %cst_8 : f32 to vector<8x8x128xf32>
    %11 = arith.mulf %10, %7 : vector<8x8x128xf32>
    %12 = arith.select %9, %7, %11 : vector<8x8x128xi1>, vector<8x8x128xf32>
    %13 = arith.truncf %12 : vector<8x8x128xf32> to vector<8x8x128xbf16>
    %c0_9 = arith.constant 0 : index
    %c0_10 = arith.constant 0 : index
    %c0_11 = arith.constant 0 : index
    %14 = vector.load %arg4[%c0_9, %c0_10, %c0_11] : memref<8x8x128xbf16, #tpu.memory_space<vmem>>, vector<8x8x128xbf16>
    tpu.vector_store %arg4[%c0_9, %c0_10, %c0_11], %13 {strides = array<i32>} : memref<8x8x128xbf16, #tpu.memory_space<vmem>>, vector<8x8x128xbf16>,
    return
  }
  func.func @transform_0(%arg0: i32) -> (i32, i32, i32) {
    %c0_i32 = arith.constant 0 : i32
    %c0_i32_0 = arith.constant 0 : i32
    %c0_i32_1 = arith.constant 0 : i32
    return %arg0, %c0_i32, %c0_i32_0 : i32, i32, i32
  }
  func.func @transform_1(%arg0: i32) -> (i32, i32, i32) {
    %c0_i32 = arith.constant 0 : i32
    %c0_i32_0 = arith.constant 0 : i32
    %c0_i32_1 = arith.constant 0 : i32
    %c0_i32_2 = arith.constant 0 : i32
    return %c0_i32, %c0_i32_0, %c0_i32_1 : i32, i32, i32
  }
  func.func @transform_2(%arg0: i32) -> (i32, i32, i32) {
    %c0_i32 = arith.constant 0 : i32
    %c0_i32_0 = arith.constant 0 : i32
    %c0_i32_1 = arith.constant 0 : i32
    %c0_i32_2 = arith.constant 0 : i32
    return %c0_i32, %c0_i32_0, %c0_i32_1 : i32, i32, i32
  }
  func.func @transform_3(%arg0: i32) -> (i32, i32, i32) {
    %c0_i32 = arith.constant 0 : i32
    %c0_i32_0 = arith.constant 0 : i32
    %c0_i32_1 = arith.constant 0 : i32
    return %arg0, %c0_i32, %c0_i32_0 : i32, i32, i32
  }
}

module attributes {stable_mosaic.version = 11 : i64} {
  func.func @_conv_bn_stats_kernel(%arg0: i32, %arg1: memref<40x1024xbf16, #tpu.memory_space<vmem>>, %arg2: memref<1024x512xbf16, #tpu.memory_space<vmem>>, %arg3: memref<40x256xbf16, #tpu.memory_space<vmem>>, %arg4: memref<1x1x256xf32, #tpu.memory_space<vmem>>, %arg5: memref<1x1x256xf32, #tpu.memory_space<vmem>>) attributes {dimension_semantics = [#tpu.dimension_semantics<parallel>], iteration_bounds = array<i64: 1>, scalar_prefetch = 0 : i64, scratch_operands = 0 : i64, tpu.core_type = #tpu.core_type<tc>, window_params = [{transform_indices = @transform_0, window_bounds = array<i64: 40, 1024>}, {pipeline_mode = #tpu.pipeline_mode<synchronous>, transform_indices = @transform_1, window_bounds = array<i64: 1024, 512>}, {transform_indices = @transform_2, window_bounds = array<i64: 40, 256>}, {transform_indices = @transform_3, window_bounds = array<i64: 1, 1, 256>}, {transform_indices = @transform_4, window_bounds = array<i64: 1, 1, 256>}]} {
    %c0 = arith.constant 0 : index
    %c0_0 = arith.constant 0 : index
    %0 = vector.load %arg1[%c0, %c0_0] : memref<40x1024xbf16, #tpu.memory_space<vmem>>, vector<40x1024xbf16>
    %c0_1 = arith.constant 0 : index
    %c0_2 = arith.constant 0 : index
    %1 = vector.load %arg2[%c0_1, %c0_2] : memref<1024x512xbf16, #tpu.memory_space<vmem>>, vector<1024x512xbf16>
    %cst = arith.constant dense<0.000000e+00> : vector<40x512xf32>
    %2 = tpu.matmul %0, %1, %cst {dimension_numbers = #tpu.dot_dimension_numbers<[1], [0], [0], [1], [0, 0, 1, 1], [], []>} : vector<40x1024xbf16>, vector<1024x512xbf16>, vector<40x512xf32> -> vector<40x512xf32>
    %3 = vector.extract_strided_slice %2 {offsets = [0, 0], sizes = [40, 256], strides = [1, 1]} : vector<40x512xf32> to vector<40x256xf32>
    %4 = vector.extract_strided_slice %2 {offsets = [0, 256], sizes = [40, 256], strides = [1, 1]} : vector<40x512xf32> to vector<40x256xf32>
    %c39_i32 = arith.constant 39 : i32
    %5 = tpu.dynamic_rotate %4 by %c39_i32 dim 0 : vector<40x256xf32>, i32 -> vector<40x256xf32>
    %6 = arith.addf %3, %5 : vector<40x256xf32>
    %7 = arith.truncf %6 : vector<40x256xf32> to vector<40x256xbf16>
    %c0_3 = arith.constant 0 : index
    %c0_4 = arith.constant 0 : index
    %8 = vector.load %arg3[%c0_3, %c0_4] : memref<40x256xbf16, #tpu.memory_space<vmem>>, vector<40x256xbf16>
    tpu.vector_store %arg3[%c0_3, %c0_4], %7 {strides = array<i32>} : memref<40x256xbf16, #tpu.memory_space<vmem>>, vector<40x256xbf16>,
    %9 = tpu.iota {dimensions = array<i32: 0>} : vector<40x1xi32>
    %c5_i32 = arith.constant 5 : i32
    %c0_i32 = arith.constant 0 : i32
    %10 = arith.cmpi eq, %c5_i32, %c0_i32 : i32
    %c1_i32 = arith.constant 1 : i32
    %11 = arith.select %10, %c1_i32, %c5_i32 : i32
    %12 = vector.broadcast %11 : i32 to vector<40x1xi32>
    %13 = arith.remsi %9, %12 : vector<40x1xi32>
    %c0_i32_5 = arith.constant 0 : i32
    %14 = vector.broadcast %c0_i32_5 : i32 to vector<40x1xi32>
    %15 = arith.cmpi ne, %13, %14 : vector<40x1xi32>
    %c0_i32_6 = arith.constant 0 : i32
    %16 = vector.broadcast %c0_i32_6 : i32 to vector<40x1xi32>
    %17 = arith.cmpi slt, %13, %16 : vector<40x1xi32>
    %c0_i32_7 = arith.constant 0 : i32
    %18 = arith.cmpi slt, %11, %c0_i32_7 : i32
    %19 = vector.broadcast %18 : i1 to vector<40x1xi1>
    %20 = vector.broadcast %19 : vector<40x1xi1> to vector<40x1xi1>
    %21 = arith.xori %17, %20 : vector<40x1xi1>
    %22 = arith.andi %21, %15 : vector<40x1xi1>
    %23 = vector.broadcast %11 : i32 to vector<40x1xi32>
    %24 = arith.addi %13, %23 : vector<40x1xi32>
    %25 = arith.select %22, %24, %13 : vector<40x1xi1>, vector<40x1xi32>
    %c4_i32 = arith.constant 4 : i32
    %26 = vector.broadcast %c4_i32 : i32 to vector<40x1xi32>
    %27 = arith.cmpi slt, %25, %26 : vector<40x1xi32>
    %cst_8 = arith.constant 0.000000e+00 : f32
    %28 = vector.shape_cast %27 : vector<40x1xi1> to vector<40x1xi1>
    %29 = vector.broadcast %28 : vector<40x1xi1> to vector<40x256xi1>
    %30 = vector.broadcast %cst_8 : f32 to vector<40x256xf32>
    %31 = arith.select %29, %6, %30 : vector<40x256xi1>, vector<40x256xf32>
    %cst_9 = arith.constant dense<0.000000e+00> : vector<256xf32>
    %32 = vector.multi_reduction <add>, %31, %cst_9 [0] : vector<40x256xf32> to vector<256xf32>
    %33 = vector.shape_cast %32 : vector<256xf32> to vector<1x1x256xf32>
    %c0_10 = arith.constant 0 : index
    %c0_11 = arith.constant 0 : index
    %c0_12 = arith.constant 0 : index
    %34 = vector.load %arg4[%c0_10, %c0_11, %c0_12] : memref<1x1x256xf32, #tpu.memory_space<vmem>>, vector<1x1x256xf32>
    tpu.vector_store %arg4[%c0_10, %c0_11, %c0_12], %33 {strides = array<i32>} : memref<1x1x256xf32, #tpu.memory_space<vmem>>, vector<1x1x256xf32>,
    %35 = arith.mulf %31, %31 : vector<40x256xf32>
    %cst_13 = arith.constant dense<0.000000e+00> : vector<256xf32>
    %36 = vector.multi_reduction <add>, %35, %cst_13 [0] : vector<40x256xf32> to vector<256xf32>
    %37 = vector.shape_cast %36 : vector<256xf32> to vector<1x1x256xf32>
    %c0_14 = arith.constant 0 : index
    %c0_15 = arith.constant 0 : index
    %c0_16 = arith.constant 0 : index
    %38 = vector.load %arg5[%c0_14, %c0_15, %c0_16] : memref<1x1x256xf32, #tpu.memory_space<vmem>>, vector<1x1x256xf32>
    tpu.vector_store %arg5[%c0_14, %c0_15, %c0_16], %37 {strides = array<i32>} : memref<1x1x256xf32, #tpu.memory_space<vmem>>, vector<1x1x256xf32>,
    return
  }
  func.func @transform_0(%arg0: i32) -> (i32, i32) {
    %c0_i32 = arith.constant 0 : i32
    %c0_i32_0 = arith.constant 0 : i32
    return %arg0, %c0_i32 : i32, i32
  }
  func.func @transform_1(%arg0: i32) -> (i32, i32) {
    %c0_i32 = arith.constant 0 : i32
    %c0_i32_0 = arith.constant 0 : i32
    %c0_i32_1 = arith.constant 0 : i32
    return %c0_i32, %c0_i32_0 : i32, i32
  }
  func.func @transform_2(%arg0: i32) -> (i32, i32) {
    %c0_i32 = arith.constant 0 : i32
    %c0_i32_0 = arith.constant 0 : i32
    return %arg0, %c0_i32 : i32, i32
  }
  func.func @transform_3(%arg0: i32) -> (i32, i32, i32) {
    %c0_i32 = arith.constant 0 : i32
    %c0_i32_0 = arith.constant 0 : i32
    %c0_i32_1 = arith.constant 0 : i32
    return %arg0, %c0_i32, %c0_i32_0 : i32, i32, i32
  }
  func.func @transform_4(%arg0: i32) -> (i32, i32, i32) {
    %c0_i32 = arith.constant 0 : i32
    %c0_i32_0 = arith.constant 0 : i32
    %c0_i32_1 = arith.constant 0 : i32
    return %arg0, %c0_i32, %c0_i32_0 : i32, i32, i32
  }
}

module attributes {stable_mosaic.version = 11 : i64} {
  func.func @_bn_lrelu_kernel(%arg0: i32, %arg1: memref<4x5x256xbf16, #tpu.memory_space<vmem>>, %arg2: memref<1x1x256xf32, #tpu.memory_space<vmem>>, %arg3: memref<1x1x256xf32, #tpu.memory_space<vmem>>, %arg4: memref<4x4x256xf32, #tpu.memory_space<vmem>>) attributes {dimension_semantics = [#tpu.dimension_semantics<parallel>], iteration_bounds = array<i64: 2>, scalar_prefetch = 0 : i64, scratch_operands = 0 : i64, tpu.core_type = #tpu.core_type<tc>, window_params = [{transform_indices = @transform_0, window_bounds = array<i64: 4, 5, 256>}, {pipeline_mode = #tpu.pipeline_mode<synchronous>, transform_indices = @transform_1, window_bounds = array<i64: 1, 1, 256>}, {pipeline_mode = #tpu.pipeline_mode<synchronous>, transform_indices = @transform_2, window_bounds = array<i64: 1, 1, 256>}, {transform_indices = @transform_3, window_bounds = array<i64: 4, 4, 256>}]} {
    %c0 = arith.constant 0 : index
    %c0_0 = arith.constant 0 : index
    %c0_1 = arith.constant 0 : index
    %0 = vector.load %arg1[%c0, %c0_0, %c0_1] : memref<4x5x256xbf16, #tpu.memory_space<vmem>>, vector<4x4x256xbf16>
    %1 = arith.extf %0 : vector<4x4x256xbf16> to vector<4x4x256xf32>
    %c0_2 = arith.constant 0 : index
    %c0_3 = arith.constant 0 : index
    %c0_4 = arith.constant 0 : index
    %2 = vector.load %arg2[%c0_2, %c0_3, %c0_4] : memref<1x1x256xf32, #tpu.memory_space<vmem>>, vector<1x1x256xf32>
    %3 = vector.broadcast %2 : vector<1x1x256xf32> to vector<4x4x256xf32>
    %4 = arith.mulf %1, %3 : vector<4x4x256xf32>
    %c0_5 = arith.constant 0 : index
    %c0_6 = arith.constant 0 : index
    %c0_7 = arith.constant 0 : index
    %5 = vector.load %arg3[%c0_5, %c0_6, %c0_7] : memref<1x1x256xf32, #tpu.memory_space<vmem>>, vector<1x1x256xf32>
    %6 = vector.broadcast %5 : vector<1x1x256xf32> to vector<4x4x256xf32>
    %7 = arith.addf %4, %6 : vector<4x4x256xf32>
    %cst = arith.constant 0.000000e+00 : f32
    %8 = vector.broadcast %cst : f32 to vector<4x4x256xf32>
    %9 = arith.cmpf ogt, %7, %8 : vector<4x4x256xf32>
    %cst_8 = arith.constant 2.000000e-01 : f32
    %10 = vector.broadcast %cst_8 : f32 to vector<4x4x256xf32>
    %11 = arith.mulf %10, %7 : vector<4x4x256xf32>
    %12 = arith.select %9, %7, %11 : vector<4x4x256xi1>, vector<4x4x256xf32>
    %c0_9 = arith.constant 0 : index
    %c0_10 = arith.constant 0 : index
    %c0_11 = arith.constant 0 : index
    %13 = vector.load %arg4[%c0_9, %c0_10, %c0_11] : memref<4x4x256xf32, #tpu.memory_space<vmem>>, vector<4x4x256xf32>
    tpu.vector_store %arg4[%c0_9, %c0_10, %c0_11], %12 {strides = array<i32>} : memref<4x4x256xf32, #tpu.memory_space<vmem>>, vector<4x4x256xf32>,
    return
  }
  func.func @transform_0(%arg0: i32) -> (i32, i32, i32) {
    %c0_i32 = arith.constant 0 : i32
    %c0_i32_0 = arith.constant 0 : i32
    %c0_i32_1 = arith.constant 0 : i32
    return %arg0, %c0_i32, %c0_i32_0 : i32, i32, i32
  }
  func.func @transform_1(%arg0: i32) -> (i32, i32, i32) {
    %c0_i32 = arith.constant 0 : i32
    %c0_i32_0 = arith.constant 0 : i32
    %c0_i32_1 = arith.constant 0 : i32
    %c0_i32_2 = arith.constant 0 : i32
    return %c0_i32, %c0_i32_0, %c0_i32_1 : i32, i32, i32
  }
  func.func @transform_2(%arg0: i32) -> (i32, i32, i32) {
    %c0_i32 = arith.constant 0 : i32
    %c0_i32_0 = arith.constant 0 : i32
    %c0_i32_1 = arith.constant 0 : i32
    %c0_i32_2 = arith.constant 0 : i32
    return %c0_i32, %c0_i32_0, %c0_i32_1 : i32, i32, i32
  }
  func.func @transform_3(%arg0: i32) -> (i32, i32, i32) {
    %c0_i32 = arith.constant 0 : i32
    %c0_i32_0 = arith.constant 0 : i32
    %c0_i32_1 = arith.constant 0 : i32
    return %arg0, %c0_i32, %c0_i32_0 : i32, i32, i32
  }
}

module attributes {stable_mosaic.version = 11 : i64} {
  func.func @_head_kernel(%arg0: i32, %arg1: memref<2x4096xf32, #tpu.memory_space<vmem>>, %arg2: memref<1x4096xf32, #tpu.memory_space<vmem>>, %arg3: memref<2x4096xf32, #tpu.memory_space<vmem>>, %arg4: memref<1x1xf32, #tpu.memory_space<vmem>>, %arg5: memref<2x1xf32, #tpu.memory_space<vmem>>) attributes {dimension_semantics = [#tpu.dimension_semantics<arbitrary>], iteration_bounds = array<i64: 1>, scalar_prefetch = 0 : i64, scratch_operands = 0 : i64, tpu.core_type = #tpu.core_type<tc>, window_params = [{pipeline_mode = #tpu.pipeline_mode<synchronous>, transform_indices = @transform_0, window_bounds = array<i64: 2, 4096>}, {pipeline_mode = #tpu.pipeline_mode<synchronous>, transform_indices = @transform_1, window_bounds = array<i64: 1, 4096>}, {pipeline_mode = #tpu.pipeline_mode<synchronous>, transform_indices = @transform_2, window_bounds = array<i64: 2, 4096>}, {pipeline_mode = #tpu.pipeline_mode<synchronous>, transform_indices = @transform_3, window_bounds = array<i64: 1, 1>}, {pipeline_mode = #tpu.pipeline_mode<synchronous>, transform_indices = @transform_4, window_bounds = array<i64: 2, 1>}]} {
    %c0 = arith.constant 0 : index
    %c0_0 = arith.constant 0 : index
    %0 = vector.load %arg2[%c0, %c0_0] : memref<1x4096xf32, #tpu.memory_space<vmem>>, vector<1x4096xf32>
    %c0_1 = arith.constant 0 : index
    %c0_2 = arith.constant 0 : index
    %1 = vector.load %arg3[%c0_1, %c0_2] : memref<2x4096xf32, #tpu.memory_space<vmem>>, vector<2x4096xf32>
    %2 = vector.broadcast %0 : vector<1x4096xf32> to vector<2x4096xf32>
    %3 = arith.addf %2, %1 : vector<2x4096xf32>
    %c0_3 = arith.constant 0 : index
    %c0_4 = arith.constant 0 : index
    %4 = vector.load %arg1[%c0_3, %c0_4] : memref<2x4096xf32, #tpu.memory_space<vmem>>, vector<2x4096xf32>
    %5 = arith.mulf %4, %3 : vector<2x4096xf32>
    %cst = arith.constant dense<0.000000e+00> : vector<2xf32>
    %6 = vector.multi_reduction <add>, %5, %cst [1] : vector<2x4096xf32> to vector<2xf32>
    %7 = vector.shape_cast %6 : vector<2xf32> to vector<2x1xf32>
    %c0_5 = arith.constant 0 : index
    %c0_6 = arith.constant 0 : index
    %8 = vector.load %arg4[%c0_5, %c0_6] : memref<1x1xf32, #tpu.memory_space<vmem>>, vector<1x1xf32>
    %9 = vector.broadcast %8 : vector<1x1xf32> to vector<2x1xf32>
    %10 = arith.addf %7, %9 : vector<2x1xf32>
    %cst_7 = arith.constant 0.000000e+00 : f32
    %11 = vector.broadcast %cst_7 : f32 to vector<2x1xf32>
    %12 = arith.subf %11, %10 : vector<2x1xf32>
    %13 = math.exp %12 : vector<2x1xf32>
    %cst_8 = arith.constant 1.000000e+00 : f32
    %14 = vector.broadcast %cst_8 : f32 to vector<2x1xf32>
    %15 = arith.addf %14, %13 : vector<2x1xf32>
    %cst_9 = arith.constant 1.000000e+00 : f32
    %16 = vector.broadcast %cst_9 : f32 to vector<2x1xf32>
    %17 = arith.divf %16, %15 : vector<2x1xf32>
    %c0_10 = arith.constant 0 : index
    %c0_11 = arith.constant 0 : index
    %18 = vector.load %arg5[%c0_10, %c0_11] : memref<2x1xf32, #tpu.memory_space<vmem>>, vector<2x1xf32>
    tpu.vector_store %arg5[%c0_10, %c0_11], %17 {strides = array<i32>} : memref<2x1xf32, #tpu.memory_space<vmem>>, vector<2x1xf32>,
    return
  }
  func.func @transform_0(%arg0: i32) -> (i32, i32) {
    %c0_i32 = arith.constant 0 : i32
    %c0_i32_0 = arith.constant 0 : i32
    %c0_i32_1 = arith.constant 0 : i32
    return %c0_i32, %c0_i32_0 : i32, i32
  }
  func.func @transform_1(%arg0: i32) -> (i32, i32) {
    %c0_i32 = arith.constant 0 : i32
    %c0_i32_0 = arith.constant 0 : i32
    %c0_i32_1 = arith.constant 0 : i32
    return %c0_i32, %c0_i32_0 : i32, i32
  }
  func.func @transform_2(%arg0: i32) -> (i32, i32) {
    %c0_i32 = arith.constant 0 : i32
    %c0_i32_0 = arith.constant 0 : i32
    %c0_i32_1 = arith.constant 0 : i32
    return %c0_i32, %c0_i32_0 : i32, i32
  }
  func.func @transform_3(%arg0: i32) -> (i32, i32) {
    %c0_i32 = arith.constant 0 : i32
    %c0_i32_0 = arith.constant 0 : i32
    %c0_i32_1 = arith.constant 0 : i32
    return %c0_i32, %c0_i32_0 : i32, i32
  }
  func.func @transform_4(%arg0: i32) -> (i32, i32) {
    %c0_i32 = arith.constant 0 : i32
    %c0_i32_0 = arith.constant 0 : i32
    %c0_i32_1 = arith.constant 0 : i32
    return %c0_i32, %c0_i32_0 : i32, i32
  }
}

</mosaic_0001>

<bundles_post_ra>
// kernel: discriminator_forward.6
= control target key start
LH: loop header
LB: loop body
LE: loop exit
PB: predicated region body
PF: predicated region fallthrough
CT: control target
= control target key end

     0   :  { %s393_s12 = smov 0   ;;  %s420_s0 = inlined_call_operand.vmem [shape: bf16[16,9,128], index: 0, kind: input, shape index: {}]   ;;  %s421_s1 = inlined_call_operand.vmem [shape: f32[1,1,128], index: 1, kind: input, shape index: {}]   ;;  %s422_s2 = inlined_call_operand.vmem [shape: f32[1,1,128], index: 2, kind: input, shape index: {}]   ;;  %s423_s3 = inlined_call_operand.vmem [shape: bf16[16,8,128], index: 3, kind: output, shape index: {}]  }
   0x1 LB: > { %s319_s13 = sadd.s32 4294967295, %s371_s12   ;;  %p323_p0 = scmp.ge.s32.totalorder %s371_s12, 1  ;;  %s371_s12 = sphi %s393_s12, %s13_s12  }
   0x2   : > { %p139_p1 = scmp.lt.s32.totalorder %s371_s12, 3 }
   0x4   : > { %p140_p2 = pnand %p323_p0, %p139_p1 }
   0x5   : > { %s324_s14 = sshll.u32 (!%p140_p2), %s319_s13, 3 }
   0x6   : > { %143 = sbr.rel (%p140_p2) target bundleno = 32 (0x20), region = 32  ;;  %p165_p3 = scmp.lt.s32.totalorder (!%p140_p2), %s324_s14, 15 }
   0xb   : > { %s425_s14 = smov (!%p165_p3, %s324_s14), 15  ;;  %v329_v0 = vld [vmem:[%s421_s1] ss:$0 sm:$0xff] }
   0xc   : > { %s333_s15 = sshll.u32 %s425_s14, 3  ;;  %v330_v9 = vld [vmem:[%s422_s2] ss:$0 sm:$0xff]  ;;  %s328_s23 = sshll.u32 %s425_s14, 2 }
   0xd   : > { %s169_s18 = scalar_lea.vmem %s420_s0, %s333_s15  ;;  %s175_s26 = scalar_lea.vmem %s423_s3, %s328_s23 }
   0xe   : > { %v177_v1 = vld [vmem:[%s169_s18] ss:$8 sps:$4 sm:$0xff]   ;;  %v179_v2 = vld [vmem:[%s169_s18 + $0x10] ss:$8 sps:$4 sm:$0xff]  }
   0xf   : > { %v181_v3 = vld [vmem:[%s169_s18 + $0x20] ss:$8 sps:$4 sm:$0xff]   ;;  %v185_v4 = vunpack.c.l.bf16 %v177_v1  ;;  %v186_v5 = vunpack.c.h.bf16 %v177_v1  ;;  %v187_v6 = vunpack.c.l.bf16 %v179_v2  ;;  %v188_v7 = vunpack.c.h.bf16 %v179_v2  ;;  %v183_v8 = vld [vmem:[%s169_s18 + $0x30] ss:$8 sps:$4 sm:$0xff]  }
  0x10   : > { %v189_v10 = vunpack.c.l.bf16 %v181_v3  ;;  %v190_v11 = vunpack.c.h.bf16 %v181_v3  ;;  %v191_v12 = vunpack.c.l.bf16 %v183_v8  ;;  %v192_v13 = vunpack.c.h.bf16 %v183_v8 }
  0x11   : > { %v200_v14 = vmul.f32 %v329_v0, %v185_v4  ;;  %v201_v15 = vmul.f32 %v329_v0, %v186_v5  ;;  %v202_v16 = vmul.f32 %v329_v0, %v187_v6  ;;  %v203_v17 = vmul.f32 %v329_v0, %v188_v7 }
  0x12   : > { %v204_v18 = vmul.f32 %v329_v0, %v189_v10  ;;  %v205_v19 = vmul.f32 %v329_v0, %v190_v11  ;;  %v206_v20 = vmul.f32 %v329_v0, %v191_v12  ;;  %v207_v21 = vmul.f32 %v329_v0, %v192_v13 }
  0x13   : > { %v215_v22 = vadd.f32 %v330_v9, %v200_v14  ;;  %v216_v23 = vadd.f32 %v330_v9, %v201_v15  ;;  %v217_v24 = vadd.f32 %v330_v9, %v202_v16  ;;  %v218_v25 = vadd.f32 %v330_v9, %v203_v17 }
  0x14   : > { %v219_v26 = vadd.f32 %v330_v9, %v204_v18  ;;  %v220_v27 = vadd.f32 %v330_v9, %v205_v19  ;;  %v221_v28 = vadd.f32 %v330_v9, %v206_v20  ;;  %v222_v29 = vadd.f32 %v330_v9, %v207_v21 }
  0x15   : > { %vm223_vm0 = vcmp.gt.f32.partialorder %v215_v22, 0.0  ;;  %vm224_vm1 = vcmp.gt.f32.partialorder %v216_v23, 0.0  ;;  %v231_v30 = vmul.f32 0.2, %v215_v22  ;;  %v232_v31 = vmul.f32 0.2, %v216_v23 }
  0x16   : > { %vm225_vm2 = vcmp.gt.f32.partialorder %v217_v24, 0.0  ;;  %vm226_vm3 = vcmp.gt.f32.partialorder %v218_v25, 0.0  ;;  %v233_v32 = vmul.f32 0.2, %v217_v24  ;;  %v234_v33 = vmul.f32 0.2, %v218_v25 }
  0x17   : > { %v239_v34 = vsel %vm223_vm0, %v215_v22, %v231_v30  ;;  %v240_v35 = vsel %vm224_vm1, %v216_v23, %v232_v31  ;;  %vm227_vm4 = vcmp.gt.f32.partialorder %v219_v26, 0.0  ;;  %vm228_vm5 = vcmp.gt.f32.partialorder %v220_v27, 0.0 }
  0x18   : > { %v337_v36 = vpack.c.bf16 %v240_v35, %v239_v34  ;;  %v241_v37 = vsel %vm225_vm2, %v217_v24, %v233_v32  ;;  %v242_v38 = vsel %vm226_vm3, %v218_v25, %v234_v33  ;;  %v235_v39 = vmul.f32 0.2, %v219_v26 }
  0x19   : > { %v342_v40 = vpack.c.bf16 %v242_v38, %v241_v37  ;;  %v236_v41 = vmul.f32 0.2, %v220_v27  ;;  %vm229_vm6 = vcmp.gt.f32.partialorder %v221_v28, 0.0  ;;  %vm230_vm7 = vcmp.gt.f32.partialorder %v222_v29, 0.0 }
  0x1a   : > { %338 = vst [vmem:[%s175_s26] sm:$0xff] %v337_v36   ;;  %v243_v42 = vsel %vm227_vm4, %v219_v26, %v235_v39  ;;  %v237_v43 = vmul.f32 0.2, %v221_v28  ;;  %v238_v44 = vmul.f32 0.2, %v222_v29 }
  0x1b   : > { %354 = vst [vmem:[%s175_s26 + $0x8] sm:$0xff] %v342_v40   ;;  %v244_v45 = vsel %vm228_vm5, %v220_v27, %v236_v41 }
  0x1c   : > { %v347_v46 = vpack.c.bf16 %v244_v45, %v243_v42  ;;  %v245_v47 = vsel %vm229_vm6, %v221_v28, %v237_v43  ;;  %v246_v48 = vsel %vm230_vm7, %v222_v29, %v238_v44 }
  0x1d   : > { %v352_v49 = vpack.c.bf16 %v246_v48, %v245_v47 }
  0x1e   : > { %355 = vst [vmem:[%s175_s26 + $0x10] sm:$0xff] %v347_v46  }
  0x1f   : > { %356 = vst [vmem:[%s175_s26 + $0x18] sm:$0xff] %v352_v49  }
  0x20 PF: > { %s13_s12 = sadd.s32 1, %s371_s12  }
  0x21   : > { %p10_p4 = scmp.ge.s32.totalorder %s13_s12, 4  }
  0x23   :  { %12 = sbr.rel (!%p10_p4) target bundleno = 1 (0x1), region = 62 }

// kernel: discriminator_forward.5
= control target key start
LH: loop header
LB: loop body
LE: loop exit
PB: predicated region body
PF: predicated region fallthrough
CT: control target
= control target key end

     0   :  { %s1607_s15 = smov 0   ;;  %s2139_s0 = inlined_call_operand.vmem [shape: bf16[144,512], index: 0, kind: input, shape index: {}]   ;;  %s2140_s1 = inlined_call_operand.vmem [shape: bf16[512,256], index: 1, kind: input, shape index: {}]   ;;  %s2141_s2 = inlined_call_operand.vmem [shape: bf16[144,128], index: 2, kind: output, shape index: {0}]   ;;  %s2142_s3 = inlined_call_operand.vmem [shape: f32[2,1,128], index: 3, kind: output, shape index: {1}]   ;;  %s2143_s4 = inlined_call_operand.vmem [shape: f32[2,1,128], index: 4, kind: output, shape index: {2}]  }
   0x1 LB: > { %s1613_s16 = sadd.s32 4294967295, %s1580_s15   ;;  %p1292_p0 = scmp.ge.s32.totalorder %s1580_s15, 1  ;;  %s1580_s15 = sphi %s1607_s15, %s15_s15  }
   0x2   : > { %p169_p1 = scmp.lt.s32.totalorder %s1580_s15, 3 }
   0x4   : > { %p170_p2 = pnand %p1292_p0, %p169_p1 }
   0x5   : > { %s202_s29 = smul.u32 (!%p170_p2), 9, %s1613_s16  ;;  %p215_p4 = scmp.lt.s32.totalorder (!%p170_p2), %s1613_s16, 1 }
   0x6   : > { %173 = sbr.rel (%p170_p2) target bundleno = 331 (0x14b), region = 28 }
   0x7   : > { %p203_p3 = scmp.lt.s32.totalorder (!%p170_p2), %s202_s29, 17 }
   0xb   : > { %v1450_v0 = vld [vmem:[%s2140_s1 + $0x74] ss:$8 sps:$4 sm:$0xff]   ;;  %v1454_v2 = vld [vmem:[%s2140_s1 + $0x70] ss:$8 sps:$4 sm:$0xff]   ;;  %v1456_v4 = vld [vmem:[%s2140_s1 + $0x64] ss:$8 sps:$4 sm:$0xff]  }
   0xc   : > { %v1452_v1 = vld [vmem:[%s2140_s1 + $0x174] ss:$8 sps:$4 sm:$0xff]   ;;  %717 = vmatprep.subr.bf16.mxu0 %v1450_v0  ;;  %v1455_v3 = vld [vmem:[%s2140_s1 + $0x170] ss:$8 sps:$4 sm:$0xff]   ;;  %v1458_v5 = vld [vmem:[%s2140_s1 + $0x164] ss:$8 sps:$4 sm:$0xff]  }
   0xd   : > { %798 = vmatprep.subr.bf16.mxu1 %v1452_v1  ;;  %718 = vmatpush1.bf16.msra.mxu0 %v1454_v2  ;;  %v1460_v6 = vld [vmem:[%s2140_s1 + $0x60] ss:$8 sps:$4 sm:$0xff]   ;;  %v1462_v8 = vld [vmem:[%s2140_s1 + $0x54] ss:$8 sps:$4 sm:$0xff]   ;;  %v1466_v10 = vld [vmem:[%s2140_s1 + $0x50] ss:$8 sps:$4 sm:$0xff]  }
   0xe   : > { %799 = vmatpush1.bf16.msra.mxu1 %v1455_v3  ;;  %719 = vmatprep.subr.bf16.mxu0 %v1456_v4  ;;  %v1461_v7 = vld [vmem:[%s2140_s1 + $0x160] ss:$8 sps:$4 sm:$0xff]   ;;  %v1464_v9 = vld [vmem:[%s2140_s1 + $0x154] ss:$8 sps:$4 sm:$0xff]   ;;  %v1467_v11 = vld [vmem:[%s2140_s1 + $0x150] ss:$8 sps:$4 sm:$0xff]  }
   0xf   : > { %800 = vmatprep.subr.bf16.mxu1 %v1458_v5  ;;  %v1468_v12 = vld [vmem:[%s2140_s1 + $0x44] ss:$8 sps:$4 sm:$0xff]   ;;  %v1472_v14 = vld [vmem:[%s2140_s1 + $0x40] ss:$8 sps:$4 sm:$0xff]   ;;  %v1474_v16 = vld [vmem:[%s2140_s1 + $0x34] ss:$8 sps:$4 sm:$0xff]  }
  0x10   : > { %v1470_v13 = vld [vmem:[%s2140_s1 + $0x144] ss:$8 sps:$4 sm:$0xff]   ;;  %v1473_v15 = vld [vmem:[%s2140_s1 + $0x140] ss:$8 sps:$4 sm:$0xff]   ;;  %v1476_v17 = vld [vmem:[%s2140_s1 + $0x134] ss:$8 sps:$4 sm:$0xff]  }
  0x11   : > { %720 = vmatpush1.bf16.msra.mxu0 %v1460_v6  ;;  %v1478_v18 = vld [vmem:[%s2140_s1 + $0x30] ss:$8 sps:$4 sm:$0xff]   ;;  %v1480_v20 = vld [vmem:[%s2140_s1 + $0x24] ss:$8 sps:$4 sm:$0xff]   ;;  %v1484_v22 = vld [vmem:[%s2140_s1 + $0x20] ss:$8 sps:$4 sm:$0xff]  }
  0x12   : > { %801 = vmatpush1.bf16.msra.mxu1 %v1461_v7  ;;  %721 = vmatprep.subr.bf16.mxu0 %v1462_v8  ;;  %v1479_v19 = vld [vmem:[%s2140_s1 + $0x130] ss:$8 sps:$4 sm:$0xff]   ;;  %v1482_v21 = vld [vmem:[%s2140_s1 + $0x124] ss:$8 sps:$4 sm:$0xff]   ;;  %v1485_v23 = vld [vmem:[%s2140_s1 + $0x120] ss:$8 sps:$4 sm:$0xff]  }
  0x13   : > { %802 = vmatprep.subr.bf16.mxu1 %v1464_v9  ;;  %v1486_v24 = vld [vmem:[%s2140_s1 + $0x14] ss:$8 sps:$4 sm:$0xff]   ;;  %v1490_v26 = vld [vmem:[%s2140_s1 + $0x10] ss:$8 sps:$4 sm:$0xff]   ;;  %v1492_v28 = vld [vmem:[%s2140_s1 + $0x4] ss:$8 sps:$4 sm:$0xff]  }
  0x14   : > { %v1488_v25 = vld [vmem:[%s2140_s1 + $0x114] ss:$8 sps:$4 sm:$0xff]   ;;  %v1491_v27 = vld [vmem:[%s2140_s1 + $0x110] ss:$8 sps:$4 sm:$0xff]   ;;  %v1494_v29 = vld [vmem:[%s2140_s1 + $0x104] ss:$8 sps:$4 sm:$0xff]  }
  0x15   : > { %722 = vmatpush1.bf16.msra.mxu0 %v1466_v10  ;;  %v1496_v30 = vld [vmem:[%s2140_s1] ss:$8 sps:$4 sm:$0xff]   ;;  %v1498_v32 = vld [vmem:[%s2140_s1 + $0xf4] ss:$8 sps:$4 sm:$0xff]   ;;  %v1502_v34 = vld [vmem:[%s2140_s1 + $0xf0] ss:$8 sps:$4 sm:$0xff]  }
  0x16   : > { %803 = vmatpush1.bf16.msra.mxu1 %v1467_v11  ;;  %723 = vmatprep.subr.bf16.mxu0 %v1468_v12  ;;  %v1497_v31 = vld [vmem:[%s2140_s1 + $0x100] ss:$8 sps:$4 sm:$0xff]   ;;  %v1500_v33 = vld [vmem:[%s2140_s1 + $0x1f4] ss:$8 sps:$4 sm:$0xff]   ;;  %v1503_v35 = vld [vmem:[%s2140_s1 + $0x1f0] ss:$8 sps:$4 sm:$0xff]  }
  0x17   : > { %804 = vmatprep.subr.bf16.mxu1 %v1470_v13  ;;  %v1504_v36 = vld [vmem:[%s2140_s1 + $0xe4] ss:$8 sps:$4 sm:$0xff]   ;;  %s2177_s29 = smov (!%p203_p3, %s202_s29), 17  ;;  %v1508_v38 = vld [vmem:[%s2140_s1 + $0xe0] ss:$8 sps:$4 sm:$0xff]   ;;  %s2179_s16 = smov (!%p215_p4, %s1613_s16), 1 }
  0x18   : > { %v1506_v37 = vld [vmem:[%s2140_s1 + $0x1e4] ss:$8 sps:$4 sm:$0xff]   ;;  %v1509_v39 = vld [vmem:[%s2140_s1 + $0x1e0] ss:$8 sps:$4 sm:$0xff]   ;;  %v1510_v40 = vld [vmem:[%s2140_s1 + $0xd4] ss:$8 sps:$4 sm:$0xff]   ;;  %s217_s12 = scalar_lea.vmem %s2142_s3, %s2179_s16  ;;  %s220_s18 = scalar_lea.vmem %s2143_s4, %s2179_s16 }
  0x19   : > { %724 = vmatpush1.bf16.msra.mxu0 %v1472_v14  ;;  %v1512_v41 = vld [vmem:[%s2140_s1 + $0x1d4] ss:$8 sps:$4 sm:$0xff]   ;;  %s1391_s5 = sshll.u32 %s2177_s29, 4  ;;  %v1514_v42 = vld [vmem:[%s2140_s1 + $0xd0] ss:$8 sps:$4 sm:$0xff]  }
  0x1a   : > { %805 = vmatpush1.bf16.msra.mxu1 %v1473_v15  ;;  %725 = vmatprep.subr.bf16.mxu0 %v1474_v16  ;;  %v1515_v43 = vld [vmem:[%s2140_s1 + $0x1d0] ss:$8 sps:$4 sm:$0xff]   ;;  %v1516_v44 = vld [vmem:[%s2140_s1 + $0xc4] ss:$8 sps:$4 sm:$0xff]   ;;  %s1759_s14 = scalar_lea.vmem %s2139_s0, %s1391_s5  ;;  %v1520_v46 = vld [vmem:[%s2140_s1 + $0xc0] ss:$8 sps:$4 sm:$0xff]  }
  0x1b   : > { %806 = vmatprep.subr.bf16.mxu1 %v1476_v17  ;;  %v1518_v45 = vld [vmem:[%s2140_s1 + $0x1c4] ss:$8 sps:$4 sm:$0xff]   ;;  %v1521_v47 = vld [vmem:[%s2140_s1 + $0x1c0] ss:$8 sps:$4 sm:$0xff]   ;;  %v1522_v48 = vld [vmem:[%s2140_s1 + $0xb4] ss:$8 sps:$4 sm:$0xff]  }
  0x1c   : > { %v1548_v49 = vld [vmem:[%s1759_s14 + $0x4] ss:$16 sps:$4 sm:$0xff]   ;;  %v1551_v51 = vld [vmem:[%s1759_s14 + $0xc] ss:$16 sps:$4 sm:$0xff]   ;;  %v1526_v52 = vld [vmem:[%s2140_s1 + $0xb0] ss:$8 sps:$4 sm:$0xff]  }
  0x1d   : > { %726 = vmatpush1.bf16.msra.mxu0 %v1478_v18  ;;  %v1524_v50 = vld [vmem:[%s2140_s1 + $0x1b4] ss:$8 sps:$4 sm:$0xff]   ;;  %749 = vmatprep.mubr.bf16.mxu0 %v1548_v49  ;;  %v1527_v53 = vld [vmem:[%s2140_s1 + $0x1b0] ss:$8 sps:$4 sm:$0xff]   ;;  %v1528_v54 = vld [vmem:[%s2140_s1 + $0xa4] ss:$8 sps:$4 sm:$0xff]  }
  0x1e   : > { %807 = vmatpush1.bf16.msra.mxu1 %v1479_v19  ;;  %727 = vmatprep.subr.bf16.mxu0 %v1480_v20  ;;  %v1530_v55 = vld [vmem:[%s2140_s1 + $0x1a4] ss:$8 sps:$4 sm:$0xff]   ;;  %v1532_v56 = vld [vmem:[%s2140_s1 + $0xa0] ss:$8 sps:$4 sm:$0xff]   ;;  %v1534_v58 = vld [vmem:[%s2140_s1 + $0x94] ss:$8 sps:$4 sm:$0xff]  }
  0x1f   : > { %808 = vmatprep.subr.bf16.mxu1 %v1482_v21  ;;  %830 = vmatprep.mubr.bf16.mxu1 %v1551_v51  ;;  %v1533_v57 = vld [vmem:[%s2140_s1 + $0x1a0] ss:$8 sps:$4 sm:$0xff]   ;;  %v1536_v59 = vld [vmem:[%s2140_s1 + $0x194] ss:$8 sps:$4 sm:$0xff]   ;;  %v1538_v60 = vld [vmem:[%s2140_s1 + $0x90] ss:$8 sps:$4 sm:$0xff]  }
  0x20   : > { %v1539_v61 = vld [vmem:[%s2140_s1 + $0x190] ss:$8 sps:$4 sm:$0xff]   ;;  %v1540_v62 = vld [vmem:[%s2140_s1 + $0x84] ss:$8 sps:$4 sm:$0xff]   ;;  %v1544_v0 = vld [vmem:[%s2140_s1 + $0x80] ss:$8 sps:$4 sm:$0xff]  }
  0x21   : > { %728 = vmatpush1.bf16.msra.mxu0 %v1484_v22  ;;  %v1542_v63 = vld [vmem:[%s2140_s1 + $0x184] ss:$8 sps:$4 sm:$0xff]   ;;  %v1545_v1 = vld [vmem:[%s2140_s1 + $0x180] ss:$8 sps:$4 sm:$0xff]   ;;  %v888_v22 = vlaneseq }
  0x22   : > { %809 = vmatpush1.bf16.msra.mxu1 %v1485_v23  ;;  %729 = vmatprep.subr.bf16.mxu0 %v1486_v24  ;;  %v1546_v2 = vld [vmem:[%s1759_s14] ss:$16 sps:$4 sm:$0xff]   ;;  %v1549_v3 = vld [vmem:[%s1759_s14 + $0x8] ss:$16 sps:$4 sm:$0xff]   ;;  %v1552_v4 = vld [vmem:[%s1759_s14 + $0x24] ss:$16 sps:$4 sm:$0xff]  }
  0x23   : > { %810 = vmatprep.subr.bf16.mxu1 %v1488_v25  ;;  %v1554_v5 = vld [vmem:[%s1759_s14 + $0x2c] ss:$16 sps:$4 sm:$0xff]   ;;  %v1556_v6 = vld [vmem:[%s1759_s14 + $0x20] ss:$16 sps:$4 sm:$0xff]   ;;  %v1557_v7 = vld [vmem:[%s1759_s14 + $0x28] ss:$16 sps:$4 sm:$0xff]  }
  0x24   : > { %v1558_v8 = vld [vmem:[%s1759_s14 + $0x44] ss:$16 sps:$4 sm:$0xff]   ;;  %v1560_v9 = vld [vmem:[%s1759_s14 + $0x4c] ss:$16 sps:$4 sm:$0xff]   ;;  %v1562_v10 = vld [vmem:[%s1759_s14 + $0x40] ss:$16 sps:$4 sm:$0xff]  }
  0x25   : > { %730 = vmatpush1.bf16.msra.mxu0 %v1490_v26  ;;  %v1563_v11 = vld [vmem:[%s1759_s14 + $0x48] ss:$16 sps:$4 sm:$0xff]   ;;  %v1564_v12 = vld [vmem:[%s1759_s14 + $0x64] ss:$16 sps:$4 sm:$0xff]   ;;  %v1566_v13 = vld [vmem:[%s1759_s14 + $0x6c] ss:$16 sps:$4 sm:$0xff]  }
  0x26   : > { %811 = vmatpush1.bf16.msra.mxu1 %v1491_v27  ;;  %731 = vmatprep.subr.bf16.mxu0 %v1492_v28  ;;  %v237_v14 = vld [vmem:[%s1759_s14 + $0x80] sm:$0xff]  ;;  %v238_v15 = vld [vmem:[%s1759_s14 + $0x88] sm:$0xff]  ;;  %v1836_v23 = vshrl.u32 %v888_v22, 7 }
  0x27   : > { %812 = vmatprep.subr.bf16.mxu1 %v1494_v29  ;;  %v1568_v16 = vld [vmem:[%s1759_s14 + $0x60] ss:$16 sps:$4 sm:$0xff]   ;;  %v1569_v17 = vld [vmem:[%s1759_s14 + $0x68] ss:$16 sps:$4 sm:$0xff]   ;;  %v1313_v18 = vcombine.high %v237_v14, %v237_v14  ;;  %v1315_v19 = vcombine.high %v238_v15, %v238_v15  ;;  %v1312_v20 = vcombine.low %v237_v14, %v237_v14  ;;  %v1314_v21 = vcombine.low %v238_v15, %v238_v15  ;;  %s1295_s14 = sshll.u32 %s2177_s29, 2 }
  0x28   : > { %v1839_v24 = vmul.u32.u64.low 3817748708, %v1836_v23  ;;  %v1840_v25 = vmul.u32.u64.high 3817748708, %v1836_v23, %v1839_v24  ;;  %v955_v26 = vadd.s32 8, %v1836_v23  ;;  %v956_v27 = vadd.s32 16, %v1836_v23  ;;  %s1977_s9 = scalar_lea.vmem %s2141_s2, %s1295_s14 }
  0x29   : > { %732 = vmatpush1.bf16.msra.mxu0 %v1496_v30  ;;  %v957_v30 = vadd.s32 24, %v1836_v23  ;;  %v1876_v51 = vadd.s32 56, %v1836_v23  ;;  %vm890_vm3 = vcmp.lt.s32.totalorder %v1836_v23, 7 }
  0x2a   : > { %813 = vmatpush1.bf16.msra.mxu1 %v1497_v31  ;;  %733 = vmatprep.subr.bf16.mxu0 %v1498_v32  ;;  %v1844_v28 = vmul.u32.u64.low 3817748708, %v955_v26  ;;  %v1845_v29 = vmul.u32.u64.high 3817748708, %v955_v26, %v1844_v28  ;;  %v1848_v31 = vmul.u32.u64.low 3817748708, %v956_v27  ;;  %v1849_v32 = vmul.u32.u64.high 3817748708, %v956_v27, %v1848_v31 }
  0x2b   : > { %814 = vmatprep.subr.bf16.mxu1 %v1500_v33  ;;  %v958_v33 = vadd.s32 32, %v1836_v23 }
  0x2d   : > { %734 = vmatpush2.bf16.msra.mxu0 %v1502_v34  ;;  %v969_v34 = vshrl.u32 %v1840_v25, 3 }
  0x2e   : > { %815 = vmatpush2.bf16.msra.mxu1 %v1503_v35  ;;  %735 = vmatprep.subr.bf16.mxu0 %v1504_v36  ;;  %v1853_v35 = vmul.u32.u64.low 3817748708, %v957_v30  ;;  %v1854_v36 = vmul.u32.u64.high 3817748708, %v957_v30, %v1853_v35 }
  0x2f   : > { %816 = vmatprep.subr.bf16.mxu1 %v1506_v37  ;;  %v1857_v37 = vadd.s32 40, %v1836_v23 }
  0x30   : > { %v1002_v49 = vshrl.u32 %v1854_v36, 3 }
  0x31   : > { %736 = vmatpush2.bf16.msra.mxu0 %v1508_v38 }
  0x32   : > { %817 = vmatpush2.bf16.msra.mxu1 %v1509_v39  ;;  %737 = vmatprep.subr.bf16.mxu0 %v1510_v40  ;;  %v1859_v38 = vmul.u32.u64.low 3817748708, %v958_v33  ;;  %v1860_v39 = vmul.u32.u64.high 3817748708, %v958_v33, %v1859_v38  ;;  %v970_v40 = vmul.u32 9, %v969_v34 }
  0x33   : > { %818 = vmatprep.subr.bf16.mxu1 %v1512_v41  ;;  %v980_v41 = vshrl.u32 %v1845_v29, 3 }
  0x35   : > { %738 = vmatpush2.bf16.msra.mxu0 %v1514_v42 }
  0x36   : > { %819 = vmatpush2.bf16.msra.mxu1 %v1515_v43  ;;  %739 = vmatprep.subr.bf16.mxu0 %v1516_v44  ;;  %v1864_v42 = vmul.u32.u64.low 3817748708, %v1857_v37  ;;  %v1865_v43 = vmul.u32.u64.high 3817748708, %v1857_v37, %v1864_v42  ;;  %v991_v44 = vshrl.u32 %v1849_v32, 3 }
  0x37   : > { %820 = vmatprep.subr.bf16.mxu1 %v1518_v45  ;;  %v1869_v45 = vsub.s32 %v1836_v23, %v970_v40 }
  0x39   : > { %740 = vmatpush2.bf16.msra.mxu0 %v1520_v46  ;;  %v981_v46 = vmul.u32 9, %v980_v41  ;;  %vm1062_vm0 = vcmp.ne.s32.totalorder %v1869_v45, 0  ;;  %vm1071_vm1 = vcmp.lt.s32.totalorder %v1869_v45, 0 }
  0x3a   : > { %821 = vmatpush2.bf16.msra.mxu1 %v1521_v47  ;;  %741 = vmatprep.subr.bf16.mxu0 %v1522_v48  ;;  %vm1902_vm2 = vmand %vm1071_vm1, %vm1062_vm0 }
  0x3b   : > { %822 = vmatprep.subr.bf16.mxu1 %v1524_v50  ;;  %v1873_v50 = vadd.s32 48, %v1836_v23 }
  0x3d   : > { %742 = vmatpush2.bf16.msra.mxu0 %v1526_v52  ;;  %v1879_v52 = vadd.s32 64, %v1836_v23 }
  0x3e   : > { %823 = vmatpush2.bf16.msra.mxu1 %v1527_v53  ;;  %743 = vmatprep.subr.bf16.mxu0 %v1528_v54 }
  0x3f   : > { %824 = vmatprep.subr.bf16.mxu1 %v1530_v55  ;;  %v992_v55 = vmul.u32 9, %v991_v44 }
  0x41   : > { %744 = vmatpush2.bf16.msra.mxu0 %v1532_v56  ;;  %v1013_v56 = vshrl.u32 %v1860_v39, 3 }
  0x42   : > { %825 = vmatpush2.bf16.msra.mxu1 %v1533_v57  ;;  %745 = vmatprep.subr.bf16.mxu0 %v1534_v58  ;;  %v1885_v57 = vadd.s32 9, %v1869_v45  ;;  %v1887_v58 = vsub.s32 %v955_v26, %v981_v46 }
  0x43   : > { %826 = vmatprep.subr.bf16.mxu1 %v1536_v59 }
  0x44   : > { %vm1063_vm4 = vcmp.ne.s32.totalorder %v1887_v58, 0  ;;  %vm1072_vm5 = vcmp.lt.s32.totalorder %v1887_v58, 0 }
  0x45   : > { %746 = vmatpush2.bf16.msra.mxu0 %v1538_v60  ;;  %vm1947_vm10 = vmand %vm1072_vm5, %vm1063_vm4 }
  0x46   : > { %827 = vmatpush2.bf16.msra.mxu1 %v1539_v61  ;;  %747 = vmatprep.subr.bf16.mxu0 %v1540_v62  ;;  %v1003_v61 = vmul.u32 9, %v1002_v49  ;;  %v1024_v62 = vshrl.u32 %v1865_v43, 3 }
  0x47   : > { %828 = vmatprep.subr.bf16.mxu1 %v1542_v63 }
  0x48   : > { %v1914_v14 = vsub.s32 %v957_v30, %v1003_v61  ;;  %v1025_v15 = vmul.u32 9, %v1024_v62 }
  0x49   : > { %748 = vmatpush2.bf16.msra.mxu0 %v1544_v0  ;;  %v1891_v63 = vmul.u32.u64.low 3817748708, %v1873_v50  ;;  %v1892_v0 = vmul.u32.u64.high 3817748708, %v1873_v50, %v1891_v63 }
  0x4a   : > { %829 = vmatpush2.bf16.msra.mxu1 %v1545_v1  ;;  %vm1065_vm8 = vcmp.ne.s32.totalorder %v1914_v14, 0  ;;  %vm1074_vm9 = vcmp.lt.s32.totalorder %v1914_v14, 0  ;;  %v1933_v28 = vsub.s32 %v1857_v37, %v1025_v15  ;;  %v1092_v42 = vadd.s32 9, %v1914_v14 }
  0x4b   : > { %v1035_v29 = vshrl.u32 %v1892_v0, 3  ;;  %vm1969_vm14 = vmand %vm1074_vm9, %vm1065_vm8 }
  0x4c   : > { %750 = vmatmul.mubr.bf16.vlgmr.msra.gmra.mxu0 %v1546_v2  ;;  %v1895_v1 = vmul.u32.u64.low 3817748708, %v1876_v51  ;;  %v1896_v2 = vmul.u32.u64.high 3817748708, %v1876_v51, %v1895_v1  ;;  %vm1067_vm15 = vcmp.ne.s32.totalorder %v1933_v28, 0  ;;  %vm1076_vm1 = vcmp.lt.s32.totalorder %v1933_v28, 0 }
  0x4d   : > { %831 = vmatmul.mubr.bf16.vlgmr.msra.gmra.mxu1 %v1549_v3  ;;  %759 = vmatprep.mubr.bf16.mxu0 %v1552_v4  ;;  %v1899_v3 = vmul.u32.u64.low 3817748708, %v1879_v52  ;;  %v1900_v4 = vmul.u32.u64.high 3817748708, %v1879_v52, %v1899_v3  ;;  %v1036_v49 = vmul.u32 9, %v1035_v29  ;;  %v1101_v1 = vsel %vm1969_vm14, %v1092_v42, %v1914_v14  ;;  %vm2014_vm4 = vmand %vm1076_vm1, %vm1067_vm15 }
  0x4e   : > { %840 = vmatprep.mubr.bf16.mxu1 %v1554_v5  ;;  %v1046_v32 = vshrl.u32 %v1896_v2, 3  ;;  %v1094_v2 = vadd.s32 9, %v1933_v28 }
  0x54   : > { %760 = vmatmul.mubr.bf16.gmra.mxu0 %v1556_v6 }
  0x55   : > { %841 = vmatmul.mubr.bf16.gmra.mxu1 %v1557_v7  ;;  %769 = vmatprep.mubr.bf16.mxu0 %v1558_v8  ;;  %v1906_v8 = vsub.s32 %v956_v27, %v992_v55  ;;  %v1047_v55 = vmul.u32 9, %v1046_v32 }
  0x56   : > { %850 = vmatprep.mubr.bf16.mxu1 %v1560_v9  ;;  %v1014_v9 = vmul.u32 9, %v1013_v56 }
  0x57   : > { %vm1064_vm6 = vcmp.ne.s32.totalorder %v1906_v8, 0  ;;  %vm1073_vm7 = vcmp.lt.s32.totalorder %v1906_v8, 0  ;;  %v1091_v25 = vadd.s32 9, %v1906_v8 }
  0x58   : > { %vm1959_vm13 = vmand %vm1073_vm7, %vm1064_vm6  ;;  %vm2031_vm7 = vcmp.lt.s32.totalorder %v1101_v1, 8 }
  0x5c   : > { %770 = vmatmul.mubr.bf16.gmra.mxu0 %v1562_v10 }
  0x5d   : > { %851 = vmatmul.mubr.bf16.gmra.mxu1 %v1563_v11  ;;  %779 = vmatprep.mubr.bf16.mxu0 %v1564_v12 }
  0x5e   : > { %860 = vmatprep.mubr.bf16.mxu1 %v1566_v13 }
  0x64   : > { %780 = vmatmul.mubr.bf16.gmra.mxu0 %v1568_v16 }
  0x65   : > { %861 = vmatmul.mubr.bf16.gmra.mxu1 %v1569_v17  ;;  %789 = vmatprep.mubr.bf16.mxu0 %v1313_v18  ;;  %v1098_v17 = vsel %vm1902_vm2, %v1885_v57, %v1869_v45 }
  0x66   : > { %870 = vmatprep.mubr.bf16.mxu1 %v1315_v19  ;;  %vm2000_vm2 = vcmp.lt.s32.totalorder %v1098_v17, 8 }
  0x6c   : > { %790 = vmatmul.mubr.bf16.gmra.mxu0 %v1312_v20  ;;  %v1090_v20 = vadd.s32 9, %v1887_v58 }
  0x6d   : > { %871 = vmatmul.mubr.bf16.gmra.mxu1 %v1314_v21  ;;  %v1925_v21 = vsub.s32 %v958_v33, %v1014_v9  ;;  %v1057_v33 = vshrl.u32 %v1900_v4, 3 }
  0x6f   : > { %vm1066_vm11 = vcmp.ne.s32.totalorder %v1925_v21, 0  ;;  %vm1075_vm12 = vcmp.lt.s32.totalorder %v1925_v21, 0  ;;  %v1093_v43 = vadd.s32 9, %v1925_v21  ;;  %v1058_v56 = vmul.u32 9, %v1057_v33 }
  0x70   : > { %vm1983_vm0 = vmand %vm1075_vm12, %vm1066_vm11 }
 0x10c   : > { %v751_v47 = vpop.f32.mrf.mxu0 }
 0x10d   : > { %v832_v48 = vpop.f32.mrf.mxu1 }
 0x10e   : > { %v753_v53 = vpop.f32.mrf.mxu0  ;;  %v833_v34 = vadd.f32 %v832_v48, %v751_v47 }
 0x10f   : > { %v834_v54 = vpop.f32.mrf.mxu1 }
 0x110   : > { %v755_v59 = vpop.f32.mrf.mxu0  ;;  %v1908_v10 = vadd.f32 %v834_v54, %v753_v53 }
 0x111   : > { %v836_v60 = vpop.f32.mrf.mxu1 }
 0x112   : > { %v757_v5 = vpop.f32.mrf.mxu0  ;;  %v879_v22 = vrot.slane %v1908_v10, 1  ;;  %v837_v35 = vadd.f32 %v836_v60, %v755_v59  ;;  %v1099_v59 = vsel %vm1947_vm10, %v1090_v20, %v1887_v58  ;;  %v1100_v60 = vsel %vm1959_vm13, %v1091_v25, %v1906_v8 }
 0x113   : > { %v838_v6 = vpop.f32.mrf.mxu1  ;;  %v2019_v8 = vsub.s32 %v1873_v50, %v1036_v49  ;;  %vm1108_vm5 = vcmp.lt.s32.totalorder %v1099_v59, 8  ;;  %vm2027_vm6 = vcmp.lt.s32.totalorder %v1100_v60, 8 }
 0x114   : > { %v839_v11 = vadd.f32 %v838_v6, %v757_v5  ;;  %v1910_v12 = vpop.f32.mrf.mxu0  ;;  %v1102_v6 = vsel %vm1983_vm0, %v1093_v43, %v1925_v21 }
 0x115   : > { %v1912_v13 = vpop.f32.mrf.mxu1  ;;  %vm2037_vm8 = vcmp.lt.s32.totalorder %v1102_v6, 8  ;;  %vm1068_vm9 = vcmp.ne.s32.totalorder %v2019_v8, 0  ;;  %vm1077_vm10 = vcmp.lt.s32.totalorder %v2019_v8, 0 }
 0x116   : > { %v880_v16 = vrot.slane %v839_v11, 1  ;;  %v763_v18 = vpop.f32.mrf.mxu0  ;;  %v843_v58 = vadd.f32 %v1912_v13, %v1910_v12  ;;  %v2022_v11 = vsub.s32 %v1876_v51, %v1047_v55  ;;  %v2025_v12 = vsub.s32 %v1879_v52, %v1058_v56  ;;  %vm2061_vm15 = vmand %vm1077_vm10, %vm1068_vm9 }
 0x117   : > { %v844_v19 = vpop.f32.mrf.mxu1  ;;  %v1103_v52 = vsel %vm2014_vm4, %v1094_v2, %v1933_v28 }
 0x118   : > { %v845_v24 = vadd.f32 %v844_v19, %v763_v18  ;;  %v765_v26 = vpop.f32.mrf.mxu0  ;;  %v898_v30 = vsel %vm890_vm3, %v879_v22, %v880_v16  ;;  %vm1069_vm11 = vcmp.ne.s32.totalorder %v2022_v11, 0  ;;  %vm1070_vm12 = vcmp.ne.s32.totalorder %v2025_v12, 0 }
 0x119   : > { %v846_v27 = vpop.f32.mrf.mxu1  ;;  %v900_v44 = vadd.f32 %v898_v30, %v833_v34  ;;  %vm1078_vm13 = vcmp.lt.s32.totalorder %v2022_v11, 0  ;;  %vm1079_vm14 = vcmp.lt.s32.totalorder %v2025_v12, 0  ;;  %v1096_v41 = vadd.s32 9, %v2022_v11 }
 0x11a   : > { %v881_v31 = vrot.slane %v845_v24, 1  ;;  %v767_v37 = vpop.f32.mrf.mxu0  ;;  %v847_v13 = vadd.f32 %v846_v27, %v765_v26  ;;  %v1097_v42 = vadd.s32 9, %v2025_v12  ;;  %vm2074_vm0 = vmand %vm1078_vm13, %vm1069_vm11  ;;  %vm2078_vm1 = vcmp.lt.s32.totalorder %v1103_v52, 8 }
 0x11b   : > { %v848_v38 = vpop.f32.mrf.mxu1  ;;  %v1134_v27 = vsel %vm2000_vm2, %v900_v44, 0.0  ;;  %vm2086_vm2 = vmand %vm1079_vm14, %vm1070_vm12  ;;  %v1105_v3 = vsel %vm2074_vm0, %v1096_v41, %v2022_v11 }
 0x11c   : > { %v897_v39 = vsel %vm890_vm3, %v880_v16, %v881_v31  ;;  %v849_v40 = vadd.f32 %v848_v38, %v767_v37  ;;  %v771_v46 = vpop.f32.mrf.mxu0  ;;  %v1158_v43 = vmul.f32 %v1134_v27, %v1134_v27  ;;  %v1106_v6 = vsel %vm2086_vm2, %v1097_v42, %v2025_v12 }
 0x11d   : > { %v901_v45 = vadd.f32 %v897_v39, %v837_v35  ;;  %v852_v47 = vpop.f32.mrf.mxu1 }
 0x11e   : > { %v882_v53 = vrot.slane %v849_v40, 1  ;;  %v773_v61 = vpop.f32.mrf.mxu0  ;;  %v853_v29 = vadd.f32 %v852_v47, %v771_v46  ;;  %v1095_v40 = vadd.s32 9, %v2019_v8 }
 0x11f   : > { %v1404_v57 = vpack.c.bf16 %v901_v45, %v900_v44  ;;  %v854_v62 = vpop.f32.mrf.mxu1  ;;  %v1135_v20 = vsel %vm1108_vm5, %v901_v45, 0.0  ;;  %vm2108_vm5 = vcmp.lt.s32.totalorder %v1105_v3, 8 }
 0x120   : > { %v896_v63 = vsel %vm890_vm3, %v881_v31, %v882_v53  ;;  %v855_v0 = vadd.f32 %v854_v62, %v773_v61  ;;  %v775_v4 = vpop.f32.mrf.mxu0  ;;  %v1159_v33 = vmul.f32 %v1135_v20, %v1135_v20  ;;  %v1143_v48 = vadd.f32 %v1135_v20, %v1134_v27 }
 0x121   : > { %1405 = vst [vmem:[%s1977_s9] sm:$0xff] %v1404_v57   ;;  %v856_v5 = vpop.f32.mrf.mxu1  ;;  %v902_v14 = vadd.f32 %v896_v63, %v843_v58 }
 0x122   : > { %v883_v9 = vrot.slane %v855_v0, 1  ;;  %v777_v50 = vpop.f32.mrf.mxu0  ;;  %v857_v49 = vadd.f32 %v856_v5, %v775_v4  ;;  %v1167_v57 = vadd.f32 %v1159_v33, %v1158_v43  ;;  %v1104_v0 = vsel %vm2061_vm15, %v1095_v40, %v2019_v8 }
 0x123   : > { %v858_v17 = vpop.f32.mrf.mxu1  ;;  %v1136_v28 = vsel %vm2027_vm6, %v902_v14, 0.0  ;;  %vm1113_vm4 = vcmp.lt.s32.totalorder %v1104_v0, 8  ;;  %vm2112_vm6 = vcmp.lt.s32.totalorder %v1106_v6, 8 }
 0x124   : > { %v895_v18 = vsel %vm890_vm3, %v882_v53, %v883_v9  ;;  %v859_v51 = vadd.f32 %v858_v17, %v777_v50  ;;  %v781_v24 = vpop.f32.mrf.mxu0  ;;  %v1160_v44 = vmul.f32 %v1136_v28, %v1136_v28  ;;  %v1144_v58 = vadd.f32 %v1143_v48, %v1136_v28 }
 0x125   : > { %v903_v21 = vadd.f32 %v895_v18, %v847_v13  ;;  %v862_v25 = vpop.f32.mrf.mxu1 }
 0x126   : > { %v884_v26 = vrot.slane %v859_v51, 1  ;;  %v783_v31 = vpop.f32.mrf.mxu0  ;;  %v1168_v4 = vadd.f32 %v1167_v57, %v1160_v44 }
 0x127   : > { %v1409_v30 = vpack.c.bf16 %v903_v21, %v902_v14  ;;  %v864_v32 = vpop.f32.mrf.mxu1  ;;  %v1137_v45 = vsel %vm2031_vm7, %v903_v21, 0.0 }
 0x128   : > { %v894_v34 = vsel %vm890_vm3, %v883_v9, %v884_v26  ;;  %v865_v35 = vadd.f32 %v864_v32, %v783_v31  ;;  %v785_v37 = vpop.f32.mrf.mxu0  ;;  %v1161_v62 = vmul.f32 %v1137_v45, %v1137_v45  ;;  %v863_v9 = vadd.f32 %v862_v25, %v781_v24 }
 0x129   : > { %1421 = vst [vmem:[%s1977_s9 + $0x8] sm:$0xff] %v1409_v30   ;;  %v904_v36 = vadd.f32 %v894_v34, %v853_v29  ;;  %v866_v38 = vpop.f32.mrf.mxu1  ;;  %v1145_v16 = vadd.f32 %v1144_v58, %v1137_v45 }
 0x12a   : > { %v885_v46 = vrot.slane %v865_v35, 1  ;;  %v787_v54 = vpop.f32.mrf.mxu0  ;;  %v1169_v17 = vadd.f32 %v1168_v4, %v1161_v62 }
 0x12b   : > { %v868_v55 = vpop.f32.mrf.mxu1  ;;  %v1138_v59 = vsel %vm2037_vm8, %v904_v36, 0.0 }
 0x12c   : > { %v893_v60 = vsel %vm890_vm3, %v884_v26, %v885_v46  ;;  %v869_v61 = vadd.f32 %v868_v55, %v787_v54  ;;  %v791_v1 = vpop.f32.mrf.mxu0  ;;  %v1162_v7 = vmul.f32 %v1138_v59, %v1138_v59  ;;  %v1146_v52 = vadd.f32 %v1145_v16, %v1138_v59 }
 0x12d   : > { %v905_v63 = vadd.f32 %v893_v60, %v857_v49  ;;  %v872_v2 = vpop.f32.mrf.mxu1  ;;  %v867_v26 = vadd.f32 %v866_v38, %v785_v37 }
 0x12e   : > { %v886_v5 = vrot.slane %v869_v61, 1  ;;  %v793_v14 = vpop.f32.mrf.mxu0  ;;  %v1170_v25 = vadd.f32 %v1169_v17, %v1162_v7  ;;  %v873_v28 = vadd.f32 %v872_v2, %v791_v1 }
 0x12f   : > { %v1414_v13 = vpack.c.bf16 %v905_v63, %v904_v36  ;;  %v1139_v8 = vsel %vm2078_vm1, %v905_v63, 0.0  ;;  %v874_v15 = vpop.f32.mrf.mxu1 }
 0x130   : > { %v892_v11 = vsel %vm890_vm3, %v885_v46, %v886_v5  ;;  %v875_v50 = vadd.f32 %v874_v15, %v793_v14  ;;  %v795_v12 = vpop.f32.mrf.mxu0  ;;  %v1163_v20 = vmul.f32 %v1139_v8, %v1139_v8  ;;  %v1147_v31 = vadd.f32 %v1146_v52, %v1139_v8 }
 0x131   : > { %1422 = vst [vmem:[%s1977_s9 + $0x10] sm:$0xff] %v1414_v13   ;;  %v906_v18 = vadd.f32 %v892_v11, %v863_v9  ;;  %v876_v19 = vpop.f32.mrf.mxu1 }
 0x132   : > { %v887_v21 = vrot.slane %v875_v50, 1  ;;  %v796_v29 = vpop.f32.mrf.mxu0  ;;  %v1171_v39 = vadd.f32 %v1170_v25, %v1163_v20 }
 0x133   : > { %v1140_v27 = vsel %vm1113_vm4, %v906_v18, 0.0  ;;  %v877_v30 = vpop.f32.mrf.mxu1 }
 0x134   : > { %v1164_v32 = vmul.f32 %v1140_v27, %v1140_v27  ;;  %v891_v33 = vsel %vm890_vm3, %v886_v5, %v887_v21  ;;  %v899_v34 = vsel %vm890_vm3, %v887_v21, %v879_v22  ;;  %v1148_v37 = vadd.f32 %v1147_v31, %v1140_v27 }
 0x135   : > { %v907_v35 = vadd.f32 %v891_v33, %v867_v26  ;;  %v908_v36 = vadd.f32 %v899_v34, %v873_v28 }
 0x136   : > { %v1172_v43 = vadd.f32 %v1171_v39, %v1164_v32 }
 0x137   : > { %v1400_v38 = vpack.c.bf16 %v908_v36, %v908_v36  ;;  %v1419_v40 = vpack.c.bf16 %v907_v35, %v906_v18  ;;  %v1141_v41 = vsel %vm2108_vm5, %v907_v35, 0.0  ;;  %v1142_v42 = vsel %vm2112_vm6, %v908_v36, 0.0 }
 0x138   : > { %v1149_v44 = vadd.f32 %v1148_v37, %v1141_v41  ;;  %v1165_v10 = vmul.f32 %v1141_v41, %v1141_v41  ;;  %v1166_v22 = vmul.f32 %v1142_v42, %v1142_v42 }
 0x139   : > { %1423 = vst [vmem:[%s1977_s9 + $0x18] sm:$0xff] %v1419_v40   ;;  %954 = vst [vmem:[%s1977_s9 + $0x20] sm:$0xf] %v1400_v38 }
 0x13a   : > { %v1150_v23 = vadd.f32 %v1149_v44, %v1142_v42  ;;  %v1173_v45 = vadd.f32 %v1172_v43, %v1165_v10 }
 0x13c   : > { %v1151_v46 = vrot.slane %v1150_v23, 4  ;;  %v1174_v47 = vadd.f32 %v1173_v45, %v1166_v22 }
 0x13e   : > { %v1152_v48 = vadd.f32 %v1151_v46, %v1150_v23  ;;  %v1175_v49 = vrot.slane %v1174_v47, 4 }
 0x140   : > { %v1153_v53 = vrot.slane %v1152_v48, 2  ;;  %v1176_v54 = vadd.f32 %v1175_v49, %v1174_v47 }
 0x142   : > { %v1154_v55 = vadd.f32 %v1153_v53, %v1152_v48  ;;  %v1177_v56 = vrot.slane %v1176_v54, 2 }
 0x144   : > { %v1155_v57 = vrot.slane %v1154_v55, 1  ;;  %v1178_v59 = vadd.f32 %v1177_v56, %v1176_v54 }
 0x146   : > { %v1156_v60 = vadd.f32 %v1155_v57, %v1154_v55  ;;  %v1179_v61 = vrot.slane %v1178_v59, 1 }
 0x148   : > { %1157 = vst [vmem:[%s217_s12] sm:$0x1] %v1156_v60  ;;  %v1180_v62 = vadd.f32 %v1179_v61, %v1178_v59 }
 0x14a   : > { %1181 = vst [vmem:[%s220_s18] sm:$0x1] %v1180_v62 }
 0x14b PF: > { %s15_s15 = sadd.s32 1, %s1580_s15  }
 0x14c   : > { %p12_p5 = scmp.ge.s32.totalorder %s15_s15, 4  }
 0x14e   :  { %14 = sbr.rel (!%p12_p5) target bundleno = 1 (0x1), region = 82 }

// kernel: discriminator_forward.8
= control target key start
LH: loop header
LB: loop body
LE: loop exit
PB: predicated region body
PF: predicated region fallthrough
CT: control target
= control target key end

     0   :  { %s384_s12 = smov 0   ;;  %s414_s0 = inlined_call_operand.vmem [shape: bf16[8,5,256], index: 0, kind: input, shape index: {}]   ;;  %s415_s1 = inlined_call_operand.vmem [shape: f32[1,1,256], index: 1, kind: input, shape index: {}]   ;;  %s416_s2 = inlined_call_operand.vmem [shape: f32[1,1,256], index: 2, kind: input, shape index: {}]   ;;  %s417_s3 = inlined_call_operand.vmem [shape: f32[8,4,256], index: 3, kind: output, shape index: {}]  }
   0x1 LB: > { %s333_s13 = sadd.s32 4294967295, %s362_s12   ;;  %p337_p0 = scmp.ge.s32.totalorder %s362_s12, 1  ;;  %s362_s12 = sphi %s384_s12, %s13_s12  }
   0x2   : > { %p139_p1 = scmp.lt.s32.totalorder %s362_s12, 3 }
   0x4   : > { %p140_p2 = pnand %p337_p0, %p139_p1 }
   0x5   : > { %s338_s14 = sshll.u32 (!%p140_p2), %s333_s13, 2 }
   0x6   : > { %143 = sbr.rel (%p140_p2) target bundleno = 34 (0x22), region = 32  ;;  %p166_p3 = scmp.lt.s32.totalorder (!%p140_p2), %s338_s14, 7 }
   0xb   : > { %v193_v0 = vlaneseq  ;;  %s419_s14 = smov (!%p166_p3, %s338_s14), 7  ;;  %v191_v2 = vld [vmem:[%s415_s1] sm:$0x3] }
   0xc   : > { %v211_v5 = vld [vmem:[%s416_s2] sm:$0x3]  ;;  %s346_s19 = sshll.u32 %s419_s14, 3 }
   0xd   : > { %v194_v1 = vshrl.u32 %v193_v0, 7  ;;  %s170_s22 = scalar_lea.vmem %s414_s0, %s346_s19  ;;  %s177_s25 = scalar_lea.vmem %s417_s3, %s346_s19 }
   0xe   : > { %v179_v8 = vld [vmem:[%s170_s22] sm:$0x33]  ;;  %v180_v9 = vld [vmem:[%s170_s22 + $0x8] sm:$0x33]  ;;  %v181_v10 = vld [vmem:[%s170_s22 + $0x10] sm:$0x33] }
   0xf   : > { %v195_v3 = vsub.s32 0, %v194_v1  ;;  %v199_v4 = vsub.s32 1, %v194_v1  ;;  %v182_v13 = vld [vmem:[%s170_s22 + $0x18] sm:$0x33]  ;;  %v183_v14 = vunpack.c.l.bf16 %v179_v8  ;;  %v184_v15 = vunpack.c.h.bf16 %v179_v8 }
  0x10   : > { %v185_v16 = vunpack.c.l.bf16 %v180_v9  ;;  %v186_v17 = vunpack.c.h.bf16 %v180_v9  ;;  %v187_v18 = vunpack.c.l.bf16 %v181_v10  ;;  %v188_v19 = vunpack.c.h.bf16 %v181_v10 }
  0x11   : > { %v196_v6 = vrot.slane %v191_v2, %v195_v3  ;;  %v200_v7 = vrot.slane %v191_v2, %v199_v4  ;;  %v216_v11 = vrot.slane %v211_v5, %v195_v3  ;;  %v220_v12 = vrot.slane %v211_v5, %v199_v4 }
  0x12   : > { %v189_v20 = vunpack.c.l.bf16 %v182_v13  ;;  %v190_v21 = vunpack.c.h.bf16 %v182_v13 }
  0x13   : > { %v203_v22 = vmul.f32 %v196_v6, %v183_v14  ;;  %v204_v23 = vmul.f32 %v200_v7, %v184_v15  ;;  %v205_v24 = vmul.f32 %v196_v6, %v185_v16  ;;  %v206_v25 = vmul.f32 %v200_v7, %v186_v17 }
  0x14   : > { %v207_v26 = vmul.f32 %v196_v6, %v187_v18  ;;  %v208_v27 = vmul.f32 %v200_v7, %v188_v19  ;;  %v209_v28 = vmul.f32 %v196_v6, %v189_v20  ;;  %v210_v29 = vmul.f32 %v200_v7, %v190_v21 }
  0x15   : > { %v223_v30 = vadd.f32 %v216_v11, %v203_v22  ;;  %v224_v31 = vadd.f32 %v220_v12, %v204_v23  ;;  %v225_v32 = vadd.f32 %v216_v11, %v205_v24  ;;  %v226_v33 = vadd.f32 %v220_v12, %v206_v25 }
  0x16   : > { %v227_v34 = vadd.f32 %v216_v11, %v207_v26  ;;  %v228_v35 = vadd.f32 %v220_v12, %v208_v27  ;;  %v229_v36 = vadd.f32 %v216_v11, %v209_v28  ;;  %v230_v37 = vadd.f32 %v220_v12, %v210_v29 }
  0x17   : > { %vm231_vm0 = vcmp.gt.f32.partialorder %v223_v30, 0.0  ;;  %vm232_vm1 = vcmp.gt.f32.partialorder %v224_v31, 0.0  ;;  %v239_v38 = vmul.f32 0.2, %v223_v30  ;;  %v240_v39 = vmul.f32 0.2, %v224_v31 }
  0x18   : > { %vm233_vm2 = vcmp.gt.f32.partialorder %v225_v32, 0.0  ;;  %vm234_vm3 = vcmp.gt.f32.partialorder %v226_v33, 0.0  ;;  %v241_v40 = vmul.f32 0.2, %v225_v32  ;;  %v242_v41 = vmul.f32 0.2, %v226_v33 }
  0x19   : > { %v247_v42 = vsel %vm231_vm0, %v223_v30, %v239_v38  ;;  %v248_v43 = vsel %vm232_vm1, %v224_v31, %v240_v39  ;;  %vm235_vm4 = vcmp.gt.f32.partialorder %v227_v34, 0.0  ;;  %vm236_vm5 = vcmp.gt.f32.partialorder %v228_v35, 0.0 }
  0x1a   : > { %v263_v44 = vcombine.low %v247_v42, %v248_v43  ;;  %v249_v45 = vsel %vm233_vm2, %v225_v32, %v241_v40  ;;  %v250_v46 = vsel %vm234_vm3, %v226_v33, %v242_v41  ;;  %v243_v47 = vmul.f32 0.2, %v227_v34 }
  0x1b   : > { %v264_v48 = vcombine.low %v249_v45, %v250_v46  ;;  %v244_v49 = vmul.f32 0.2, %v228_v35  ;;  %vm237_vm6 = vcmp.gt.f32.partialorder %v229_v36, 0.0  ;;  %vm238_vm7 = vcmp.gt.f32.partialorder %v230_v37, 0.0 }
  0x1c   : > { %271 = vst [vmem:[%s177_s25] sm:$0xff] %v263_v44  ;;  %v251_v50 = vsel %vm235_vm4, %v227_v34, %v243_v47  ;;  %v245_v51 = vmul.f32 0.2, %v229_v36  ;;  %v246_v52 = vmul.f32 0.2, %v230_v37 }
  0x1d   : > { %272 = vst [vmem:[%s177_s25 + $0x8] sm:$0xff] %v264_v48  ;;  %v252_v53 = vsel %vm236_vm5, %v228_v35, %v244_v49 }
  0x1e   : > { %v265_v54 = vcombine.low %v251_v50, %v252_v53  ;;  %v253_v55 = vsel %vm237_vm6, %v229_v36, %v245_v51  ;;  %v254_v56 = vsel %vm238_vm7, %v230_v37, %v246_v52 }
  0x1f   : > { %v266_v57 = vcombine.low %v253_v55, %v254_v56 }
  0x20   : > { %273 = vst [vmem:[%s177_s25 + $0x10] sm:$0xff] %v265_v54 }
  0x21   : > { %274 = vst [vmem:[%s177_s25 + $0x18] sm:$0xff] %v266_v57 }
  0x22 PF: > { %s13_s12 = sadd.s32 1, %s362_s12  }
  0x23   : > { %p10_p4 = scmp.ge.s32.totalorder %s13_s12, 4  }
  0x25   :  { %12 = sbr.rel (!%p10_p4) target bundleno = 1 (0x1), region = 62 }

// kernel: discriminator_forward.9
= control target key start
LH: loop header
LB: loop body
LE: loop exit
PB: predicated region body
PF: predicated region fallthrough
CT: control target
= control target key end

     0   :  { %v35_v1 = vlaneseq  ;;  %v871_v2 = vmov 1983009808   ;;  %vm771_vm0 = vcmask 1041408   ;;  %vm851_vm1 = vcmask 1024   ;;  %s1113_s3 = inlined_call_operand.<no memory space> [shape: f32[1,1], index: 3, kind: input, shape index: {}]   ;;  %s1114_s2 = inlined_call_operand.vmem [shape: f32[2,4096], index: 2, kind: input, shape index: {}]   ;;  %s1115_s1 = inlined_call_operand.vmem [shape: f32[1,4096], index: 1, kind: input, shape index: {}]   ;;  %s1116_s0 = inlined_call_operand.vmem [shape: f32[2,4096], index: 0, kind: input, shape index: {}]   ;;  %s1117_s4 = inlined_call_operand.vmem [shape: f32[2,1], index: 4, kind: output, shape index: {}]  }
   0x1   :  { %v9_v0 = vstv %s1113_s3  ;;  %v205_v3 = vunpack.c.l.s4 %v871_v2  ;;  %v23_v6 = vld [vmem:[%s1114_s2] sm:$0xff]  ;;  %v24_v7 = vld [vmem:[%s1114_s2 + $0x8] sm:$0xff]  ;;  %v25_v22 = vld [vmem:[%s1114_s2 + $0x10] sm:$0xff] }
   0x2   :  { %10 = vst [vmem:[#allocation2] sm:$0x1] %v9_v0  ;;  %v36_v4 = vshrl.u32 %v35_v1, 7  ;;  %v203_v8 = vcombine.high %v23_v6, %v23_v6  ;;  %v19_v11 = vld [vmem:[%s1115_s1] sm:$0xff]  ;;  %v220_v13 = vcombine.high %v24_v7, %v24_v7  ;;  %v237_v33 = vcombine.high %v25_v22, %v25_v22  ;;  %v20_v42 = vld [vmem:[%s1115_s1 + $0x8] sm:$0xff]  ;;  %v26_v45 = vld [vmem:[%s1114_s2 + $0x18] sm:$0xff] }
   0x3   :  { %v206_v5 = vunpack.c.0.s8 %v205_v3  ;;  %v254_v56 = vcombine.high %v26_v45, %v26_v45  ;;  %v27_v0 = vld [vmem:[%s1114_s2 + $0x20] sm:$0xff] }
   0x4   :  { %v908_v10 = vsub.s32 0, %v36_v4  ;;  %v913_v12 = vsub.s32 1, %v36_v4  ;;  %v915_v14 = vsub.s32 2, %v36_v4  ;;  %v917_v15 = vsub.s32 3, %v36_v4 }
   0x5   :  { %v906_v9 = vsub.s32 %v206_v5, %v36_v4  ;;  %v922_v19 = vsub.s32 4, %v36_v4  ;;  %v924_v20 = vsub.s32 5, %v36_v4  ;;  %v926_v21 = vsub.s32 6, %v36_v4  ;;  %v403_v5 = vld [vmem:[%s1116_s0] sm:$0xff] }
   0x6   :  { %v38_v18 = vrot.slane %v19_v11, %v908_v10  ;;  %v42_v23 = vrot.slane %v19_v11, %v913_v12  ;;  %v932_v24 = vsub.s32 7, %v36_v4  ;;  %v46_v27 = vrot.slane %v19_v11, %v915_v14 }
   0x7   :  { %v210_v16 = vrot.slane %v23_v6, %v906_v9  ;;  %v217_v17 = vrot.slane %v203_v8, %v906_v9  ;;  %v227_v25 = vrot.slane %v24_v7, %v906_v9  ;;  %v234_v26 = vrot.slane %v220_v13, %v906_v9 }
   0x8   :  { %v50_v28 = vrot.slane %v19_v11, %v917_v15  ;;  %v54_v31 = vrot.slane %v19_v11, %v922_v19  ;;  %v58_v32 = vrot.slane %v19_v11, %v924_v20  ;;  %v62_v34 = vrot.slane %v19_v11, %v926_v21 }
   0x9   :  { %v218_v29 = vcombine.high %v210_v16, %v210_v16  ;;  %v219_v30 = vcombine.high %v217_v17, %v217_v17  ;;  %v66_v35 = vrot.slane %v19_v11, %v932_v24  ;;  %v235_v36 = vcombine.high %v227_v25, %v227_v25 }
   0xa   :  { %v236_v37 = vcombine.high %v234_v26, %v234_v26  ;;  %v371_v38 = vadd.f32 %v210_v16, %v38_v18  ;;  %v373_v40 = vadd.f32 %v217_v17, %v46_v27  ;;  %v244_v43 = vrot.slane %v25_v22, %v906_v9 }
   0xb   :  { %v372_v39 = vadd.f32 %v218_v29, %v42_v23  ;;  %v374_v41 = vadd.f32 %v219_v30, %v50_v28  ;;  %v251_v44 = vrot.slane %v237_v33, %v906_v9  ;;  %v375_v46 = vadd.f32 %v227_v25, %v54_v31  ;;  %v404_v31 = vld [vmem:[%s1116_s0 + $0x8] sm:$0xff] }
   0xc   :  { %v376_v47 = vadd.f32 %v235_v36, %v58_v32  ;;  %v377_v48 = vadd.f32 %v234_v26, %v62_v34  ;;  %v378_v49 = vadd.f32 %v236_v37, %v66_v35  ;;  %v70_v52 = vrot.slane %v20_v42, %v908_v10  ;;  %v976_v32 = vld [vmem:[%s1115_s1 + $0x10] sm:$0xff]  ;;  %v28_v33 = vld [vmem:[%s1114_s2 + $0x28] sm:$0xff] }
   0xd   :  { %v443_v50 = vcombine.low %v371_v38, %v372_v39  ;;  %v444_v51 = vcombine.low %v373_v40, %v374_v41  ;;  %v74_v53 = vrot.slane %v20_v42, %v913_v12  ;;  %v78_v54 = vrot.slane %v20_v42, %v915_v14 }
   0xe   :  { %v252_v55 = vcombine.high %v244_v43, %v244_v43  ;;  %v82_v59 = vrot.slane %v20_v42, %v917_v15  ;;  %v253_v60 = vcombine.high %v251_v44, %v251_v44  ;;  %v460_v61 = vcombine.low %v375_v46, %v376_v47 }
   0xf   :  { %v451_v57 = vrot.slane %v443_v50, %v906_v9  ;;  %v458_v58 = vrot.slane %v444_v51, %v906_v9  ;;  %v461_v62 = vcombine.low %v377_v48, %v378_v49  ;;  %v261_v1 = vrot.slane %v26_v45, %v906_v9 }
  0x10   :  { %v268_v2 = vrot.slane %v254_v56, %v906_v9  ;;  %v379_v3 = vadd.f32 %v244_v43, %v70_v52  ;;  %v380_v4 = vadd.f32 %v252_v55, %v74_v53  ;;  %v381_v6 = vadd.f32 %v251_v44, %v78_v54 }
  0x11   :  { %v459_v63 = vcombine.low %v451_v57, %v458_v58  ;;  %v382_v7 = vadd.f32 %v253_v60, %v82_v59  ;;  %v468_v8 = vrot.slane %v460_v61, %v906_v9  ;;  %v475_v11 = vrot.slane %v461_v62, %v906_v9 }
  0x12   :  { %v86_v13 = vrot.slane %v20_v42, %v922_v19  ;;  %v90_v16 = vrot.slane %v20_v42, %v924_v20  ;;  %v271_v17 = vcombine.high %v27_v0, %v27_v0  ;;  %v94_v22 = vrot.slane %v20_v42, %v926_v21 }
  0x13   :  { %v587_v18 = vmul.f32 %v459_v63, %v403_v5  ;;  %v98_v23 = vrot.slane %v20_v42, %v932_v24  ;;  %v269_v25 = vcombine.high %v261_v1, %v261_v1  ;;  %v270_v26 = vcombine.high %v268_v2, %v268_v2  ;;  %v405_v63 = vld [vmem:[%s1116_s0 + $0x10] sm:$0xff] }
  0x14   :  { %v476_v27 = vcombine.low %v468_v8, %v475_v11  ;;  %v477_v28 = vcombine.low %v379_v3, %v380_v4  ;;  %v478_v29 = vcombine.low %v381_v6, %v382_v7  ;;  %v278_v34 = vrot.slane %v27_v0, %v906_v9 }
  0x15   :  { %v603_v30 = vcombine.high %v587_v18, %v587_v18  ;;  %v285_v35 = vrot.slane %v271_v17, %v906_v9  ;;  %v610_v36 = vrot.slane %v587_v18, %v906_v9  ;;  %v383_v37 = vadd.f32 %v261_v1, %v86_v13  ;;  %v29_v1 = vld [vmem:[%s1114_s2 + $0x30] sm:$0xff] }
  0x16   :  { %v384_v38 = vadd.f32 %v269_v25, %v90_v16  ;;  %v385_v39 = vadd.f32 %v268_v2, %v94_v22  ;;  %v386_v40 = vadd.f32 %v270_v26, %v98_v23  ;;  %v485_v41 = vrot.slane %v477_v28, %v906_v9 }
  0x17   :  { %v492_v42 = vrot.slane %v478_v29, %v906_v9  ;;  %v588_v43 = vmul.f32 %v476_v27, %v404_v31  ;;  %v617_v44 = vrot.slane %v603_v30, %v906_v9  ;;  %v102_v45 = vrot.slane %v976_v32, %v908_v10  ;;  %v1020_v27 = vld [vmem:[%s1115_s1 + $0x18] sm:$0xff] }
  0x18   :  { %v106_v46 = vrot.slane %v976_v32, %v913_v12  ;;  %v288_v47 = vcombine.high %v28_v33, %v28_v33  ;;  %v110_v48 = vrot.slane %v976_v32, %v915_v14  ;;  %v114_v49 = vrot.slane %v976_v32, %v917_v15 }
  0x19   :  { %v286_v50 = vcombine.high %v278_v34, %v278_v34  ;;  %v618_v51 = vcombine.high %v610_v36, %v610_v36  ;;  %v118_v52 = vrot.slane %v976_v32, %v922_v19  ;;  %v287_v53 = vcombine.high %v285_v35, %v285_v35 }
  0x1a   :  { %v494_v54 = vcombine.low %v383_v37, %v384_v38  ;;  %v495_v55 = vcombine.low %v385_v39, %v386_v40  ;;  %v493_v56 = vcombine.low %v485_v41, %v492_v42  ;;  %v619_v57 = vcombine.high %v617_v44, %v617_v44 }
  0x1b   :  { %v620_v58 = vcombine.high %v588_v43, %v588_v43  ;;  %v627_v59 = vrot.slane %v588_v43, %v906_v9  ;;  %v295_v60 = vrot.slane %v28_v33, %v906_v9  ;;  %v302_v61 = vrot.slane %v288_v47, %v906_v9  ;;  %v406_v43 = vld [vmem:[%s1116_s0 + $0x18] sm:$0xff] }
  0x1c   :  { %v387_v62 = vadd.f32 %v278_v34, %v102_v45  ;;  %v772_v0 = vsel %vm771_vm0, %v610_v36, 0.0  ;;  %v388_v2 = vadd.f32 %v286_v50, %v106_v46  ;;  %v389_v3 = vadd.f32 %v285_v35, %v110_v48  ;;  %v30_v45 = vld [vmem:[%s1114_s2 + $0x38] sm:$0xff] }
  0x1d   :  { %v773_v4 = vsel %vm771_vm0, %v618_v51, 0.0  ;;  %v775_v5 = vsel %vm771_vm0, %v617_v44, 0.0  ;;  %v390_v6 = vadd.f32 %v287_v53, %v114_v49  ;;  %v502_v7 = vrot.slane %v494_v54, %v906_v9 }
  0x1e   :  { %v509_v8 = vrot.slane %v495_v55, %v906_v9  ;;  %v774_v11 = vadd.f32 %v773_v4, %v772_v0  ;;  %v589_v13 = vmul.f32 %v493_v56, %v405_v63  ;;  %v634_v16 = vrot.slane %v620_v58, %v906_v9 }
  0x1f   :  { %v635_v17 = vcombine.high %v627_v59, %v627_v59  ;;  %v777_v18 = vsel %vm771_vm0, %v619_v57, 0.0  ;;  %v122_v22 = vrot.slane %v976_v32, %v924_v20  ;;  %v126_v23 = vrot.slane %v976_v32, %v926_v21 }
  0x20   :  { %v305_v25 = vcombine.high %v29_v1, %v29_v1  ;;  %v776_v26 = vadd.f32 %v775_v5, %v774_v11  ;;  %v130_v28 = vrot.slane %v976_v32, %v932_v24  ;;  %v303_v29 = vcombine.high %v295_v60, %v295_v60 }
  0x21   :  { %v304_v30 = vcombine.high %v302_v61, %v302_v61  ;;  %v779_v31 = vsel %vm771_vm0, %v627_v59, 0.0  ;;  %v510_v33 = vcombine.low %v502_v7, %v509_v8  ;;  %v511_v34 = vcombine.low %v387_v62, %v388_v2 }
  0x22   :  { %v512_v35 = vcombine.low %v389_v3, %v390_v6  ;;  %v778_v36 = vadd.f32 %v777_v18, %v776_v26  ;;  %v636_v37 = vcombine.high %v634_v16, %v634_v16  ;;  %v637_v38 = vcombine.high %v589_v13, %v589_v13 }
  0x23   :  { %v644_v39 = vrot.slane %v589_v13, %v906_v9  ;;  %v781_v40 = vsel %vm771_vm0, %v635_v17, 0.0  ;;  %v134_v41 = vrot.slane %v1020_v27, %v908_v10  ;;  %v312_v42 = vrot.slane %v29_v1, %v906_v9 }
  0x24   :  { %v319_v32 = vrot.slane %v305_v25, %v906_v9  ;;  %v780_v44 = vadd.f32 %v779_v31, %v778_v36  ;;  %v391_v46 = vadd.f32 %v295_v60, %v118_v52  ;;  %v392_v47 = vadd.f32 %v303_v29, %v122_v22 }
  0x25   :  { %v393_v48 = vadd.f32 %v302_v61, %v126_v23  ;;  %v783_v49 = vsel %vm771_vm0, %v634_v16, 0.0  ;;  %v394_v50 = vadd.f32 %v304_v30, %v130_v28  ;;  %v519_v10 = vrot.slane %v511_v34, %v906_v9 }
  0x26   :  { %v526_v51 = vrot.slane %v512_v35, %v906_v9  ;;  %v782_v53 = vadd.f32 %v781_v40, %v780_v44  ;;  %v590_v54 = vmul.f32 %v510_v33, %v406_v43  ;;  %v651_v55 = vrot.slane %v637_v38, %v906_v9 }
  0x27   :  { %v652_v56 = vcombine.high %v644_v39, %v644_v39  ;;  %v785_v57 = vsel %vm771_vm0, %v636_v37, 0.0  ;;  %v138_v58 = vrot.slane %v1020_v27, %v913_v12  ;;  %v142_v52 = vrot.slane %v1020_v27, %v915_v14 }
  0x28   :  { %v322_v59 = vcombine.high %v30_v45, %v30_v45  ;;  %v784_v60 = vadd.f32 %v783_v49, %v782_v53  ;;  %v146_v61 = vrot.slane %v1020_v27, %v917_v15  ;;  %v320_v62 = vcombine.high %v312_v42, %v312_v42  ;;  %v407_v15 = vld [vmem:[%s1116_s0 + $0x20] sm:$0xff] }
  0x29   :  { %v321_v63 = vcombine.high %v319_v32, %v319_v32  ;;  %v787_v0 = vsel %vm771_vm0, %v644_v39, 0.0  ;;  %v527_v1 = vcombine.low %v519_v10, %v526_v51  ;;  %v528_v2 = vcombine.low %v391_v46, %v392_v47 }
  0x2a   :  { %v529_v3 = vcombine.low %v393_v48, %v394_v50  ;;  %v786_v4 = vadd.f32 %v785_v57, %v784_v60  ;;  %v653_v5 = vcombine.high %v651_v55, %v651_v55  ;;  %v654_v6 = vcombine.high %v590_v54, %v590_v54 }
  0x2b   :  { %v661_v12 = vrot.slane %v590_v54, %v906_v9  ;;  %v789_v7 = vsel %vm771_vm0, %v652_v56, 0.0  ;;  %v329_v14 = vrot.slane %v30_v45, %v906_v9  ;;  %v336_v8 = vrot.slane %v322_v59, %v906_v9 }
  0x2c   :  { %v788_v11 = vadd.f32 %v787_v0, %v786_v4  ;;  %v395_v13 = vadd.f32 %v312_v42, %v134_v41  ;;  %v396_v16 = vadd.f32 %v320_v62, %v138_v58  ;;  %v397_v17 = vadd.f32 %v319_v32, %v142_v52 }
  0x2d   :  { %v791_v18 = vsel %vm771_vm0, %v651_v55, 0.0  ;;  %v398_v22 = vadd.f32 %v321_v63, %v146_v61  ;;  %v536_v23 = vrot.slane %v528_v2, %v906_v9  ;;  %v543_v25 = vrot.slane %v529_v3, %v906_v9  ;;  %v409_v2 = vld [vmem:[%s1116_s0 + $0x30] sm:$0xff] }
  0x2e   :  { %v790_v26 = vadd.f32 %v789_v7, %v788_v11  ;;  %v591_v28 = vmul.f32 %v527_v1, %v407_v15  ;;  %v668_v29 = vrot.slane %v654_v6, %v906_v9  ;;  %v669_v30 = vcombine.high %v661_v12, %v661_v12 }
  0x2f   :  { %v793_v31 = vsel %vm771_vm0, %v653_v5, 0.0  ;;  %v150_v33 = vrot.slane %v1020_v27, %v922_v19  ;;  %v154_v34 = vrot.slane %v1020_v27, %v924_v20  ;;  %v158_v35 = vrot.slane %v1020_v27, %v926_v21  ;;  %v408_v21 = vld [vmem:[%s1116_s0 + $0x28] sm:$0xff] }
  0x30   :  { %v792_v36 = vadd.f32 %v791_v18, %v790_v26  ;;  %v162_v37 = vrot.slane %v1020_v27, %v932_v24  ;;  %v337_v38 = vcombine.high %v329_v14, %v329_v14  ;;  %v338_v39 = vcombine.high %v336_v8, %v336_v8  ;;  %v410_v26 = vld [vmem:[%s1116_s0 + $0x38] sm:$0xff] }
  0x31   :  { %v795_v40 = vsel %vm771_vm0, %v661_v12, 0.0  ;;  %v544_v41 = vcombine.low %v536_v23, %v543_v25  ;;  %v545_v42 = vcombine.low %v395_v13, %v396_v16  ;;  %v546_v32 = vcombine.low %v397_v17, %v398_v22 }
  0x32   :  { %v794_v43 = vadd.f32 %v793_v31, %v792_v36  ;;  %v670_v44 = vcombine.high %v668_v29, %v668_v29  ;;  %v671_v19 = vcombine.high %v591_v28, %v591_v28  ;;  %v678_v45 = vrot.slane %v591_v28, %v906_v9 }
  0x33   :  { %v797_v20 = vsel %vm771_vm0, %v669_v30, 0.0  ;;  %v399_v24 = vadd.f32 %v329_v14, %v150_v33  ;;  %v400_v27 = vadd.f32 %v337_v38, %v154_v34  ;;  %v401_v47 = vadd.f32 %v336_v8, %v158_v35 }
  0x34   :  { %v796_v46 = vadd.f32 %v795_v40, %v794_v43  ;;  %v799_v48 = vsel %vm771_vm0, %v668_v29, 0.0  ;;  %v402_v49 = vadd.f32 %v338_v39, %v162_v37  ;;  %v553_v50 = vrot.slane %v545_v42, %v906_v9 }
  0x35   :  { %v560_v10 = vrot.slane %v546_v32, %v906_v9  ;;  %v592_v53 = vmul.f32 %v544_v41, %v408_v21  ;;  %v685_v54 = vrot.slane %v671_v19, %v906_v9  ;;  %v686_v55 = vcombine.high %v678_v45, %v678_v45 }
  0x36   :  { %v798_v51 = vadd.f32 %v797_v20, %v796_v46  ;;  %v801_v56 = vsel %vm771_vm0, %v670_v44, 0.0  ;;  %v803_v58 = vsel %vm771_vm0, %v678_v45, 0.0  ;;  %v562_v59 = vcombine.low %v399_v24, %v400_v27 }
  0x37   :  { %v561_v52 = vcombine.low %v553_v50, %v560_v10  ;;  %v563_v60 = vcombine.low %v401_v47, %v402_v49  ;;  %v687_v62 = vcombine.high %v685_v54, %v685_v54  ;;  %v688_v63 = vcombine.high %v592_v53, %v592_v53 }
  0x38   :  { %v800_v57 = vadd.f32 %v799_v48, %v798_v51  ;;  %v695_v0 = vrot.slane %v592_v53, %v906_v9  ;;  %v805_v1 = vsel %vm771_vm0, %v686_v55, 0.0  ;;  %v807_v4 = vsel %vm771_vm0, %v685_v54, 0.0 }
  0x39   :  { %v570_v5 = vrot.slane %v562_v59, %v906_v9  ;;  %v577_v6 = vrot.slane %v563_v60, %v906_v9  ;;  %v593_v7 = vmul.f32 %v561_v52, %v409_v2  ;;  %v702_v14 = vrot.slane %v688_v63, %v906_v9 }
  0x3a   :  { %v802_v61 = vadd.f32 %v801_v56, %v800_v57  ;;  %v703_v8 = vcombine.high %v695_v0, %v695_v0  ;;  %v809_v15 = vsel %vm771_vm0, %v687_v62, 0.0  ;;  %v811_v13 = vsel %vm771_vm0, %v695_v0, 0.0 }
  0x3b   :  { %v578_v16 = vcombine.low %v570_v5, %v577_v6  ;;  %v704_v18 = vcombine.high %v702_v14, %v702_v14  ;;  %v705_v22 = vcombine.high %v593_v7, %v593_v7  ;;  %v712_v23 = vrot.slane %v593_v7, %v906_v9 }
  0x3c   :  { %v804_v3 = vadd.f32 %v803_v58, %v802_v61  ;;  %v813_v25 = vsel %vm771_vm0, %v703_v8, 0.0  ;;  %v815_v29 = vsel %vm771_vm0, %v702_v14, 0.0 }
  0x3d   :  { %v594_v31 = vmul.f32 %v578_v16, %v410_v26  ;;  %v719_v33 = vrot.slane %v705_v22, %v906_v9  ;;  %v720_v34 = vcombine.high %v712_v23, %v712_v23  ;;  %v817_v35 = vsel %vm771_vm0, %v704_v18, 0.0 }
  0x3e   :  { %v806_v12 = vadd.f32 %v805_v1, %v804_v3  ;;  %v819_v37 = vsel %vm771_vm0, %v712_v23, 0.0 }
  0x3f   :  { %v721_v39 = vcombine.high %v719_v33, %v719_v33  ;;  %v722_v40 = vcombine.high %v594_v31, %v594_v31  ;;  %v729_v41 = vrot.slane %v594_v31, %v906_v9  ;;  %v821_v42 = vsel %vm771_vm0, %v720_v34, 0.0 }
  0x40   :  { %v808_v11 = vadd.f32 %v807_v4, %v806_v12  ;;  %v823_v43 = vsel %vm771_vm0, %v719_v33, 0.0 }
  0x41   :  { %v736_v19 = vrot.slane %v722_v40, %v906_v9  ;;  %v737_v45 = vcombine.high %v729_v41, %v729_v41  ;;  %v825_v20 = vsel %vm771_vm0, %v721_v39, 0.0  ;;  %v827_v46 = vsel %vm771_vm0, %v729_v41, 0.0  ;;  %v857_v9 = vld [vmem:[#allocation2] ss:$0 sm:$0xff] }
  0x42   :  { %v810_v17 = vadd.f32 %v809_v15, %v808_v11 }
  0x43   :  { %v738_v27 = vcombine.high %v736_v19, %v736_v19  ;;  %v829_v47 = vsel %vm771_vm0, %v737_v45, 0.0  ;;  %v831_v49 = vsel %vm771_vm0, %v736_v19, 0.0 }
  0x44   :  { %v812_v28 = vadd.f32 %v811_v13, %v810_v17 }
  0x45   :  { %v833_v10 = vsel %vm771_vm0, %v738_v27, 0.0 }
  0x46   :  { %v814_v30 = vadd.f32 %v813_v25, %v812_v28 }
  0x48   :  { %v816_v36 = vadd.f32 %v815_v29, %v814_v30 }
  0x4a   :  { %v818_v38 = vadd.f32 %v817_v35, %v816_v36 }
  0x4c   :  { %v820_v32 = vadd.f32 %v819_v37, %v818_v38 }
  0x4e   :  { %v822_v44 = vadd.f32 %v821_v42, %v820_v32 }
  0x50   :  { %v824_v21 = vadd.f32 %v823_v43, %v822_v44 }
  0x52   :  { %v826_v24 = vadd.f32 %v825_v20, %v824_v21 }
  0x54   :  { %v828_v48 = vadd.f32 %v827_v46, %v826_v24 }
  0x56   :  { %v830_v50 = vadd.f32 %v829_v47, %v828_v48 }
  0x58   :  { %v832_v51 = vadd.f32 %v831_v49, %v830_v50 }
  0x5a   :  { %v834_v53 = vadd.f32 %v833_v10, %v832_v51 }
  0x5c   :  { %835 = vadd.xlane.f32.xlu0 %v834_v53 }
  0xe5   :  { %v836_v54 = vpop.xlane.xlu0 %835 }
  0xe6   :  { %v844_v55 = vadd.f32 %v857_v9, %v836_v54 }
  0xe8   :  { %v845_v56 = vsub.f32 0.0, %v844_v55 }
  0xea   :  { %v846_v57 = vmul.f32 1.442695, %v845_v56 }
  0xec   :  { %867 = vpow2.f32 %v846_v57 }
  0xf9   :  { %v868_v58 = vpop.eup %867 }
  0xfa   :  { %v848_v52 = vadd.f32 1.0, %v868_v58 }
  0xfc   :  { %869 = vrcp.f32 %v848_v52 }
 0x109   :  { %v870_v59 = vpop.eup %869 }
 0x10a   :  { %852 = vst.msk [vmem:[%s1117_s4] sm:$0x3] %vm851_vm1, %v870_v59 }

// kernel: discriminator_forward.7
= control target key start
LH: loop header
LB: loop body
LE: loop exit
PB: predicated region body
PF: predicated region fallthrough
CT: control target
= control target key end

     0   :  { %s4366_s1 = inlined_call_operand.vmem [shape: bf16[1024,512], index: 1, kind: input, shape index: {}]   ;;  %s4367_s0 = inlined_call_operand.vmem [shape: bf16[40,1024], index: 0, kind: input, shape index: {}]   ;;  %s4368_s2 = inlined_call_operand.vmem [shape: bf16[40,256], index: 2, kind: output, shape index: {0}]   ;;  %s4369_s3 = inlined_call_operand.vmem [shape: f32[1,1,256], index: 3, kind: output, shape index: {1}]   ;;  %s4370_s4 = inlined_call_operand.vmem [shape: f32[1,1,256], index: 4, kind: output, shape index: {2}]  }
   0x1   :  { %v2750_v0 = vld [vmem:[%s4366_s1 + $0xe4] ss:$16 sps:$4 sm:$0xff]   ;;  %v2754_v2 = vld [vmem:[%s4366_s1 + $0xe0] ss:$16 sps:$4 sm:$0xff]   ;;  %v15_v50 = vld [vmem:[%s4367_s0 + $0x8] sm:$0xff] }
   0x2   :  { %v2752_v1 = vld [vmem:[%s4366_s1 + $0x2e4] ss:$16 sps:$4 sm:$0xff]   ;;  %1678 = vmatprep.subr.bf16.mxu0 %v2750_v0  ;;  %v2755_v3 = vld [vmem:[%s4366_s1 + $0x2e0] ss:$16 sps:$4 sm:$0xff]   ;;  %v19_v51 = vld [vmem:[%s4367_s0 + $0x28] sm:$0xff] }
   0x3   :  { %1739 = vmatprep.subr.bf16.mxu1 %v2752_v1  ;;  %v2756_v4 = vld [vmem:[%s4366_s1 + $0xc4] ss:$16 sps:$4 sm:$0xff]   ;;  %1679 = vmatpush1.bf16.msra.mxu0 %v2754_v2  ;;  %v2760_v6 = vld [vmem:[%s4366_s1 + $0xc0] ss:$16 sps:$4 sm:$0xff]   ;;  %v3332_v55 = vcombine.high %v15_v50, %v19_v51 }
   0x4   :  { %1740 = vmatpush1.bf16.msra.mxu1 %v2755_v3  ;;  %v2758_v5 = vld [vmem:[%s4366_s1 + $0x2c4] ss:$16 sps:$4 sm:$0xff]   ;;  %1680 = vmatprep.subr.bf16.mxu0 %v2756_v4  ;;  %v2761_v7 = vld [vmem:[%s4366_s1 + $0x2c0] ss:$16 sps:$4 sm:$0xff]  }
   0x5   :  { %1741 = vmatprep.subr.bf16.mxu1 %v2758_v5  ;;  %v2762_v8 = vld [vmem:[%s4366_s1 + $0xa4] ss:$16 sps:$4 sm:$0xff]   ;;  %v2766_v10 = vld [vmem:[%s4366_s1 + $0xa0] ss:$16 sps:$4 sm:$0xff]   ;;  %1771 = vmatprep.mubr.bf16.mxu1 %v3332_v55 }
   0x6   :  { %v2764_v9 = vld [vmem:[%s4366_s1 + $0x2a4] ss:$16 sps:$4 sm:$0xff]   ;;  %v2767_v11 = vld [vmem:[%s4366_s1 + $0x2a0] ss:$16 sps:$4 sm:$0xff]  }
   0x7   :  { %1681 = vmatpush1.bf16.msra.mxu0 %v2760_v6  ;;  %v2768_v12 = vld [vmem:[%s4366_s1 + $0x84] ss:$16 sps:$4 sm:$0xff]   ;;  %v2772_v14 = vld [vmem:[%s4366_s1 + $0x80] ss:$16 sps:$4 sm:$0xff]  }
   0x8   :  { %1742 = vmatpush1.bf16.msra.mxu1 %v2761_v7  ;;  %1682 = vmatprep.subr.bf16.mxu0 %v2762_v8  ;;  %v2770_v13 = vld [vmem:[%s4366_s1 + $0x284] ss:$16 sps:$4 sm:$0xff]   ;;  %v2773_v15 = vld [vmem:[%s4366_s1 + $0x280] ss:$16 sps:$4 sm:$0xff]  }
   0x9   :  { %1743 = vmatprep.subr.bf16.mxu1 %v2764_v9  ;;  %v2774_v16 = vld [vmem:[%s4366_s1 + $0x64] ss:$16 sps:$4 sm:$0xff]   ;;  %v2778_v18 = vld [vmem:[%s4366_s1 + $0x60] ss:$16 sps:$4 sm:$0xff]   ;;  %v3386_v9 = vcombine.low %v15_v50, %v19_v51 }
   0xa   :  { %v2776_v17 = vld [vmem:[%s4366_s1 + $0x264] ss:$16 sps:$4 sm:$0xff]   ;;  %v2779_v19 = vld [vmem:[%s4366_s1 + $0x260] ss:$16 sps:$4 sm:$0xff]  }
   0xb   :  { %1683 = vmatpush1.bf16.msra.mxu0 %v2766_v10  ;;  %v2780_v20 = vld [vmem:[%s4366_s1 + $0x44] ss:$16 sps:$4 sm:$0xff]   ;;  %v2784_v22 = vld [vmem:[%s4366_s1 + $0x40] ss:$16 sps:$4 sm:$0xff]  }
   0xc   :  { %1744 = vmatpush1.bf16.msra.mxu1 %v2767_v11  ;;  %1684 = vmatprep.subr.bf16.mxu0 %v2768_v12  ;;  %v2782_v21 = vld [vmem:[%s4366_s1 + $0x244] ss:$16 sps:$4 sm:$0xff]   ;;  %v2785_v23 = vld [vmem:[%s4366_s1 + $0x240] ss:$16 sps:$4 sm:$0xff]  }
   0xd   :  { %1745 = vmatprep.subr.bf16.mxu1 %v2770_v13  ;;  %v2786_v24 = vld [vmem:[%s4366_s1 + $0x24] ss:$16 sps:$4 sm:$0xff]   ;;  %v2790_v26 = vld [vmem:[%s4366_s1 + $0x20] ss:$16 sps:$4 sm:$0xff]  }
   0xe   :  { %v2788_v25 = vld [vmem:[%s4366_s1 + $0x224] ss:$16 sps:$4 sm:$0xff]   ;;  %v2791_v27 = vld [vmem:[%s4366_s1 + $0x220] ss:$16 sps:$4 sm:$0xff]  }
   0xf   :  { %1685 = vmatpush1.bf16.msra.mxu0 %v2772_v14  ;;  %v2792_v28 = vld [vmem:[%s4366_s1 + $0x4] ss:$16 sps:$4 sm:$0xff]   ;;  %v2796_v30 = vld [vmem:[%s4366_s1] ss:$16 sps:$4 sm:$0xff]  }
  0x10   :  { %1746 = vmatpush1.bf16.msra.mxu1 %v2773_v15  ;;  %1686 = vmatprep.subr.bf16.mxu0 %v2774_v16  ;;  %v2794_v29 = vld [vmem:[%s4366_s1 + $0x204] ss:$16 sps:$4 sm:$0xff]   ;;  %v2797_v31 = vld [vmem:[%s4366_s1 + $0x200] ss:$16 sps:$4 sm:$0xff]  }
  0x11   :  { %1747 = vmatprep.subr.bf16.mxu1 %v2776_v17  ;;  %v2798_v32 = vld [vmem:[%s4366_s1 + $0x1e4] ss:$16 sps:$4 sm:$0xff]   ;;  %v2802_v34 = vld [vmem:[%s4366_s1 + $0x1e0] ss:$16 sps:$4 sm:$0xff]  }
  0x12   :  { %v2800_v33 = vld [vmem:[%s4366_s1 + $0x3e4] ss:$16 sps:$4 sm:$0xff]   ;;  %v2803_v35 = vld [vmem:[%s4366_s1 + $0x3e0] ss:$16 sps:$4 sm:$0xff]  }
  0x13   :  { %1687 = vmatpush1.bf16.msra.mxu0 %v2778_v18  ;;  %v2804_v36 = vld [vmem:[%s4366_s1 + $0x1c4] ss:$16 sps:$4 sm:$0xff]   ;;  %v2808_v38 = vld [vmem:[%s4366_s1 + $0x1c0] ss:$16 sps:$4 sm:$0xff]  }
  0x14   :  { %1748 = vmatpush1.bf16.msra.mxu1 %v2779_v19  ;;  %1688 = vmatprep.subr.bf16.mxu0 %v2780_v20  ;;  %v2806_v37 = vld [vmem:[%s4366_s1 + $0x3c4] ss:$16 sps:$4 sm:$0xff]   ;;  %v2809_v39 = vld [vmem:[%s4366_s1 + $0x3c0] ss:$16 sps:$4 sm:$0xff]  }
  0x15   :  { %1749 = vmatprep.subr.bf16.mxu1 %v2782_v21  ;;  %v2810_v40 = vld [vmem:[%s4366_s1 + $0x1a4] ss:$16 sps:$4 sm:$0xff]   ;;  %v2814_v42 = vld [vmem:[%s4366_s1 + $0x1a0] ss:$16 sps:$4 sm:$0xff]  }
  0x16   :  { %v2812_v41 = vld [vmem:[%s4366_s1 + $0x3a4] ss:$16 sps:$4 sm:$0xff]   ;;  %v2815_v43 = vld [vmem:[%s4366_s1 + $0x3a0] ss:$16 sps:$4 sm:$0xff]  }
  0x17   :  { %1689 = vmatpush1.bf16.msra.mxu0 %v2784_v22  ;;  %v2816_v44 = vld [vmem:[%s4366_s1 + $0x184] ss:$16 sps:$4 sm:$0xff]   ;;  %v2820_v46 = vld [vmem:[%s4366_s1 + $0x180] ss:$16 sps:$4 sm:$0xff]  }
  0x18   :  { %1750 = vmatpush1.bf16.msra.mxu1 %v2785_v23  ;;  %1690 = vmatprep.subr.bf16.mxu0 %v2786_v24  ;;  %v2818_v45 = vld [vmem:[%s4366_s1 + $0x384] ss:$16 sps:$4 sm:$0xff]   ;;  %v2821_v47 = vld [vmem:[%s4366_s1 + $0x380] ss:$16 sps:$4 sm:$0xff]  }
  0x19   :  { %1751 = vmatprep.subr.bf16.mxu1 %v2788_v25  ;;  %v14_v48 = vld [vmem:[%s4367_s0] sm:$0xff]  ;;  %v23_v25 = vld [vmem:[%s4367_s0 + $0x48] sm:$0xff] }
  0x1a   :  { %v18_v49 = vld [vmem:[%s4367_s0 + $0x20] sm:$0xff] }
  0x1b   :  { %1691 = vmatpush1.bf16.msra.mxu0 %v2790_v26  ;;  %v2822_v52 = vld [vmem:[%s4366_s1 + $0x164] ss:$16 sps:$4 sm:$0xff]   ;;  %v3327_v53 = vcombine.high %v14_v48, %v18_v49  ;;  %v2826_v56 = vld [vmem:[%s4366_s1 + $0x160] ss:$16 sps:$4 sm:$0xff]   ;;  %v3384_v8 = vcombine.low %v14_v48, %v18_v49  ;;  %v27_v26 = vld [vmem:[%s4367_s0 + $0x68] sm:$0xff] }
  0x1c   :  { %1752 = vmatpush1.bf16.msra.mxu1 %v2791_v27  ;;  %1692 = vmatprep.subr.bf16.mxu0 %v2792_v28  ;;  %v2824_v54 = vld [vmem:[%s4366_s1 + $0x364] ss:$16 sps:$4 sm:$0xff]   ;;  %v2827_v57 = vld [vmem:[%s4366_s1 + $0x360] ss:$16 sps:$4 sm:$0xff]  }
  0x1d   :  { %1753 = vmatprep.subr.bf16.mxu1 %v2794_v29  ;;  %1710 = vmatprep.mubr.bf16.mxu0 %v3327_v53  ;;  %v2828_v58 = vld [vmem:[%s4366_s1 + $0x144] ss:$16 sps:$4 sm:$0xff]   ;;  %v2832_v60 = vld [vmem:[%s4366_s1 + $0x140] ss:$16 sps:$4 sm:$0xff]   ;;  %v3446_v29 = vcombine.high %v23_v25, %v27_v26 }
  0x1e   :  { %v2830_v59 = vld [vmem:[%s4366_s1 + $0x344] ss:$16 sps:$4 sm:$0xff]   ;;  %v2833_v61 = vld [vmem:[%s4366_s1 + $0x340] ss:$16 sps:$4 sm:$0xff]  }
  0x1f   :  { %1693 = vmatpush1.bf16.msra.mxu0 %v2796_v30  ;;  %v2834_v62 = vld [vmem:[%s4366_s1 + $0x124] ss:$16 sps:$4 sm:$0xff]   ;;  %v2838_v0 = vld [vmem:[%s4366_s1 + $0x120] ss:$16 sps:$4 sm:$0xff]  }
  0x20   :  { %1754 = vmatpush1.bf16.msra.mxu1 %v2797_v31  ;;  %1694 = vmatprep.subr.bf16.mxu0 %v2798_v32  ;;  %v2836_v63 = vld [vmem:[%s4366_s1 + $0x324] ss:$16 sps:$4 sm:$0xff]   ;;  %v2839_v1 = vld [vmem:[%s4366_s1 + $0x320] ss:$16 sps:$4 sm:$0xff]   ;;  %v3450_v31 = vcombine.low %v23_v25, %v27_v26 }
  0x21   :  { %1755 = vmatprep.subr.bf16.mxu1 %v2800_v33  ;;  %v2840_v2 = vld [vmem:[%s4366_s1 + $0x104] ss:$16 sps:$4 sm:$0xff]   ;;  %v2844_v4 = vld [vmem:[%s4366_s1 + $0x100] ss:$16 sps:$4 sm:$0xff]  }
  0x22   :  { %v2842_v3 = vld [vmem:[%s4366_s1 + $0x304] ss:$16 sps:$4 sm:$0xff]   ;;  %v2845_v5 = vld [vmem:[%s4366_s1 + $0x300] ss:$16 sps:$4 sm:$0xff]  }
  0x23   :  { %1695 = vmatpush2.bf16.msra.mxu0 %v2802_v34  ;;  %v2848_v6 = vld [vmem:[%s4366_s1 + $0x4e4] ss:$16 sps:$4 sm:$0xff]   ;;  %v2846_v10 = vld [vmem:[%s4366_s1 + $0x4e0] ss:$16 sps:$4 sm:$0xff]  }
  0x24   :  { %1756 = vmatpush2.bf16.msra.mxu1 %v2803_v35  ;;  %1696 = vmatprep.subr.bf16.mxu0 %v2804_v36  ;;  %v2851_v7 = vld [vmem:[%s4366_s1 + $0x6e4] ss:$16 sps:$4 sm:$0xff]   ;;  %v2849_v11 = vld [vmem:[%s4366_s1 + $0x6e0] ss:$16 sps:$4 sm:$0xff]  }
  0x25   :  { %1757 = vmatprep.subr.bf16.mxu1 %v2806_v37  ;;  %v2854_v12 = vld [vmem:[%s4366_s1 + $0x4c4] ss:$16 sps:$4 sm:$0xff]   ;;  %v2852_v14 = vld [vmem:[%s4366_s1 + $0x4c0] ss:$16 sps:$4 sm:$0xff]   ;;  %v31_v37 = vld [vmem:[%s4367_s0 + $0x88] sm:$0xff] }
  0x26   :  { %v2857_v13 = vld [vmem:[%s4366_s1 + $0x6c4] ss:$16 sps:$4 sm:$0xff]   ;;  %v2855_v15 = vld [vmem:[%s4366_s1 + $0x6c0] ss:$16 sps:$4 sm:$0xff]  }
  0x27   :  { %1697 = vmatpush2.bf16.msra.mxu0 %v2808_v38  ;;  %v2860_v16 = vld [vmem:[%s4366_s1 + $0x4a4] ss:$16 sps:$4 sm:$0xff]   ;;  %v2858_v18 = vld [vmem:[%s4366_s1 + $0x4a0] ss:$16 sps:$4 sm:$0xff]  }
  0x28   :  { %1758 = vmatpush2.bf16.msra.mxu1 %v2809_v39  ;;  %1698 = vmatprep.subr.bf16.mxu0 %v2810_v40  ;;  %v2863_v17 = vld [vmem:[%s4366_s1 + $0x6a4] ss:$16 sps:$4 sm:$0xff]   ;;  %v2861_v19 = vld [vmem:[%s4366_s1 + $0x6a0] ss:$16 sps:$4 sm:$0xff]  }
  0x29   :  { %1759 = vmatprep.subr.bf16.mxu1 %v2812_v41  ;;  %v2866_v20 = vld [vmem:[%s4366_s1 + $0x484] ss:$16 sps:$4 sm:$0xff]   ;;  %v2864_v27 = vld [vmem:[%s4366_s1 + $0x480] ss:$16 sps:$4 sm:$0xff]   ;;  %v3482_v41 = vcombine.high %v31_v37, %v31_v37 }
  0x2a   :  { %v2869_v21 = vld [vmem:[%s4366_s1 + $0x684] ss:$16 sps:$4 sm:$0xff]   ;;  %v2867_v28 = vld [vmem:[%s4366_s1 + $0x680] ss:$16 sps:$4 sm:$0xff]  }
  0x2b   :  { %1699 = vmatpush2.bf16.msra.mxu0 %v2814_v42  ;;  %v22_v22 = vld [vmem:[%s4367_s0 + $0x40] sm:$0xff] }
  0x2c   :  { %1760 = vmatpush2.bf16.msra.mxu1 %v2815_v43  ;;  %1700 = vmatprep.subr.bf16.mxu0 %v2816_v44  ;;  %v26_v23 = vld [vmem:[%s4367_s0 + $0x60] sm:$0xff]  ;;  %v3488_v43 = vcombine.low %v31_v37, %v31_v37  ;;  %v2951_v37 = vld [vmem:[%s4366_s1 + $0x2ec] ss:$16 sps:$4 sm:$0xff]  }
  0x2d   :  { %1761 = vmatprep.subr.bf16.mxu1 %v2818_v45  ;;  %v3432_v24 = vcombine.high %v22_v22, %v26_v23  ;;  %v3448_v30 = vcombine.low %v22_v22, %v26_v23  ;;  %v2872_v32 = vld [vmem:[%s4366_s1 + $0x464] ss:$16 sps:$4 sm:$0xff]   ;;  %v2870_v34 = vld [vmem:[%s4366_s1 + $0x460] ss:$16 sps:$4 sm:$0xff]  }
  0x2e   :  { %v2875_v33 = vld [vmem:[%s4366_s1 + $0x664] ss:$16 sps:$4 sm:$0xff]   ;;  %v2873_v35 = vld [vmem:[%s4366_s1 + $0x660] ss:$16 sps:$4 sm:$0xff]  }
  0x2f   :  { %1701 = vmatpush2.bf16.msra.mxu0 %v2820_v46  ;;  %v30_v36 = vld [vmem:[%s4367_s0 + $0x80] sm:$0xff] }
  0x30   :  { %1762 = vmatpush2.bf16.msra.mxu1 %v2821_v47  ;;  %1702 = vmatprep.subr.bf16.mxu0 %v2822_v52  ;;  %v2878_v38 = vld [vmem:[%s4366_s1 + $0x444] ss:$16 sps:$4 sm:$0xff]   ;;  %v3480_v40 = vcombine.high %v30_v36, %v30_v36  ;;  %v3485_v42 = vcombine.low %v30_v36, %v30_v36  ;;  %v2876_v44 = vld [vmem:[%s4366_s1 + $0x440] ss:$16 sps:$4 sm:$0xff]   ;;  %v2948_v36 = vld [vmem:[%s4366_s1 + $0xec] ss:$16 sps:$4 sm:$0xff]  }
  0x31   :  { %1763 = vmatprep.subr.bf16.mxu1 %v2824_v54  ;;  %v2881_v39 = vld [vmem:[%s4366_s1 + $0x644] ss:$16 sps:$4 sm:$0xff]   ;;  %v2879_v45 = vld [vmem:[%s4366_s1 + $0x640] ss:$16 sps:$4 sm:$0xff]  }
  0x32   :  { %v2884_v46 = vld [vmem:[%s4366_s1 + $0x424] ss:$16 sps:$4 sm:$0xff]   ;;  %v2882_v48 = vld [vmem:[%s4366_s1 + $0x420] ss:$16 sps:$4 sm:$0xff]  }
  0x33   :  { %1703 = vmatpush2.bf16.msra.mxu0 %v2826_v56  ;;  %v2887_v47 = vld [vmem:[%s4366_s1 + $0x624] ss:$16 sps:$4 sm:$0xff]   ;;  %v2885_v49 = vld [vmem:[%s4366_s1 + $0x620] ss:$16 sps:$4 sm:$0xff]   ;;  %v3529_v56 = vld [vmem:[%s4367_s0 + $0x18] sm:$0xff] }
  0x34   :  { %1764 = vmatpush2.bf16.msra.mxu1 %v2827_v57  ;;  %1704 = vmatprep.subr.bf16.mxu0 %v2828_v58  ;;  %v2890_v50 = vld [vmem:[%s4366_s1 + $0x404] ss:$16 sps:$4 sm:$0xff]   ;;  %v3534_v57 = vld [vmem:[%s4367_s0 + $0x38] sm:$0xff]  ;;  %v2927_v22 = vld [vmem:[%s4366_s1 + $0x540] ss:$16 sps:$4 sm:$0xff]  }
  0x35   :  { %1765 = vmatprep.subr.bf16.mxu1 %v2830_v59  ;;  %v2893_v51 = vld [vmem:[%s4366_s1 + $0x604] ss:$16 sps:$4 sm:$0xff]   ;;  %v3542_v59 = vcombine.high %v3529_v56, %v3534_v57  ;;  %v2930_v23 = vld [vmem:[%s4366_s1 + $0x740] ss:$16 sps:$4 sm:$0xff]  }
  0x36   :  { %v3519_v52 = vld [vmem:[%s4367_s0 + $0x10] sm:$0xff] }
  0x37   :  { %1705 = vmatpush2.bf16.msra.mxu0 %v2832_v60  ;;  %v3524_v54 = vld [vmem:[%s4367_s0 + $0x30] sm:$0xff] }
  0x38   :  { %1766 = vmatpush2.bf16.msra.mxu1 %v2833_v61  ;;  %1706 = vmatprep.subr.bf16.mxu0 %v2834_v62  ;;  %v3538_v58 = vcombine.high %v3519_v52, %v3524_v54  ;;  %v2888_v60 = vld [vmem:[%s4366_s1 + $0x400] ss:$16 sps:$4 sm:$0xff]   ;;  %v2896_v62 = vld [vmem:[%s4366_s1 + $0x5e4] ss:$16 sps:$4 sm:$0xff]  }
  0x39   :  { %1767 = vmatprep.subr.bf16.mxu1 %v2836_v63  ;;  %v2891_v61 = vld [vmem:[%s4366_s1 + $0x600] ss:$16 sps:$4 sm:$0xff]   ;;  %v2899_v63 = vld [vmem:[%s4366_s1 + $0x7e4] ss:$16 sps:$4 sm:$0xff]  }
  0x3a   :  { %v2936_v25 = vld [vmem:[%s4366_s1 + $0x524] ss:$16 sps:$4 sm:$0xff]  }
  0x3b   :  { %1707 = vmatpush2.bf16.msra.mxu0 %v2838_v0  ;;  %v2894_v0 = vld [vmem:[%s4366_s1 + $0x5e0] ss:$16 sps:$4 sm:$0xff]   ;;  %v2939_v26 = vld [vmem:[%s4366_s1 + $0x724] ss:$16 sps:$4 sm:$0xff]  }
  0x3c   :  { %1768 = vmatpush2.bf16.msra.mxu1 %v2839_v1  ;;  %1708 = vmatprep.subr.bf16.mxu0 %v2840_v2  ;;  %v2897_v1 = vld [vmem:[%s4366_s1 + $0x7e0] ss:$16 sps:$4 sm:$0xff]   ;;  %v2902_v2 = vld [vmem:[%s4366_s1 + $0x5c4] ss:$16 sps:$4 sm:$0xff]  }
  0x3d   :  { %1769 = vmatprep.subr.bf16.mxu1 %v2842_v3  ;;  %v2905_v3 = vld [vmem:[%s4366_s1 + $0x7c4] ss:$16 sps:$4 sm:$0xff]  }
  0x3f   :  { %1709 = vmatpush2.bf16.msra.mxu0 %v2844_v4  ;;  %v2900_v4 = vld [vmem:[%s4366_s1 + $0x5c0] ss:$16 sps:$4 sm:$0xff]  }
  0x40   :  { %1770 = vmatpush2.bf16.msra.mxu1 %v2845_v5  ;;  %1800 = vmatprep.subr.bf16.mxu0 %v2848_v6  ;;  %v2903_v5 = vld [vmem:[%s4366_s1 + $0x7c0] ss:$16 sps:$4 sm:$0xff]   ;;  %v2908_v6 = vld [vmem:[%s4366_s1 + $0x5a4] ss:$16 sps:$4 sm:$0xff]  }
  0x41   :  { %1861 = vmatprep.subr.bf16.mxu1 %v2851_v7  ;;  %v2911_v7 = vld [vmem:[%s4366_s1 + $0x7a4] ss:$16 sps:$4 sm:$0xff]  }
  0x42   :  { %1711 = vmatmul.mubr.bf16.vlgmr.msra.gmra.mxu0 %v3384_v8 }
  0x43   :  { %1772 = vmatmul.mubr.bf16.vlgmr.msra.gmra.mxu1 %v3386_v9  ;;  %1801 = vmatpush1.bf16.msra.mxu0 %v2846_v10  ;;  %v2906_v10 = vld [vmem:[%s4366_s1 + $0x5a0] ss:$16 sps:$4 sm:$0xff]  }
  0x44   :  { %1862 = vmatpush1.bf16.msra.mxu1 %v2849_v11  ;;  %1802 = vmatprep.subr.bf16.mxu0 %v2854_v12  ;;  %v2909_v11 = vld [vmem:[%s4366_s1 + $0x7a0] ss:$16 sps:$4 sm:$0xff]   ;;  %v2914_v12 = vld [vmem:[%s4366_s1 + $0x584] ss:$16 sps:$4 sm:$0xff]  }
  0x45   :  { %1863 = vmatprep.subr.bf16.mxu1 %v2857_v13  ;;  %1720 = vmatprep.mubr.bf16.mxu0 %v3432_v24  ;;  %v2917_v13 = vld [vmem:[%s4366_s1 + $0x784] ss:$16 sps:$4 sm:$0xff]  }
  0x46   :  { %1781 = vmatprep.mubr.bf16.mxu1 %v3446_v29 }
  0x47   :  { %1803 = vmatpush1.bf16.msra.mxu0 %v2852_v14  ;;  %v2912_v14 = vld [vmem:[%s4366_s1 + $0x580] ss:$16 sps:$4 sm:$0xff]  }
  0x48   :  { %1864 = vmatpush1.bf16.msra.mxu1 %v2855_v15  ;;  %1804 = vmatprep.subr.bf16.mxu0 %v2860_v16  ;;  %v2915_v15 = vld [vmem:[%s4366_s1 + $0x780] ss:$16 sps:$4 sm:$0xff]   ;;  %v2920_v16 = vld [vmem:[%s4366_s1 + $0x564] ss:$16 sps:$4 sm:$0xff]  }
  0x49   :  { %1865 = vmatprep.subr.bf16.mxu1 %v2863_v17  ;;  %v2923_v17 = vld [vmem:[%s4366_s1 + $0x764] ss:$16 sps:$4 sm:$0xff]  }
  0x4a   :  { %1721 = vmatmul.mubr.bf16.gmra.mxu0 %v3448_v30 }
  0x4b   :  { %1805 = vmatpush1.bf16.msra.mxu0 %v2858_v18  ;;  %1782 = vmatmul.mubr.bf16.gmra.mxu1 %v3450_v31  ;;  %v2918_v18 = vld [vmem:[%s4366_s1 + $0x560] ss:$16 sps:$4 sm:$0xff]  }
  0x4c   :  { %1866 = vmatpush1.bf16.msra.mxu1 %v2861_v19  ;;  %1806 = vmatprep.subr.bf16.mxu0 %v2866_v20  ;;  %v2921_v19 = vld [vmem:[%s4366_s1 + $0x760] ss:$16 sps:$4 sm:$0xff]   ;;  %v2929_v20 = vld [vmem:[%s4366_s1 + $0x544] ss:$16 sps:$4 sm:$0xff]  }
  0x4d   :  { %1867 = vmatprep.subr.bf16.mxu1 %v2869_v21  ;;  %1730 = vmatprep.mubr.bf16.mxu0 %v3480_v40  ;;  %v2932_v21 = vld [vmem:[%s4366_s1 + $0x744] ss:$16 sps:$4 sm:$0xff]  }
  0x4e   :  { %1791 = vmatprep.mubr.bf16.mxu1 %v3482_v41 }
  0x4f   :  { %1807 = vmatpush1.bf16.msra.mxu0 %v2864_v27  ;;  %v2934_v27 = vld [vmem:[%s4366_s1 + $0x520] ss:$16 sps:$4 sm:$0xff]  }
  0x50   :  { %1868 = vmatpush1.bf16.msra.mxu1 %v2867_v28  ;;  %1808 = vmatprep.subr.bf16.mxu0 %v2872_v32  ;;  %v2937_v28 = vld [vmem:[%s4366_s1 + $0x720] ss:$16 sps:$4 sm:$0xff]   ;;  %v2942_v32 = vld [vmem:[%s4366_s1 + $0x504] ss:$16 sps:$4 sm:$0xff]  }
  0x51   :  { %1869 = vmatprep.subr.bf16.mxu1 %v2875_v33  ;;  %v2945_v33 = vld [vmem:[%s4366_s1 + $0x704] ss:$16 sps:$4 sm:$0xff]  }
  0x52   :  { %1731 = vmatmul.mubr.bf16.gmra.mxu0 %v3485_v42 }
  0x53   :  { %1809 = vmatpush1.bf16.msra.mxu0 %v2870_v34  ;;  %1792 = vmatmul.mubr.bf16.gmra.mxu1 %v3488_v43  ;;  %v2940_v34 = vld [vmem:[%s4366_s1 + $0x500] ss:$16 sps:$4 sm:$0xff]  }
  0x54   :  { %1870 = vmatpush1.bf16.msra.mxu1 %v2873_v35  ;;  %1810 = vmatprep.subr.bf16.mxu0 %v2878_v38  ;;  %v2943_v35 = vld [vmem:[%s4366_s1 + $0x700] ss:$16 sps:$4 sm:$0xff]   ;;  %v2946_v38 = vld [vmem:[%s4366_s1 + $0xe8] ss:$16 sps:$4 sm:$0xff]  }
  0x55   :  { %1871 = vmatprep.subr.bf16.mxu1 %v2881_v39  ;;  %1832 = vmatprep.mubr.bf16.mxu0 %v3538_v58  ;;  %v2949_v39 = vld [vmem:[%s4366_s1 + $0x2e8] ss:$16 sps:$4 sm:$0xff]  }
  0x56   :  { %1893 = vmatprep.mubr.bf16.mxu1 %v3542_v59 }
  0x57   :  { %1811 = vmatpush1.bf16.msra.mxu0 %v2876_v44  ;;  %v24_v44 = vld [vmem:[%s4367_s0 + $0x50] sm:$0xff] }
  0x58   :  { %1872 = vmatpush1.bf16.msra.mxu1 %v2879_v45  ;;  %1812 = vmatprep.subr.bf16.mxu0 %v2884_v46  ;;  %v28_v45 = vld [vmem:[%s4367_s0 + $0x70] sm:$0xff]  ;;  %v3668_v46 = vcombine.low %v3519_v52, %v3524_v54 }
  0x59   :  { %1873 = vmatprep.subr.bf16.mxu1 %v2887_v47  ;;  %v3672_v47 = vcombine.low %v3529_v56, %v3534_v57  ;;  %v3686_v52 = vcombine.high %v24_v44, %v28_v45  ;;  %v2952_v56 = vld [vmem:[%s4366_s1 + $0xc8] ss:$16 sps:$4 sm:$0xff]  }
  0x5a   :  { %v2955_v57 = vld [vmem:[%s4366_s1 + $0x2c8] ss:$16 sps:$4 sm:$0xff]  }
  0x5b   :  { %1813 = vmatpush1.bf16.msra.mxu0 %v2882_v48  ;;  %v25_v48 = vld [vmem:[%s4367_s0 + $0x58] sm:$0xff] }
  0x5c   :  { %1874 = vmatpush1.bf16.msra.mxu1 %v2885_v49  ;;  %1814 = vmatprep.subr.bf16.mxu0 %v2890_v50  ;;  %v29_v49 = vld [vmem:[%s4367_s0 + $0x78] sm:$0xff] }
  0x5d   :  { %1875 = vmatprep.subr.bf16.mxu1 %v2893_v51  ;;  %v2954_v50 = vld [vmem:[%s4366_s1 + $0xcc] ss:$16 sps:$4 sm:$0xff]   ;;  %v3688_v54 = vcombine.high %v25_v48, %v29_v49 }
  0x5e   :  { %v2957_v51 = vld [vmem:[%s4366_s1 + $0x2cc] ss:$16 sps:$4 sm:$0xff]  }
  0x5f   :  { %1815 = vmatpush1.bf16.msra.mxu0 %v2888_v60  ;;  %v2960_v60 = vld [vmem:[%s4366_s1 + $0xac] ss:$16 sps:$4 sm:$0xff]  }
  0x60   :  { %1876 = vmatpush1.bf16.msra.mxu1 %v2891_v61  ;;  %1816 = vmatprep.subr.bf16.mxu0 %v2896_v62  ;;  %v2963_v61 = vld [vmem:[%s4366_s1 + $0x2ac] ss:$16 sps:$4 sm:$0xff]   ;;  %v2958_v62 = vld [vmem:[%s4366_s1 + $0xa8] ss:$16 sps:$4 sm:$0xff]  }
  0x61   :  { %1877 = vmatprep.subr.bf16.mxu1 %v2899_v63  ;;  %v2961_v63 = vld [vmem:[%s4366_s1 + $0x2a8] ss:$16 sps:$4 sm:$0xff]  }
  0x63   :  { %1817 = vmatpush2.bf16.msra.mxu0 %v2894_v0  ;;  %v3712_v0 = vcombine.low %v24_v44, %v28_v45  ;;  %v3012_v44 = vld [vmem:[%s4366_s1 + $0x1ac] ss:$16 sps:$4 sm:$0xff]  }
  0x64   :  { %1878 = vmatpush2.bf16.msra.mxu1 %v2897_v1  ;;  %1818 = vmatprep.subr.bf16.mxu0 %v2902_v2  ;;  %v3714_v1 = vcombine.low %v25_v48, %v29_v49  ;;  %v32_v2 = vld [vmem:[%s4367_s0 + $0x90] sm:$0xff]  ;;  %v3015_v45 = vld [vmem:[%s4366_s1 + $0x3ac] ss:$16 sps:$4 sm:$0xff]   ;;  %v3010_v48 = vld [vmem:[%s4366_s1 + $0x1a8] ss:$16 sps:$4 sm:$0xff]  }
  0x65   :  { %1879 = vmatprep.subr.bf16.mxu1 %v2905_v3  ;;  %v33_v3 = vld [vmem:[%s4367_s0 + $0x98] sm:$0xff] }
  0x66   :  { %v3013_v49 = vld [vmem:[%s4366_s1 + $0x3a8] ss:$16 sps:$4 sm:$0xff]  }
  0x67   :  { %1819 = vmatpush2.bf16.msra.mxu0 %v2900_v4  ;;  %v2966_v4 = vld [vmem:[%s4366_s1 + $0x8c] ss:$16 sps:$4 sm:$0xff]  }
  0x68   :  { %1880 = vmatpush2.bf16.msra.mxu1 %v2903_v5  ;;  %1820 = vmatprep.subr.bf16.mxu0 %v2908_v6  ;;  %v2969_v5 = vld [vmem:[%s4366_s1 + $0x28c] ss:$16 sps:$4 sm:$0xff]   ;;  %v3728_v6 = vcombine.high %v32_v2, %v32_v2 }
  0x69   :  { %1881 = vmatprep.subr.bf16.mxu1 %v2911_v7  ;;  %v3730_v7 = vcombine.high %v33_v3, %v33_v3 }
  0x6b   :  { %1821 = vmatpush2.bf16.msra.mxu0 %v2906_v10  ;;  %v2964_v10 = vld [vmem:[%s4366_s1 + $0x88] ss:$16 sps:$4 sm:$0xff]  }
  0x6c   :  { %1882 = vmatpush2.bf16.msra.mxu1 %v2909_v11  ;;  %1822 = vmatprep.subr.bf16.mxu0 %v2914_v12  ;;  %v2967_v11 = vld [vmem:[%s4366_s1 + $0x288] ss:$16 sps:$4 sm:$0xff]   ;;  %v2974_v12 = vld [vmem:[%s4366_s1 + $0x6c] ss:$16 sps:$4 sm:$0xff]  }
  0x6d   :  { %1883 = vmatprep.subr.bf16.mxu1 %v2917_v13  ;;  %v2977_v13 = vld [vmem:[%s4366_s1 + $0x26c] ss:$16 sps:$4 sm:$0xff]  }
  0x6f   :  { %1823 = vmatpush2.bf16.msra.mxu0 %v2912_v14  ;;  %v3748_v14 = vcombine.low %v32_v2, %v32_v2  ;;  %v3030_v2 = vld [vmem:[%s4366_s1 + $0x14c] ss:$16 sps:$4 sm:$0xff]  }
  0x70   :  { %1884 = vmatpush2.bf16.msra.mxu1 %v2915_v15  ;;  %1824 = vmatprep.subr.bf16.mxu0 %v2920_v16  ;;  %v2972_v15 = vld [vmem:[%s4366_s1 + $0x68] ss:$16 sps:$4 sm:$0xff]  }
  0x71   :  { %1885 = vmatprep.subr.bf16.mxu1 %v2923_v17  ;;  %v2975_v16 = vld [vmem:[%s4366_s1 + $0x268] ss:$16 sps:$4 sm:$0xff]   ;;  %v3756_v17 = vcombine.low %v33_v3, %v33_v3  ;;  %v3033_v3 = vld [vmem:[%s4366_s1 + $0x34c] ss:$16 sps:$4 sm:$0xff]  }
  0x73   :  { %1825 = vmatpush2.bf16.msra.mxu0 %v2918_v18  ;;  %v2982_v18 = vld [vmem:[%s4366_s1 + $0x4c] ss:$16 sps:$4 sm:$0xff]  }
  0x74   :  { %1886 = vmatpush2.bf16.msra.mxu1 %v2921_v19  ;;  %1826 = vmatprep.subr.bf16.mxu0 %v2929_v20  ;;  %v2985_v19 = vld [vmem:[%s4366_s1 + $0x24c] ss:$16 sps:$4 sm:$0xff]   ;;  %v2980_v20 = vld [vmem:[%s4366_s1 + $0x48] ss:$16 sps:$4 sm:$0xff]  }
  0x75   :  { %1887 = vmatprep.subr.bf16.mxu1 %v2932_v21  ;;  %v2983_v21 = vld [vmem:[%s4366_s1 + $0x248] ss:$16 sps:$4 sm:$0xff]  }
  0x77   :  { %1827 = vmatpush2.bf16.msra.mxu0 %v2927_v22  ;;  %v2988_v22 = vld [vmem:[%s4366_s1 + $0x2c] ss:$16 sps:$4 sm:$0xff]  }
  0x78   :  { %1888 = vmatpush2.bf16.msra.mxu1 %v2930_v23  ;;  %1828 = vmatprep.subr.bf16.mxu0 %v2936_v25  ;;  %v2991_v23 = vld [vmem:[%s4366_s1 + $0x22c] ss:$16 sps:$4 sm:$0xff]   ;;  %v2986_v25 = vld [vmem:[%s4366_s1 + $0x28] ss:$16 sps:$4 sm:$0xff]  }
  0x79   :  { %1889 = vmatprep.subr.bf16.mxu1 %v2939_v26  ;;  %v2989_v26 = vld [vmem:[%s4366_s1 + $0x228] ss:$16 sps:$4 sm:$0xff]  }
  0x7b   :  { %1829 = vmatpush2.bf16.msra.mxu0 %v2934_v27  ;;  %v2994_v27 = vld [vmem:[%s4366_s1 + $0xc] ss:$16 sps:$4 sm:$0xff]  }
  0x7c   :  { %1890 = vmatpush2.bf16.msra.mxu1 %v2937_v28  ;;  %1830 = vmatprep.subr.bf16.mxu0 %v2942_v32  ;;  %v2995_v28 = vld [vmem:[%s4366_s1 + $0x208] ss:$16 sps:$4 sm:$0xff]   ;;  %v3000_v32 = vld [vmem:[%s4366_s1 + $0x1ec] ss:$16 sps:$4 sm:$0xff]  }
  0x7d   :  { %1891 = vmatprep.subr.bf16.mxu1 %v2945_v33  ;;  %v3003_v33 = vld [vmem:[%s4366_s1 + $0x3ec] ss:$16 sps:$4 sm:$0xff]  }
  0x7f   :  { %1831 = vmatpush2.bf16.msra.mxu0 %v2940_v34  ;;  %v2998_v34 = vld [vmem:[%s4366_s1 + $0x1e8] ss:$16 sps:$4 sm:$0xff]  }
  0x80   :  { %1892 = vmatpush2.bf16.msra.mxu1 %v2943_v35  ;;  %1922 = vmatprep.subr.bf16.mxu0 %v2948_v36  ;;  %v3001_v35 = vld [vmem:[%s4366_s1 + $0x3e8] ss:$16 sps:$4 sm:$0xff]   ;;  %v3006_v36 = vld [vmem:[%s4366_s1 + $0x1cc] ss:$16 sps:$4 sm:$0xff]  }
  0x81   :  { %1983 = vmatprep.subr.bf16.mxu1 %v2951_v37  ;;  %v3009_v37 = vld [vmem:[%s4366_s1 + $0x3cc] ss:$16 sps:$4 sm:$0xff]  }
  0x82   :  { %1833 = vmatmul.mubr.bf16.vlgmr.msra.gmra.mxu0 %v3668_v46 }
  0x83   :  { %1894 = vmatmul.mubr.bf16.vlgmr.msra.gmra.mxu1 %v3672_v47  ;;  %1923 = vmatpush1.bf16.msra.mxu0 %v2946_v38  ;;  %v3004_v38 = vld [vmem:[%s4366_s1 + $0x1c8] ss:$16 sps:$4 sm:$0xff]  }
  0x84   :  { %1984 = vmatpush1.bf16.msra.mxu1 %v2949_v39  ;;  %1924 = vmatprep.subr.bf16.mxu0 %v2954_v50  ;;  %v3007_v39 = vld [vmem:[%s4366_s1 + $0x3c8] ss:$16 sps:$4 sm:$0xff]   ;;  %v3018_v50 = vld [vmem:[%s4366_s1 + $0x18c] ss:$16 sps:$4 sm:$0xff]  }
  0x85   :  { %1985 = vmatprep.subr.bf16.mxu1 %v2957_v51  ;;  %1842 = vmatprep.mubr.bf16.mxu0 %v3686_v52  ;;  %v3021_v51 = vld [vmem:[%s4366_s1 + $0x38c] ss:$16 sps:$4 sm:$0xff]  }
  0x86   :  { %1903 = vmatprep.mubr.bf16.mxu1 %v3688_v54 }
  0x87   :  { %1925 = vmatpush1.bf16.msra.mxu0 %v2952_v56  ;;  %v3016_v56 = vld [vmem:[%s4366_s1 + $0x188] ss:$16 sps:$4 sm:$0xff]  }
  0x88   :  { %1986 = vmatpush1.bf16.msra.mxu1 %v2955_v57  ;;  %1926 = vmatprep.subr.bf16.mxu0 %v2960_v60  ;;  %v3019_v57 = vld [vmem:[%s4366_s1 + $0x388] ss:$16 sps:$4 sm:$0xff]   ;;  %v3024_v60 = vld [vmem:[%s4366_s1 + $0x16c] ss:$16 sps:$4 sm:$0xff]  }
  0x89   :  { %1987 = vmatprep.subr.bf16.mxu1 %v2963_v61  ;;  %v3027_v61 = vld [vmem:[%s4366_s1 + $0x36c] ss:$16 sps:$4 sm:$0xff]  }
  0x8a   :  { %1843 = vmatmul.mubr.bf16.gmra.mxu0 %v3712_v0 }
  0x8b   :  { %1904 = vmatmul.mubr.bf16.gmra.mxu1 %v3714_v1  ;;  %1927 = vmatpush1.bf16.msra.mxu0 %v2958_v62  ;;  %v3022_v62 = vld [vmem:[%s4366_s1 + $0x168] ss:$16 sps:$4 sm:$0xff]  }
  0x8c   :  { %1988 = vmatpush1.bf16.msra.mxu1 %v2961_v63  ;;  %1928 = vmatprep.subr.bf16.mxu0 %v2966_v4  ;;  %v3025_v63 = vld [vmem:[%s4366_s1 + $0x368] ss:$16 sps:$4 sm:$0xff]  }
  0x8d   :  { %1989 = vmatprep.subr.bf16.mxu1 %v2969_v5  ;;  %1852 = vmatprep.mubr.bf16.mxu0 %v3728_v6  ;;  %v3028_v4 = vld [vmem:[%s4366_s1 + $0x148] ss:$16 sps:$4 sm:$0xff]  }
  0x8e   :  { %1913 = vmatprep.mubr.bf16.mxu1 %v3730_v7  ;;  %v3031_v5 = vld [vmem:[%s4366_s1 + $0x348] ss:$16 sps:$4 sm:$0xff]  }
  0x8f   :  { %1929 = vmatpush1.bf16.msra.mxu0 %v2964_v10  ;;  %v3036_v10 = vld [vmem:[%s4366_s1 + $0x12c] ss:$16 sps:$4 sm:$0xff]  }
  0x90   :  { %1990 = vmatpush1.bf16.msra.mxu1 %v2967_v11  ;;  %1930 = vmatprep.subr.bf16.mxu0 %v2974_v12  ;;  %v3039_v11 = vld [vmem:[%s4366_s1 + $0x32c] ss:$16 sps:$4 sm:$0xff]   ;;  %v3034_v12 = vld [vmem:[%s4366_s1 + $0x128] ss:$16 sps:$4 sm:$0xff]  }
  0x91   :  { %1991 = vmatprep.subr.bf16.mxu1 %v2977_v13  ;;  %v3037_v13 = vld [vmem:[%s4366_s1 + $0x328] ss:$16 sps:$4 sm:$0xff]  }
  0x92   :  { %1853 = vmatmul.mubr.bf16.gmra.mxu0 %v3748_v14 }
  0x93   :  { %1914 = vmatmul.mubr.bf16.gmra.mxu1 %v3756_v17  ;;  %1931 = vmatpush1.bf16.msra.mxu0 %v2972_v15  ;;  %v3042_v15 = vld [vmem:[%s4366_s1 + $0x10c] ss:$16 sps:$4 sm:$0xff]  }
  0x94   :  { %1992 = vmatpush1.bf16.msra.mxu1 %v2975_v16  ;;  %1932 = vmatprep.subr.bf16.mxu0 %v2982_v18  ;;  %v3045_v16 = vld [vmem:[%s4366_s1 + $0x30c] ss:$16 sps:$4 sm:$0xff]   ;;  %v3040_v18 = vld [vmem:[%s4366_s1 + $0x108] ss:$16 sps:$4 sm:$0xff]  }
  0x95   :  { %1993 = vmatprep.subr.bf16.mxu1 %v2985_v19  ;;  %1954 = vmatprep.mubr.bf16.mxu0 %v3327_v53  ;;  %v2997_v53 = vld [vmem:[%s4366_s1 + $0x20c] ss:$16 sps:$4 sm:$0xff]   ;;  %v3043_v19 = vld [vmem:[%s4366_s1 + $0x308] ss:$16 sps:$4 sm:$0xff]  }
  0x96   :  { %2015 = vmatprep.mubr.bf16.mxu1 %v3332_v55  ;;  %v2992_v55 = vld [vmem:[%s4366_s1 + $0x8] ss:$16 sps:$4 sm:$0xff]  }
  0x97   :  { %1933 = vmatpush1.bf16.msra.mxu0 %v2980_v20  ;;  %v3048_v20 = vld [vmem:[%s4366_s1 + $0x4ec] ss:$16 sps:$4 sm:$0xff]  }
  0x98   :  { %1994 = vmatpush1.bf16.msra.mxu1 %v2983_v21  ;;  %1934 = vmatprep.subr.bf16.mxu0 %v2988_v22  ;;  %v3051_v21 = vld [vmem:[%s4366_s1 + $0x6ec] ss:$16 sps:$4 sm:$0xff]   ;;  %v3046_v22 = vld [vmem:[%s4366_s1 + $0x4e8] ss:$16 sps:$4 sm:$0xff]  }
  0x99   :  { %1995 = vmatprep.subr.bf16.mxu1 %v2991_v23  ;;  %v3049_v23 = vld [vmem:[%s4366_s1 + $0x6e8] ss:$16 sps:$4 sm:$0xff]  }
  0x9b   :  { %1935 = vmatpush1.bf16.msra.mxu0 %v2986_v25  ;;  %v3054_v25 = vld [vmem:[%s4366_s1 + $0x4cc] ss:$16 sps:$4 sm:$0xff]  }
  0x9c   :  { %1996 = vmatpush1.bf16.msra.mxu1 %v2989_v26  ;;  %1936 = vmatprep.subr.bf16.mxu0 %v2994_v27  ;;  %v3057_v26 = vld [vmem:[%s4366_s1 + $0x6cc] ss:$16 sps:$4 sm:$0xff]   ;;  %v3052_v27 = vld [vmem:[%s4366_s1 + $0x4c8] ss:$16 sps:$4 sm:$0xff]  }
  0x9d   :  { %1997 = vmatprep.subr.bf16.mxu1 %v2997_v53  ;;  %v3055_v53 = vld [vmem:[%s4366_s1 + $0x6c8] ss:$16 sps:$4 sm:$0xff]  }
  0x9f   :  { %1937 = vmatpush1.bf16.msra.mxu0 %v2992_v55  ;;  %v3060_v55 = vld [vmem:[%s4366_s1 + $0x4ac] ss:$16 sps:$4 sm:$0xff]  }
  0xa0   :  { %1998 = vmatpush1.bf16.msra.mxu1 %v2995_v28  ;;  %1938 = vmatprep.subr.bf16.mxu0 %v3000_v32  ;;  %v3061_v28 = vld [vmem:[%s4366_s1 + $0x6a8] ss:$16 sps:$4 sm:$0xff]   ;;  %v3066_v32 = vld [vmem:[%s4366_s1 + $0x48c] ss:$16 sps:$4 sm:$0xff]  }
  0xa1   :  { %1999 = vmatprep.subr.bf16.mxu1 %v3003_v33  ;;  %v3067_v33 = vld [vmem:[%s4366_s1 + $0x688] ss:$16 sps:$4 sm:$0xff]  }
  0xa3   :  { %1939 = vmatpush2.bf16.msra.mxu0 %v2998_v34  ;;  %v3072_v34 = vld [vmem:[%s4366_s1 + $0x46c] ss:$16 sps:$4 sm:$0xff]  }
  0xa4   :  { %2000 = vmatpush2.bf16.msra.mxu1 %v3001_v35  ;;  %1940 = vmatprep.subr.bf16.mxu0 %v3006_v36  ;;  %v3073_v35 = vld [vmem:[%s4366_s1 + $0x668] ss:$16 sps:$4 sm:$0xff]   ;;  %v3078_v36 = vld [vmem:[%s4366_s1 + $0x44c] ss:$16 sps:$4 sm:$0xff]  }
  0xa5   :  { %2001 = vmatprep.subr.bf16.mxu1 %v3009_v37  ;;  %v3079_v37 = vld [vmem:[%s4366_s1 + $0x648] ss:$16 sps:$4 sm:$0xff]  }
  0xa7   :  { %1941 = vmatpush2.bf16.msra.mxu0 %v3004_v38  ;;  %v3084_v38 = vld [vmem:[%s4366_s1 + $0x42c] ss:$16 sps:$4 sm:$0xff]  }
  0xa8   :  { %2002 = vmatpush2.bf16.msra.mxu1 %v3007_v39  ;;  %1942 = vmatprep.subr.bf16.mxu0 %v3012_v44  ;;  %v3085_v39 = vld [vmem:[%s4366_s1 + $0x628] ss:$16 sps:$4 sm:$0xff]   ;;  %v3090_v44 = vld [vmem:[%s4366_s1 + $0x40c] ss:$16 sps:$4 sm:$0xff]  }
  0xa9   :  { %2003 = vmatprep.subr.bf16.mxu1 %v3015_v45  ;;  %v3091_v45 = vld [vmem:[%s4366_s1 + $0x608] ss:$16 sps:$4 sm:$0xff]  }
  0xab   :  { %1943 = vmatpush2.bf16.msra.mxu0 %v3010_v48  ;;  %v3096_v48 = vld [vmem:[%s4366_s1 + $0x5ec] ss:$16 sps:$4 sm:$0xff]  }
  0xac   :  { %2004 = vmatpush2.bf16.msra.mxu1 %v3013_v49  ;;  %1944 = vmatprep.subr.bf16.mxu0 %v3018_v50  ;;  %v3099_v49 = vld [vmem:[%s4366_s1 + $0x7ec] ss:$16 sps:$4 sm:$0xff]   ;;  %v3094_v50 = vld [vmem:[%s4366_s1 + $0x5e8] ss:$16 sps:$4 sm:$0xff]  }
  0xad   :  { %2005 = vmatprep.subr.bf16.mxu1 %v3021_v51  ;;  %v3097_v51 = vld [vmem:[%s4366_s1 + $0x7e8] ss:$16 sps:$4 sm:$0xff]  }
  0xaf   :  { %1945 = vmatpush2.bf16.msra.mxu0 %v3016_v56  ;;  %v3102_v56 = vld [vmem:[%s4366_s1 + $0x5cc] ss:$16 sps:$4 sm:$0xff]  }
  0xb0   :  { %2006 = vmatpush2.bf16.msra.mxu1 %v3019_v57  ;;  %1946 = vmatprep.subr.bf16.mxu0 %v3024_v60  ;;  %v3105_v57 = vld [vmem:[%s4366_s1 + $0x7cc] ss:$16 sps:$4 sm:$0xff]   ;;  %v3100_v60 = vld [vmem:[%s4366_s1 + $0x5c8] ss:$16 sps:$4 sm:$0xff]  }
  0xb1   :  { %2007 = vmatprep.subr.bf16.mxu1 %v3027_v61  ;;  %v3103_v61 = vld [vmem:[%s4366_s1 + $0x7c8] ss:$16 sps:$4 sm:$0xff]  }
  0xb3   :  { %1947 = vmatpush2.bf16.msra.mxu0 %v3022_v62  ;;  %v3108_v62 = vld [vmem:[%s4366_s1 + $0x5ac] ss:$16 sps:$4 sm:$0xff]  }
  0xb4   :  { %2008 = vmatpush2.bf16.msra.mxu1 %v3025_v63  ;;  %1948 = vmatprep.subr.bf16.mxu0 %v3030_v2  ;;  %v3111_v63 = vld [vmem:[%s4366_s1 + $0x7ac] ss:$16 sps:$4 sm:$0xff]   ;;  %v3106_v2 = vld [vmem:[%s4366_s1 + $0x5a8] ss:$16 sps:$4 sm:$0xff]  }
  0xb5   :  { %2009 = vmatprep.subr.bf16.mxu1 %v3033_v3  ;;  %v3109_v3 = vld [vmem:[%s4366_s1 + $0x7a8] ss:$16 sps:$4 sm:$0xff]  }
  0xb7   :  { %1949 = vmatpush2.bf16.msra.mxu0 %v3028_v4  ;;  %v3114_v4 = vld [vmem:[%s4366_s1 + $0x58c] ss:$16 sps:$4 sm:$0xff]  }
  0xb8   :  { %2010 = vmatpush2.bf16.msra.mxu1 %v3031_v5  ;;  %1950 = vmatprep.subr.bf16.mxu0 %v3036_v10  ;;  %v3117_v5 = vld [vmem:[%s4366_s1 + $0x78c] ss:$16 sps:$4 sm:$0xff]   ;;  %v3112_v10 = vld [vmem:[%s4366_s1 + $0x588] ss:$16 sps:$4 sm:$0xff]  }
  0xb9   :  { %2011 = vmatprep.subr.bf16.mxu1 %v3039_v11  ;;  %v3115_v11 = vld [vmem:[%s4366_s1 + $0x788] ss:$16 sps:$4 sm:$0xff]  }
  0xbb   :  { %1951 = vmatpush2.bf16.msra.mxu0 %v3034_v12  ;;  %v3120_v12 = vld [vmem:[%s4366_s1 + $0x56c] ss:$16 sps:$4 sm:$0xff]  }
  0xbc   :  { %2012 = vmatpush2.bf16.msra.mxu1 %v3037_v13  ;;  %1952 = vmatprep.subr.bf16.mxu0 %v3042_v15  ;;  %v3123_v13 = vld [vmem:[%s4366_s1 + $0x76c] ss:$16 sps:$4 sm:$0xff]   ;;  %v3118_v15 = vld [vmem:[%s4366_s1 + $0x568] ss:$16 sps:$4 sm:$0xff]  }
  0xbd   :  { %2013 = vmatprep.subr.bf16.mxu1 %v3045_v16  ;;  %v3121_v16 = vld [vmem:[%s4366_s1 + $0x768] ss:$16 sps:$4 sm:$0xff]  }
  0xbf   :  { %1953 = vmatpush2.bf16.msra.mxu0 %v3040_v18  ;;  %v3126_v18 = vld [vmem:[%s4366_s1 + $0x54c] ss:$16 sps:$4 sm:$0xff]  }
  0xc0   :  { %2014 = vmatpush2.bf16.msra.mxu1 %v3043_v19  ;;  %2044 = vmatprep.subr.bf16.mxu0 %v3048_v20  ;;  %v3129_v19 = vld [vmem:[%s4366_s1 + $0x74c] ss:$16 sps:$4 sm:$0xff]   ;;  %v3124_v20 = vld [vmem:[%s4366_s1 + $0x548] ss:$16 sps:$4 sm:$0xff]  }
  0xc1   :  { %2105 = vmatprep.subr.bf16.mxu1 %v3051_v21  ;;  %v3127_v21 = vld [vmem:[%s4366_s1 + $0x748] ss:$16 sps:$4 sm:$0xff]  }
  0xc2   :  { %1955 = vmatmul.mubr.bf16.vlgmr.msra.gmra.mxu0 %v3384_v8  ;;  %v3063_v8 = vld [vmem:[%s4366_s1 + $0x6ac] ss:$16 sps:$4 sm:$0xff]  }
  0xc3   :  { %2016 = vmatmul.mubr.bf16.vlgmr.msra.gmra.mxu1 %v3386_v9  ;;  %2045 = vmatpush1.bf16.msra.mxu0 %v3046_v22  ;;  %v3058_v9 = vld [vmem:[%s4366_s1 + $0x4a8] ss:$16 sps:$4 sm:$0xff]   ;;  %v3132_v22 = vld [vmem:[%s4366_s1 + $0x52c] ss:$16 sps:$4 sm:$0xff]  }
  0xc4   :  { %2106 = vmatpush1.bf16.msra.mxu1 %v3049_v23  ;;  %2046 = vmatprep.subr.bf16.mxu0 %v3054_v25  ;;  %v3135_v23 = vld [vmem:[%s4366_s1 + $0x72c] ss:$16 sps:$4 sm:$0xff]   ;;  %v3130_v25 = vld [vmem:[%s4366_s1 + $0x528] ss:$16 sps:$4 sm:$0xff]  }
  0xc5   :  { %2107 = vmatprep.subr.bf16.mxu1 %v3057_v26  ;;  %1964 = vmatprep.mubr.bf16.mxu0 %v3432_v24  ;;  %v3069_v24 = vld [vmem:[%s4366_s1 + $0x68c] ss:$16 sps:$4 sm:$0xff]   ;;  %v3133_v26 = vld [vmem:[%s4366_s1 + $0x728] ss:$16 sps:$4 sm:$0xff]  }
  0xc6   :  { %2025 = vmatprep.mubr.bf16.mxu1 %v3446_v29  ;;  %v3064_v29 = vld [vmem:[%s4366_s1 + $0x488] ss:$16 sps:$4 sm:$0xff]  }
  0xc7   :  { %2047 = vmatpush1.bf16.msra.mxu0 %v3052_v27  ;;  %v3138_v27 = vld [vmem:[%s4366_s1 + $0x50c] ss:$16 sps:$4 sm:$0xff]  }
  0xc8   :  { %2108 = vmatpush1.bf16.msra.mxu1 %v3055_v53  ;;  %2048 = vmatprep.subr.bf16.mxu0 %v3060_v55  ;;  %v3141_v53 = vld [vmem:[%s4366_s1 + $0x70c] ss:$16 sps:$4 sm:$0xff]   ;;  %v3136_v55 = vld [vmem:[%s4366_s1 + $0x508] ss:$16 sps:$4 sm:$0xff]  }
  0xc9   :  { %2109 = vmatprep.subr.bf16.mxu1 %v3063_v8  ;;  %v3139_v8 = vld [vmem:[%s4366_s1 + $0x708] ss:$16 sps:$4 sm:$0xff]  }
  0xca   :  { %1965 = vmatmul.mubr.bf16.gmra.mxu0 %v3448_v30  ;;  %v3075_v30 = vld [vmem:[%s4366_s1 + $0x66c] ss:$16 sps:$4 sm:$0xff]  }
  0xcb   :  { %2026 = vmatmul.mubr.bf16.gmra.mxu1 %v3450_v31  ;;  %2049 = vmatpush1.bf16.msra.mxu0 %v3058_v9  ;;  %v3070_v31 = vld [vmem:[%s4366_s1 + $0x468] ss:$16 sps:$4 sm:$0xff]  }
  0xcc   :  { %2110 = vmatpush1.bf16.msra.mxu1 %v3061_v28  ;;  %2050 = vmatprep.subr.bf16.mxu0 %v3066_v32 }
  0xcd   :  { %2111 = vmatprep.subr.bf16.mxu1 %v3069_v24  ;;  %1974 = vmatprep.mubr.bf16.mxu0 %v3480_v40  ;;  %v3081_v40 = vld [vmem:[%s4366_s1 + $0x64c] ss:$16 sps:$4 sm:$0xff]  }
  0xce   :  { %2035 = vmatprep.mubr.bf16.mxu1 %v3482_v41  ;;  %v3076_v41 = vld [vmem:[%s4366_s1 + $0x448] ss:$16 sps:$4 sm:$0xff]  }
  0xcf   :  { %2051 = vmatpush1.bf16.msra.mxu0 %v3064_v29 }
  0xd0   :  { %2112 = vmatpush1.bf16.msra.mxu1 %v3067_v33  ;;  %2052 = vmatprep.subr.bf16.mxu0 %v3072_v34 }
  0xd1   :  { %2113 = vmatprep.subr.bf16.mxu1 %v3075_v30 }
  0xd2   :  { %1975 = vmatmul.mubr.bf16.gmra.mxu0 %v3485_v42  ;;  %v3087_v42 = vld [vmem:[%s4366_s1 + $0x62c] ss:$16 sps:$4 sm:$0xff]  }
  0xd3   :  { %2036 = vmatmul.mubr.bf16.gmra.mxu1 %v3488_v43  ;;  %2053 = vmatpush1.bf16.msra.mxu0 %v3070_v31  ;;  %v3082_v43 = vld [vmem:[%s4366_s1 + $0x428] ss:$16 sps:$4 sm:$0xff]  }
  0xd4   :  { %2114 = vmatpush1.bf16.msra.mxu1 %v3073_v35  ;;  %2054 = vmatprep.subr.bf16.mxu0 %v3078_v36 }
  0xd5   :  { %2115 = vmatprep.subr.bf16.mxu1 %v3081_v40  ;;  %2076 = vmatprep.mubr.bf16.mxu0 %v3538_v58  ;;  %v3093_v58 = vld [vmem:[%s4366_s1 + $0x60c] ss:$16 sps:$4 sm:$0xff]  }
  0xd6   :  { %2137 = vmatprep.mubr.bf16.mxu1 %v3542_v59  ;;  %v3088_v59 = vld [vmem:[%s4366_s1 + $0x408] ss:$16 sps:$4 sm:$0xff]  }
  0xd7   :  { %2055 = vmatpush1.bf16.msra.mxu0 %v3076_v41 }
  0xd8   :  { %2116 = vmatpush1.bf16.msra.mxu1 %v3079_v37  ;;  %2056 = vmatprep.subr.bf16.mxu0 %v3084_v38 }
  0xd9   :  { %2117 = vmatprep.subr.bf16.mxu1 %v3087_v42 }
  0xdb   :  { %2057 = vmatpush1.bf16.msra.mxu0 %v3082_v43 }
  0xdc   :  { %2118 = vmatpush1.bf16.msra.mxu1 %v3085_v39  ;;  %2058 = vmatprep.subr.bf16.mxu0 %v3090_v44 }
  0xdd   :  { %2119 = vmatprep.subr.bf16.mxu1 %v3093_v58 }
  0xdf   :  { %2059 = vmatpush1.bf16.msra.mxu0 %v3088_v59 }
  0xe0   :  { %2120 = vmatpush1.bf16.msra.mxu1 %v3091_v45  ;;  %2060 = vmatprep.subr.bf16.mxu0 %v3096_v48 }
  0xe1   :  { %2121 = vmatprep.subr.bf16.mxu1 %v3099_v49 }
  0xe3   :  { %2061 = vmatpush2.bf16.msra.mxu0 %v3094_v50 }
  0xe4   :  { %2122 = vmatpush2.bf16.msra.mxu1 %v3097_v51  ;;  %2062 = vmatprep.subr.bf16.mxu0 %v3102_v56 }
  0xe5   :  { %2123 = vmatprep.subr.bf16.mxu1 %v3105_v57 }
  0xe7   :  { %2063 = vmatpush2.bf16.msra.mxu0 %v3100_v60 }
  0xe8   :  { %2124 = vmatpush2.bf16.msra.mxu1 %v3103_v61  ;;  %2064 = vmatprep.subr.bf16.mxu0 %v3108_v62 }
  0xe9   :  { %2125 = vmatprep.subr.bf16.mxu1 %v3111_v63 }
  0xeb   :  { %2065 = vmatpush2.bf16.msra.mxu0 %v3106_v2 }
  0xec   :  { %2126 = vmatpush2.bf16.msra.mxu1 %v3109_v3  ;;  %2066 = vmatprep.subr.bf16.mxu0 %v3114_v4 }
  0xed   :  { %2127 = vmatprep.subr.bf16.mxu1 %v3117_v5 }
  0xef   :  { %2067 = vmatpush2.bf16.msra.mxu0 %v3112_v10 }
  0xf0   :  { %2128 = vmatpush2.bf16.msra.mxu1 %v3115_v11  ;;  %2068 = vmatprep.subr.bf16.mxu0 %v3120_v12 }
  0xf1   :  { %2129 = vmatprep.subr.bf16.mxu1 %v3123_v13 }
  0xf3   :  { %2069 = vmatpush2.bf16.msra.mxu0 %v3118_v15 }
  0xf4   :  { %2130 = vmatpush2.bf16.msra.mxu1 %v3121_v16  ;;  %2070 = vmatprep.subr.bf16.mxu0 %v3126_v18 }
  0xf5   :  { %2131 = vmatprep.subr.bf16.mxu1 %v3129_v19 }
  0xf7   :  { %2071 = vmatpush2.bf16.msra.mxu0 %v3124_v20 }
  0xf8   :  { %2132 = vmatpush2.bf16.msra.mxu1 %v3127_v21  ;;  %2072 = vmatprep.subr.bf16.mxu0 %v3132_v22 }
  0xf9   :  { %2133 = vmatprep.subr.bf16.mxu1 %v3135_v23 }
  0xfb   :  { %2073 = vmatpush2.bf16.msra.mxu0 %v3130_v25 }
  0xfc   :  { %2134 = vmatpush2.bf16.msra.mxu1 %v3133_v26  ;;  %2074 = vmatprep.subr.bf16.mxu0 %v3138_v27 }
  0xfd   :  { %2135 = vmatprep.subr.bf16.mxu1 %v3141_v53 }
  0xff   :  { %2075 = vmatpush2.bf16.msra.mxu0 %v3136_v55 }
 0x100   :  { %2136 = vmatpush2.bf16.msra.mxu1 %v3139_v8 }
 0x102   :  { %v1712_v9 = vpop.f32.mrf.mxu0  ;;  %2077 = vmatmul.mubr.bf16.vlgmr.msra.gmra.mxu0 %v3668_v46 }
 0x103   :  { %v1773_v28 = vpop.f32.mrf.mxu1  ;;  %2138 = vmatmul.mubr.bf16.vlgmr.msra.gmra.mxu1 %v3672_v47  ;;  %2086 = vmatprep.mubr.bf16.mxu0 %v3686_v52 }
 0x104   :  { %v1774_v32 = vadd.f32 %v1773_v28, %v1712_v9  ;;  %2147 = vmatprep.mubr.bf16.mxu1 %v3688_v54  ;;  %v1714_v24 = vpop.f32.mrf.mxu0 }
 0x105   :  { %v1775_v29 = vpop.f32.mrf.mxu1 }
 0x106   :  { %v1776_v33 = vadd.f32 %v1775_v29, %v1714_v24  ;;  %v1716_v34 = vpop.f32.mrf.mxu0 }
 0x107   :  { %v1777_v30 = vpop.f32.mrf.mxu1 }
 0x108   :  { %v1778_v31 = vadd.f32 %v1777_v30, %v1716_v34  ;;  %v1718_v35 = vpop.f32.mrf.mxu0 }
 0x109   :  { %v1779_v36 = vpop.f32.mrf.mxu1 }
 0x10a   :  { %v1780_v40 = vadd.f32 %v1779_v36, %v1718_v35  ;;  %2087 = vmatmul.mubr.bf16.gmra.mxu0 %v3712_v0  ;;  %v1722_v46 = vpop.f32.mrf.mxu0 }
 0x10b   :  { %2148 = vmatmul.mubr.bf16.gmra.mxu1 %v3714_v1  ;;  %2096 = vmatprep.mubr.bf16.mxu0 %v3728_v6  ;;  %v1783_v47 = vpop.f32.mrf.mxu1 }
 0x10c   :  { %2157 = vmatprep.mubr.bf16.mxu1 %v3730_v7  ;;  %v1784_v52 = vadd.f32 %v1783_v47, %v1722_v46  ;;  %v1724_v54 = vpop.f32.mrf.mxu0 }
 0x10d   :  { %v1785_v41 = vpop.f32.mrf.mxu1 }
 0x10e   :  { %v1786_v37 = vadd.f32 %v1785_v41, %v1724_v54  ;;  %v1726_v38 = vpop.f32.mrf.mxu0 }
 0x10f   :  { %v1787_v42 = vpop.f32.mrf.mxu1 }
 0x110   :  { %v1788_v43 = vadd.f32 %v1787_v42, %v1726_v38  ;;  %v1728_v0 = vpop.f32.mrf.mxu0 }
 0x111   :  { %v1789_v39 = vpop.f32.mrf.mxu1 }
 0x112   :  { %2097 = vmatmul.mubr.bf16.gmra.mxu0 %v3748_v14  ;;  %v1790_v1 = vadd.f32 %v1789_v39, %v1728_v0  ;;  %v1732_v44 = vpop.f32.mrf.mxu0 }
 0x113   :  { %2158 = vmatmul.mubr.bf16.gmra.mxu1 %v3756_v17  ;;  %v1793_v6 = vpop.f32.mrf.mxu1 }
 0x114   :  { %v1794_v58 = vadd.f32 %v1793_v6, %v1732_v44  ;;  %v1734_v7 = vpop.f32.mrf.mxu0 }
 0x115   :  { %v1795_v59 = vpop.f32.mrf.mxu1 }
 0x116   :  { %v1796_v45 = vadd.f32 %v1795_v59, %v1734_v7  ;;  %v1736_v48 = vpop.f32.mrf.mxu0 }
 0x117   :  { %v1797_v49 = vpop.f32.mrf.mxu1 }
 0x118   :  { %v1737_v50 = vpop.f32.mrf.mxu0 }
 0x119   :  { %v1798_v51 = vpop.f32.mrf.mxu1 }
 0x142   :  { %v1834_v56 = vpop.f32.mrf.mxu0 }
 0x143   :  { %v1895_v14 = vpop.f32.mrf.mxu1  ;;  %v1835_v57 = vadd.f32 %v1834_v56, %v1774_v32 }
 0x144   :  { %v1836_v17 = vpop.f32.mrf.mxu0 }
 0x145   :  { %v1897_v60 = vpop.f32.mrf.mxu1  ;;  %v4108_v61 = vadd.f32 %v1895_v14, %v1835_v57  ;;  %v1837_v62 = vadd.f32 %v1836_v17, %v1776_v33 }
 0x146   :  { %v1838_v63 = vpop.f32.mrf.mxu0 }
 0x147   :  { %v1899_v2 = vpop.f32.mrf.mxu1  ;;  %v4110_v3 = vadd.f32 %v1897_v60, %v1837_v62  ;;  %v1839_v4 = vadd.f32 %v1838_v63, %v1778_v31 }
 0x148   :  { %v1840_v5 = vpop.f32.mrf.mxu0 }
 0x149   :  { %v1901_v10 = vpop.f32.mrf.mxu1  ;;  %v4112_v11 = vadd.f32 %v1899_v2, %v1839_v4  ;;  %v1841_v12 = vadd.f32 %v1840_v5, %v1780_v40 }
 0x14a   :  { %v1844_v13 = vpop.f32.mrf.mxu0 }
 0x14b   :  { %v1905_v15 = vpop.f32.mrf.mxu1  ;;  %v4114_v16 = vadd.f32 %v1901_v10, %v1841_v12  ;;  %v1845_v18 = vadd.f32 %v1844_v13, %v1784_v52  ;;  %v2176_v12 = vlaneseq }
 0x14c   :  { %v1846_v19 = vpop.f32.mrf.mxu0 }
 0x14d   :  { %v1907_v20 = vpop.f32.mrf.mxu1  ;;  %v1847_v21 = vadd.f32 %v1846_v19, %v1786_v37  ;;  %v4116_v22 = vadd.f32 %v1905_v15, %v1845_v18  ;;  %v4155_v13 = vshrl.u32 %v2176_v12, 7 }
 0x14e   :  { %v1848_v23 = vpop.f32.mrf.mxu0 }
 0x14f   :  { %v1909_v25 = vpop.f32.mrf.mxu1  ;;  %v1849_v26 = vadd.f32 %v1848_v23, %v1788_v43  ;;  %v4118_v27 = vadd.f32 %v1907_v20, %v1847_v21  ;;  %v2236_v15 = vadd.s32 8, %v4155_v13  ;;  %v2237_v18 = vadd.s32 16, %v4155_v13 }
 0x150   :  { %v1850_v53 = vpop.f32.mrf.mxu0  ;;  %v4160_v19 = vmul.u32.u64.low 3435973837, %v4155_v13  ;;  %v4161_v20 = vmul.u32.u64.high 3435973837, %v4155_v13, %v4160_v19  ;;  %vm2178_vm9 = vcmp.lt.s32.totalorder %v4155_v13, 7 }
 0x151   :  { %v1911_v55 = vpop.f32.mrf.mxu1  ;;  %v1851_v8 = vadd.f32 %v1850_v53, %v1790_v1  ;;  %v4120_v9 = vadd.f32 %v1909_v25, %v1849_v26  ;;  %v4163_v21 = vmul.u32.u64.low 3435973837, %v2236_v15  ;;  %v4164_v23 = vmul.u32.u64.high 3435973837, %v2236_v15, %v4163_v21 }
 0x152   :  { %v1854_v28 = vpop.f32.mrf.mxu0  ;;  %v4166_v25 = vmul.u32.u64.low 3435973837, %v2237_v18  ;;  %v4167_v26 = vmul.u32.u64.high 3435973837, %v2237_v18, %v4166_v25  ;;  %v2238_v53 = vadd.s32 24, %v4155_v13 }
 0x153   :  { %v1915_v32 = vpop.f32.mrf.mxu1  ;;  %v1855_v24 = vadd.f32 %v1854_v28, %v1794_v58  ;;  %v4122_v29 = vadd.f32 %v1911_v55, %v1851_v8  ;;  %v2239_v55 = vadd.s32 32, %v4155_v13  ;;  %v2246_v8 = vshrl.u32 %v4161_v20, 2 }
 0x154   :  { %v1856_v33 = vpop.f32.mrf.mxu0 }
 0x155   :  { %v1917_v34 = vpop.f32.mrf.mxu1  ;;  %v1857_v30 = vadd.f32 %v1856_v33, %v1796_v45  ;;  %v4124_v31 = vadd.f32 %v1915_v32, %v1855_v24  ;;  %v4172_v28 = vmul.u32.u64.low 3435973837, %v2238_v53  ;;  %v4173_v32 = vmul.u32.u64.high 3435973837, %v2238_v53, %v4172_v28 }
 0x156   :  { %v1858_v35 = vpop.f32.mrf.mxu0  ;;  %v2257_v24 = vshrl.u32 %v4164_v23, 2 }
 0x157   :  { %v1919_v36 = vpop.f32.mrf.mxu1  ;;  %v4126_v40 = vadd.f32 %v1917_v34, %v1857_v30  ;;  %v4176_v33 = vmul.u32.u64.low 3435973837, %v2239_v55  ;;  %v4177_v34 = vmul.u32.u64.high 3435973837, %v2239_v55, %v4176_v33  ;;  %v2268_v30 = vshrl.u32 %v4167_v26, 2 }
 0x158   :  { %v1859_v46 = vpop.f32.mrf.mxu0  ;;  %v2247_v35 = vmul.u32 5, %v2246_v8  ;;  %v2258_v36 = vmul.u32 5, %v2257_v24 }
 0x159   :  { %v1920_v47 = vpop.f32.mrf.mxu1  ;;  %v2269_v46 = vmul.u32 5, %v2268_v30 }
 0x15a   :  { %v2248_v47 = vsub.s32 %v4155_v13, %v2247_v35 }
 0x15c   :  { %vm2295_vm0 = vcmp.ne.s32.totalorder %v2248_v47, 0  ;;  %vm2300_vm1 = vcmp.lt.s32.totalorder %v2248_v47, 0 }
 0x15d   :  { %vm4188_vm6 = vmand %vm2300_vm1, %vm2295_vm0 }
 0x182   :  { %v1956_v52 = vpop.f32.mrf.mxu0 }
 0x183   :  { %v2017_v54 = vpop.f32.mrf.mxu1 }
 0x184   :  { %v4128_v41 = vadd.f32 %v2017_v54, %v1956_v52  ;;  %v1958_v37 = vpop.f32.mrf.mxu0  ;;  %v2279_v52 = vshrl.u32 %v4173_v32, 2  ;;  %v2259_v54 = vsub.s32 %v2236_v15, %v2258_v36 }
 0x185   :  { %v2019_v38 = vpop.f32.mrf.mxu1 }
 0x186   :  { %v4130_v42 = vadd.f32 %v2019_v38, %v1958_v37  ;;  %v1960_v43 = vpop.f32.mrf.mxu0  ;;  %v2290_v37 = vshrl.u32 %v4177_v34, 2  ;;  %v4183_v38 = vsub.s32 %v2237_v18, %v2269_v46  ;;  %vm2296_vm2 = vcmp.ne.s32.totalorder %v2259_v54, 0 }
 0x187   :  { %v2021_v0 = vpop.f32.mrf.mxu1  ;;  %vm2301_vm3 = vcmp.lt.s32.totalorder %v2259_v54, 0 }
 0x188   :  { %v4132_v39 = vadd.f32 %v2021_v0, %v1960_v43  ;;  %v4134_v1 = vpop.f32.mrf.mxu0  ;;  %v2280_v43 = vmul.u32 5, %v2279_v52  ;;  %vm2297_vm4 = vcmp.ne.s32.totalorder %v4183_v38, 0  ;;  %vm2302_vm5 = vcmp.lt.s32.totalorder %v4183_v38, 0  ;;  %vm4193_vm7 = vmand %vm2301_vm3, %vm2296_vm2 }
 0x189   :  { %v4136_v44 = vpop.f32.mrf.mxu1  ;;  %vm4200_vm8 = vmand %vm2302_vm5, %vm2297_vm4  ;;  %vm2385_vm5 = vcmp.lt.s32.totalorder %v2176_v12, 256 }
 0x18a   :  { %v1966_v6 = vpop.f32.mrf.mxu0  ;;  %v2024_v20 = vadd.f32 %v4136_v44, %v4134_v1 }
 0x18b   :  { %v2027_v58 = vpop.f32.mrf.mxu1 }
 0x18c   :  { %v4138_v7 = vadd.f32 %v2027_v58, %v1966_v6  ;;  %v4140_v59 = vpop.f32.mrf.mxu0  ;;  %v2291_v58 = vmul.u32 5, %v2290_v37 }
 0x18d   :  { %v4142_v45 = vpop.f32.mrf.mxu1 }
 0x18e   :  { %v1970_v48 = vpop.f32.mrf.mxu0  ;;  %v4204_v19 = vsub.s32 %v2239_v55, %v2291_v58 }
 0x18f   :  { %v2031_v49 = vpop.f32.mrf.mxu1 }
 0x190   :  { %v4144_v50 = vadd.f32 %v2031_v49, %v1970_v48  ;;  %v4146_v51 = vpop.f32.mrf.mxu0  ;;  %vm2299_vm11 = vcmp.ne.s32.totalorder %v4204_v19, 0  ;;  %vm2304_vm13 = vcmp.lt.s32.totalorder %v4204_v19, 0 }
 0x191   :  { %v4148_v56 = vpop.f32.mrf.mxu1  ;;  %vm4265_vm2 = vmand %vm2304_vm13, %vm2299_vm11 }
 0x192   :  { %v1976_v14 = vpop.f32.mrf.mxu0 }
 0x193   :  { %v2037_v57 = vpop.f32.mrf.mxu1 }
 0x194   :  { %v4150_v17 = vadd.f32 %v2037_v57, %v1976_v14  ;;  %v1978_v60 = vpop.f32.mrf.mxu0 }
 0x195   :  { %v2039_v62 = vpop.f32.mrf.mxu1 }
 0x196   :  { %v4152_v63 = vadd.f32 %v2039_v62, %v1978_v60  ;;  %v1980_v2 = vpop.f32.mrf.mxu0  ;;  %v2310_v60 = vadd.s32 5, %v2248_v47  ;;  %v2311_v62 = vadd.s32 5, %v2259_v54 }
 0x197   :  { %v2041_v4 = vpop.f32.mrf.mxu1 }
 0x198   :  { %v1981_v5 = vpop.f32.mrf.mxu0  ;;  %v2315_v25 = vsel %vm4188_vm6, %v2310_v60, %v2248_v47  ;;  %v2316_v55 = vsel %vm4193_vm7, %v2311_v62, %v2259_v54  ;;  %v4238_v47 = vadd.s32 5, %v4204_v19  ;;  %v2034_v62 = vadd.f32 %v4148_v56, %v4146_v51 }
 0x199   :  { %v2042_v10 = vpop.f32.mrf.mxu1  ;;  %v4198_v5 = vsub.s32 %v2238_v53, %v2280_v43  ;;  %vm4230_vm14 = vcmp.lt.s32.totalorder %v2315_v25, 4  ;;  %vm4253_vm0 = vcmp.lt.s32.totalorder %v2316_v55, 4 }
 0x19a   :  { %v2319_v51 = vsel %vm4265_vm2, %v4238_v47, %v4204_v19 }
 0x19b   :  { %vm2298_vm10 = vcmp.ne.s32.totalorder %v4198_v5, 0  ;;  %vm2303_vm12 = vcmp.lt.s32.totalorder %v4198_v5, 0  ;;  %v4235_v46 = vadd.s32 5, %v4198_v5  ;;  %vm4325_vm4 = vcmp.lt.s32.totalorder %v2319_v51, 4 }
 0x19c   :  { %vm4248_vm15 = vmand %vm2303_vm12, %vm2298_vm10 }
 0x1c2   :  { %v2078_v0 = vpop.f32.mrf.mxu0 }
 0x1c3   :  { %v2139_v6 = vpop.f32.mrf.mxu1  ;;  %v2079_v48 = vadd.f32 %v2078_v0, %v4128_v41  ;;  %v2312_v41 = vadd.s32 5, %v4183_v38 }
 0x1c4   :  { %v2080_v49 = vpop.f32.mrf.mxu0 }
 0x1c5   :  { %v2141_v14 = vpop.f32.mrf.mxu1  ;;  %v2081_v2 = vadd.f32 %v2080_v49, %v4130_v42  ;;  %v4208_v42 = vadd.f32 %v2139_v6, %v2079_v48  ;;  %v2317_v1 = vsel %vm4200_vm8, %v2312_v41, %v4183_v38 }
 0x1c6   :  { %v2082_v10 = vpop.f32.mrf.mxu0  ;;  %vm4257_vm1 = vcmp.lt.s32.totalorder %v2317_v1, 4 }
 0x1c7   :  { %v2143_v15 = vpop.f32.mrf.mxu1  ;;  %v2083_v21 = vadd.f32 %v2082_v10, %v4132_v39  ;;  %v4211_v23 = vadd.f32 %v2141_v14, %v2081_v2  ;;  %v2030_v39 = vadd.f32 %v4142_v45, %v4140_v59  ;;  %v2166_v24 = vrot.slane %v4208_v42, 1 }
 0x1c8   :  { %v2084_v26 = vpop.f32.mrf.mxu0 }
 0x1c9   :  { %v2145_v53 = vpop.f32.mrf.mxu1  ;;  %v2144_v8 = vadd.f32 %v2143_v15, %v2083_v21  ;;  %v2085_v28 = vadd.f32 %v2084_v26, %v2024_v20  ;;  %v2167_v35 = vrot.slane %v4211_v23, 1  ;;  %v2318_v15 = vsel %vm4248_vm15, %v4235_v46, %v4198_v5 }
 0x1ca   :  { %v2088_v44 = vpop.f32.mrf.mxu0  ;;  %vm4313_vm3 = vcmp.lt.s32.totalorder %v2318_v15, 4 }
 0x1cb   :  { %v2149_v32 = vpop.f32.mrf.mxu1  ;;  %v2168_v33 = vrot.slane %v2144_v8, 1  ;;  %v2146_v34 = vadd.f32 %v2145_v53, %v2085_v28  ;;  %v2089_v30 = vadd.f32 %v2088_v44, %v4138_v7 }
 0x1cc   :  { %v2090_v59 = vpop.f32.mrf.mxu0 }
 0x1cd   :  { %v2151_v45 = vpop.f32.mrf.mxu1  ;;  %v2185_v52 = vsel %vm2178_vm9, %v2166_v24, %v2168_v33  ;;  %v2169_v7 = vrot.slane %v2146_v34, 1  ;;  %v2150_v54 = vadd.f32 %v2149_v32, %v2089_v30  ;;  %v2091_v37 = vadd.f32 %v2090_v59, %v2030_v39 }
 0x1ce   :  { %v2189_v43 = vadd.f32 %v2185_v52, %v4108_v61  ;;  %v2092_v6 = vpop.f32.mrf.mxu0 }
 0x1cf   :  { %v2153_v58 = vpop.f32.mrf.mxu1  ;;  %v2186_v61 = vsel %vm2178_vm9, %v2167_v35, %v2169_v7  ;;  %v2170_v14 = vrot.slane %v2150_v54, 1  ;;  %v2152_v57 = vadd.f32 %v2151_v45, %v2091_v37  ;;  %v2093_v60 = vadd.f32 %v2092_v6, %v4144_v50 }
 0x1d0   :  { %v2335_v2 = vsel %vm4230_vm14, %v2189_v43, 0.0  ;;  %v2190_v4 = vadd.f32 %v2186_v61, %v4110_v3  ;;  %v2094_v41 = vpop.f32.mrf.mxu0 }
 0x1d1   :  { %v2155_v10 = vpop.f32.mrf.mxu1  ;;  %v2183_v18 = vsel %vm2178_vm9, %v2168_v33, %v2170_v14  ;;  %v2171_v20 = vrot.slane %v2152_v57, 1  ;;  %v2154_v50 = vadd.f32 %v2153_v58, %v2093_v60  ;;  %v2095_v25 = vadd.f32 %v2094_v41, %v2034_v62 }
 0x1d2   :  { %v2734_v56 = vpack.c.bf16 %v2190_v4, %v2189_v43  ;;  %v2336_v3 = vsel %vm4230_vm14, %v2190_v4, 0.0  ;;  %v2191_v21 = vadd.f32 %v2183_v18, %v4112_v11  ;;  %v2098_v26 = vpop.f32.mrf.mxu0  ;;  %v2388_v5 = vmul.f32 %v2335_v2, %v2335_v2 }
 0x1d3   :  { %v2159_v53 = vpop.f32.mrf.mxu1  ;;  %v2184_v55 = vsel %vm2178_vm9, %v2169_v7, %v2171_v20  ;;  %v2172_v8 = vrot.slane %v2154_v50, 1  ;;  %v2099_v28 = vadd.f32 %v2098_v26, %v4150_v17  ;;  %v2389_v19 = vmul.f32 %v2336_v3, %v2336_v3 }
 0x1d4   :  { %2231 = vst [vmem:[%s4368_s2] sm:$0xff] %v2734_v56  ;;  %v2337_v1 = vsel %vm4253_vm0, %v2191_v21, 0.0  ;;  %v2192_v11 = vadd.f32 %v2184_v55, %v4114_v16  ;;  %v2156_v39 = vadd.f32 %v2155_v10, %v2095_v25  ;;  %v2100_v44 = vpop.f32.mrf.mxu0 }
 0x1d5   :  { %v2161_v32 = vpop.f32.mrf.mxu1  ;;  %v2345_v33 = vadd.f32 %v2337_v1, %v2335_v2  ;;  %v2390_v34 = vmul.f32 %v2337_v1, %v2337_v1  ;;  %v2181_v30 = vsel %vm2178_vm9, %v2170_v14, %v2172_v8  ;;  %v2160_v36 = vadd.f32 %v2159_v53, %v2099_v28 }
 0x1d6   :  { %v2735_v17 = vpack.c.bf16 %v2192_v11, %v2191_v21  ;;  %v2338_v59 = vsel %vm4253_vm0, %v2192_v11, 0.0  ;;  %v2193_v45 = vadd.f32 %v2181_v30, %v4116_v22  ;;  %v2173_v46 = vrot.slane %v2156_v39, 1  ;;  %v2102_v47 = vpop.f32.mrf.mxu0 }
 0x1d7   :  { %v2163_v52 = vpop.f32.mrf.mxu1  ;;  %v2398_v7 = vadd.f32 %v2390_v34, %v2388_v5  ;;  %v2355_v16 = vadd.f32 %v2338_v59, %v2336_v3  ;;  %v2391_v54 = vmul.f32 %v2338_v59, %v2338_v59  ;;  %v2174_v37 = vrot.slane %v2160_v36, 1 }
 0x1d8   :  { %2232 = vst [vmem:[%s4368_s2 + $0x8] sm:$0xff] %v2735_v17  ;;  %v2339_v38 = vsel %vm4257_vm1, %v2193_v45, 0.0  ;;  %v2182_v43 = vsel %vm2178_vm9, %v2171_v20, %v2173_v46  ;;  %v2101_v22 = vadd.f32 %v2100_v44, %v4152_v63  ;;  %v2103_v6 = vpop.f32.mrf.mxu0 }
 0x1d9   :  { %v2164_v58 = vpop.f32.mrf.mxu1  ;;  %v2408_v49 = vadd.f32 %v2391_v54, %v2389_v19  ;;  %v2346_v61 = vadd.f32 %v2345_v33, %v2339_v38  ;;  %v2392_v14 = vmul.f32 %v2339_v38, %v2339_v38  ;;  %v2194_v57 = vadd.f32 %v2182_v43, %v4118_v27 }
 0x1da   :  { %v2179_v60 = vsel %vm2178_vm9, %v2172_v8, %v2174_v37  ;;  %v2187_v62 = vsel %vm2178_vm9, %v2174_v37, %v2166_v24  ;;  %v2162_v63 = vadd.f32 %v2161_v32, %v2101_v22 }
 0x1db   :  { %v2399_v4 = vadd.f32 %v2398_v7, %v2392_v14  ;;  %v2736_v41 = vpack.c.bf16 %v2194_v57, %v2193_v45  ;;  %v2340_v10 = vsel %vm4257_vm1, %v2194_v57, 0.0  ;;  %v2195_v27 = vadd.f32 %v2179_v60, %v4120_v9 }
 0x1dc   :  { %v2356_v15 = vadd.f32 %v2355_v16, %v2340_v10  ;;  %v2393_v18 = vmul.f32 %v2340_v10, %v2340_v10  ;;  %v2197_v20 = vadd.f32 %v2187_v62, %v4124_v31  ;;  %v2175_v42 = vrot.slane %v2162_v63, 1 }
 0x1dd   :  { %2233 = vst [vmem:[%s4368_s2 + $0x10] sm:$0xff] %v2736_v41  ;;  %v2341_v24 = vsel %vm4313_vm3, %v2195_v27, 0.0  ;;  %v3142_v45 = vmov 1966171168  }
 0x1de   :  { %v2409_v50 = vadd.f32 %v2408_v49, %v2393_v18  ;;  %v2343_v51 = vsel %vm4325_vm4, %v2197_v20, 0.0  ;;  %v2347_v48 = vadd.f32 %v2346_v61, %v2341_v24  ;;  %v2394_v56 = vmul.f32 %v2341_v24, %v2341_v24 }
 0x1df   :  { %v2396_v3 = vmul.f32 %v2343_v51, %v2343_v51  ;;  %v2180_v9 = vsel %vm2178_vm9, %v2173_v46, %v2175_v42  ;;  %v2188_v31 = vsel %vm2178_vm9, %v2175_v42, %v2167_v35  ;;  %v2369_v46 = vunpack.c.l.s4 %v3142_v45 }
 0x1e0   :  { %v2348_v21 = vadd.f32 %v2347_v48, %v2343_v51  ;;  %v2400_v25 = vadd.f32 %v2399_v4, %v2394_v56  ;;  %v2196_v26 = vadd.f32 %v2180_v9, %v4122_v29  ;;  %v2198_v53 = vadd.f32 %v2188_v31, %v4126_v40 }
 0x1e1   :  { %v2370_v38 = vunpack.c.0.s8 %v2369_v46 }
 0x1e2   :  { %v2349_v5 = vrot.slane %v2348_v21, 4  ;;  %v2401_v55 = vadd.f32 %v2400_v25, %v2396_v3  ;;  %v2737_v8 = vpack.c.bf16 %v2196_v26, %v2195_v27  ;;  %v2738_v28 = vpack.c.bf16 %v2198_v53, %v2197_v20 }
 0x1e3   :  { %v2342_v19 = vsel %vm4313_vm3, %v2196_v26, 0.0  ;;  %v2344_v1 = vsel %vm4325_vm4, %v2198_v53, 0.0  ;;  %v2373_v61 = vsub.s32 %v2370_v38, %v4155_v13 }
 0x1e4   :  { %v2350_v23 = vadd.f32 %v2349_v5, %v2348_v21  ;;  %v2402_v11 = vrot.slane %v2401_v55, 4  ;;  %2234 = vst [vmem:[%s4368_s2 + $0x18] sm:$0xff] %v2737_v8  ;;  %2235 = vst [vmem:[%s4368_s2 + $0x20] sm:$0xff] %v2738_v28  ;;  %v2357_v29 = vadd.f32 %v2356_v15, %v2342_v19  ;;  %v2395_v40 = vmul.f32 %v2342_v19, %v2342_v19 }
 0x1e5   :  { %v2397_v35 = vmul.f32 %v2344_v1, %v2344_v1 }
 0x1e6   :  { %v2351_v39 = vrot.slane %v2350_v23, 2  ;;  %v2403_v44 = vadd.f32 %v2402_v11, %v2401_v55  ;;  %v2358_v32 = vadd.f32 %v2357_v29, %v2344_v1  ;;  %v2410_v33 = vadd.f32 %v2409_v50, %v2395_v40 }
 0x1e8   :  { %v2404_v34 = vrot.slane %v2403_v44, 2  ;;  %v2359_v30 = vrot.slane %v2358_v32, 4  ;;  %v2411_v36 = vadd.f32 %v2410_v33, %v2397_v35  ;;  %v2352_v17 = vadd.f32 %v2351_v39, %v2350_v23 }
 0x1ea   :  { %v2360_v59 = vadd.f32 %v2359_v30, %v2358_v32  ;;  %v2412_v47 = vrot.slane %v2411_v36, 4  ;;  %v2405_v52 = vadd.f32 %v2404_v34, %v2403_v44  ;;  %v2353_v54 = vrot.slane %v2352_v17, 1 }
 0x1ec   :  { %v2361_v7 = vrot.slane %v2360_v59, 2  ;;  %v2413_v16 = vadd.f32 %v2412_v47, %v2411_v36  ;;  %v2406_v0 = vrot.slane %v2405_v52, 1  ;;  %v2354_v58 = vadd.f32 %v2353_v54, %v2352_v17 }
 0x1ee   :  { %v2362_v37 = vadd.f32 %v2361_v7, %v2360_v59  ;;  %v2414_v43 = vrot.slane %v2413_v16, 2  ;;  %v2407_v57 = vadd.f32 %v2406_v0, %v2405_v52 }
 0x1f0   :  { %v2363_v22 = vrot.slane %v2362_v37, 1  ;;  %v2415_v6 = vadd.f32 %v2414_v43, %v2413_v16 }
 0x1f2   :  { %v2364_v49 = vadd.f32 %v2363_v22, %v2362_v37  ;;  %v2416_v14 = vrot.slane %v2415_v6, 1 }
 0x1f4   :  { %v2367_v60 = vcombine.low %v2354_v58, %v2364_v49  ;;  %v2417_v62 = vadd.f32 %v2416_v14, %v2415_v6 }
 0x1f6   :  { %v2374_v2 = vrot.slane %v2367_v60, %v2373_v61  ;;  %v2420_v63 = vcombine.low %v2407_v57, %v2417_v62 }
 0x1f8   :  { %v2381_v4 = vrot.slane %v2374_v2, %v2373_v61  ;;  %v2427_v41 = vrot.slane %v2420_v63, %v2373_v61 }
 0x1fa   :  { %2387 = vst.msk [vmem:[%s4369_s3] sm:$0x3] %vm2385_vm5, %v2381_v4  ;;  %v2434_v10 = vrot.slane %v2427_v41, %v2373_v61 }
 0x1fc   :  { %2436 = vst.msk [vmem:[%s4370_s4] sm:$0x3] %vm2385_vm5, %v2434_v10 }

</bundles_post_ra>
